<compile_context>
chip_gen: v6e
topology: v6e:2x2x1
jax: 0.10.0
libtpu: 0.0.40
codegen_flags: <defaults>
</compile_context>

<pallas_src>
import math

import jax
import jax.numpy as jnp
from jax.experimental import pallas as pl
from jax.experimental.pallas import tpu as pltpu

# ---- hyper-parameters (match nn.TransformerEncoderLayer defaults) ----
HIDDEN = 32
NUM_HEADS = 4
HEAD_DIM = HIDDEN // NUM_HEADS
NUM_LAYERS = 2
FFN_DIM = 2048          # PyTorch default dim_feedforward
OUTPUT_SIZE = 1
LN_EPS = 1e-5           # PyTorch default layer_norm_eps

SEQ = 8
BATCH = 2


def _layer_norm(y, w, b):
    # y: (rows, H); w, b: (1, H)
    mean = jnp.mean(y, axis=-1, keepdims=True)
    var = jnp.mean((y - mean) ** 2, axis=-1, keepdims=True)
    return (y - mean) * jax.lax.rsqrt(var + LN_EPS) * w + b


def transformer_forecaster_kernel(x_ref, vecs_ref, wqkv_ref, wo_ref,
                                  l1wb_ref, l2w_ref, out_ref):
    N, H = x_ref.shape                 # N = B*S, batch-major rows (b*S + s)
    S = SEQ
    B = N // S
    scale = 1.0 / math.sqrt(HEAD_DIM)

    # positional encoding: rows 0..N-1 of the packed vector table are the
    # pre-tiled pe rows, so x + pe is one vector add.
    x = x_ref[...] + vecs_ref[0:N, :]                          # (N, H) f32

    for l in range(NUM_LAYERS):                                # static unroll
        last = (l == NUM_LAYERS - 1)
        base = N + 6 * l
        opb = vecs_ref[base + 0:base + 1, :]                   # (1, H) out_proj bias
        l2b = vecs_ref[base + 1:base + 2, :]                   # linear2 bias
        n1w = vecs_ref[base + 2:base + 3, :]                   # norm1 weight
        n1b = vecs_ref[base + 3:base + 4, :]                   # norm1 bias
        n2w = vecs_ref[base + 4:base + 5, :]                   # norm2 weight
        n2b = vecs_ref[base + 5:base + 6, :]                   # norm2 bias

        # ---------- multi-head self-attention (heads split on host) ----------
        attn_out = None
        for h in range(NUM_HEADS):                             # static unroll
            iq = (l * 3 + 0) * NUM_HEADS + h
            ik = (l * 3 + 1) * NUM_HEADS + h
            iv = (l * 3 + 2) * NUM_HEADS + h
            # weight rows 0:H, bias = row H (packed on host)
            qh = jnp.dot(x, wqkv_ref[iq, 0:H, :],
                         preferred_element_type=jnp.float32) + wqkv_ref[iq, H:H + 1, :]
            kh = jnp.dot(x, wqkv_ref[ik, 0:H, :],
                         preferred_element_type=jnp.float32) + wqkv_ref[ik, H:H + 1, :]
            vh = jnp.dot(x, wqkv_ref[iv, 0:H, :],
                         preferred_element_type=jnp.float32) + wqkv_ref[iv, H:H + 1, :]

            q3 = qh.reshape(B, S, HEAD_DIM)                    # cheap: minor dim kept
            k3 = kh.reshape(B, S, HEAD_DIM)
            v3 = vh.reshape(B, S, HEAD_DIM)

            s = jnp.einsum('bse,bte->bst', q3, k3,
                           preferred_element_type=jnp.float32) * scale
            s = s - jnp.max(s, axis=-1, keepdims=True)
            p = jnp.exp(s)
            p = p * pl.reciprocal(jnp.sum(p, axis=-1, keepdims=True), approx=True)
            ctx = jnp.einsum('bst,bte->bse', p, v3,
                             preferred_element_type=jnp.float32)   # (B, S, HD)

            # out_proj folded per head: sum_h ctx_h @ Wo[h*HD:(h+1)*HD, :]
            # (no lane concat).  In the last layer only the last timestep feeds
            # anything downstream, so trim before the out_proj matmul.
            ctx2 = ctx[:, S - 1, :] if last else ctx.reshape(N, HEAD_DIM)
            part = jnp.dot(ctx2, wo_ref[l * NUM_HEADS + h],
                           preferred_element_type=jnp.float32)     # (rows, H)
            attn_out = part if attn_out is None else attn_out + part
        attn_out = attn_out + opb
        # dropout (p=0.1) is identity in eval/inference mode

        x_res = x.reshape(B, S, H)[:, S - 1, :] if last else x     # (rows, H)
        y = _layer_norm(x_res + attn_out, n1w, n1b)

        # ---------- feed-forward (relu), bf16 weights, f32 accumulate ----------
        w1 = l1wb_ref[l, 0:HIDDEN, :]                               # (H, FF) bf16
        b1 = l1wb_ref[l, HIDDEN:HIDDEN + 1, :].astype(jnp.float32)  # (1, FF)
        h1 = jnp.maximum(
            jnp.dot(y.astype(jnp.bfloat16), w1,
                    preferred_element_type=jnp.float32) + b1, 0.0)
        h2 = jnp.dot(h1.astype(jnp.bfloat16), l2w_ref[l],
                     preferred_element_type=jnp.float32) + l2b
        x = _layer_norm(y + h2, n2w, n2b)                           # (rows, H)

    # ---------- head: fc_out on the last timestep (x is already (B, H)) ----------
    r_fc = N + 6 * NUM_LAYERS
    fcw = vecs_ref[r_fc:r_fc + 1, :]                                # (1, H)
    fcb = vecs_ref[r_fc + 1:r_fc + 2, 0:1]                          # (1, 1)
    out_ref[...] = jnp.sum(x * fcw, axis=-1, keepdims=True) + fcb   # (B, 1)


def positional_encoding(seq_len, d_model):
    position = jnp.arange(seq_len, dtype=jnp.float32)[:, None]
    div_term = jnp.exp(jnp.arange(0, d_model, 2, dtype=jnp.float32)
                       * (-math.log(10000.0) / d_model))
    pe = jnp.zeros((seq_len, d_model), jnp.float32)
    pe = pe.at[:, 0::2].set(jnp.sin(position * div_term))
    pe = pe.at[:, 1::2].set(jnp.cos(position * div_term))
    return pe


def init_params(key):
    """Synthetic parameters, pre-packed for the kernel (x @ W layout).

    Attention weights are split per head on the host so the kernel never
    lane-slices activations:
      wqkvb[(l*3+p)*NH + h] = [W_{q|k|v}[:, h*HD:(h+1)*HD] ; bias row]  p in {0,1,2}
      wo[l*NH + h]          = W_o[h*HD:(h+1)*HD, :]
    linear1 bias rides as the last row of l1wb; every other small vector lives
    in the packed (rows, H) table `pvecs`.
    """
    L, H, NH, HD, FF = NUM_LAYERS, HIDDEN, NUM_HEADS, HEAD_DIM, FFN_DIM
    ks = jax.random.split(key, 7)

    def nrm(k, shape, scale=0.05):
        return jax.random.normal(k, shape, jnp.float32) * scale

    wqkv = nrm(ks[0], (L * 3 * NH, H, HD))                   # q/k/v per-head weights
    bqkv = nrm(ks[1], (L * 3 * NH, 1, HD), 0.02)             # q/k/v per-head biases
    wqkvb = jnp.concatenate([wqkv, bqkv], axis=1)            # (L*3*NH, H+1, HD)
    wo = nrm(ks[2], (L * NH, HD, H))                         # out_proj per-head slabs

    l1w = nrm(ks[3], (L, H, FF))
    l1b = nrm(ks[4], (L, 1, FF), 0.02)
    l1wb = jnp.concatenate([l1w, l1b], axis=1).astype(jnp.bfloat16)   # (L, H+1, FF)
    l2w = nrm(ks[5], (L, FF, H)).astype(jnp.bfloat16)                 # (L, FF, H)

    # per layer: [out_proj bias, linear2 bias, norm1 w, norm1 b, norm2 w, norm2 b]
    kv = jax.random.split(ks[6], 6 * L + 1)
    rows = []
    for l in range(L):
        rows += [nrm(kv[6 * l + 0], (1, H), 0.02),
                 nrm(kv[6 * l + 1], (1, H), 0.02),
                 1.0 + nrm(kv[6 * l + 2], (1, H), 0.05),
                 nrm(kv[6 * l + 3], (1, H), 0.02),
                 1.0 + nrm(kv[6 * l + 4], (1, H), 0.05),
                 nrm(kv[6 * l + 5], (1, H), 0.02)]
    rows += [nrm(kv[6 * L], (1, H)),                         # fc_out weight (O=1)
             jnp.full((1, H), 0.01, jnp.float32)]            # fc_out bias (lane 0)
    pvecs = jnp.concatenate(rows, axis=0).astype(jnp.float32)  # (6L+2, H)

    return wqkvb, wo, l1wb, l2w, pvecs


def transformer_forecaster(x_sbh, params):
    """x_sbh: (seq_len, batch, hidden) — same convention as the PyTorch module.
    Returns (batch, output_size)."""
    wqkvb, wo, l1wb, l2w, pvecs = params
    S, B, H = x_sbh.shape

    # host-side glue: batch-major 2-D activations + packed vector table
    x2d = jnp.transpose(x_sbh, (1, 0, 2)).reshape(B * S, H)
    pe = positional_encoding(S, H)                                   # (S, H)
    vecs = jnp.concatenate([jnp.tile(pe, (B, 1)), pvecs], axis=0)    # (B*S + 6L+2, H)

    inputs = (x2d, vecs, wqkvb, wo, l1wb, l2w)
    vm = pl.BlockSpec(memory_space=pltpu.MemorySpace.VMEM)

    # TODO(synk): for real throughput, batch many sequences per call (B*S >= 256)
    # with a parallel grid over batch tiles; this harness is fixed at B=2, S=8.
    return pl.pallas_call(
        transformer_forecaster_kernel,
        out_shape=jax.ShapeDtypeStruct((B, OUTPUT_SIZE), jnp.float32),
        in_specs=[vm] * len(inputs),
        out_specs=vm,
    )(*inputs)


def ref_forward(x_sbh, params):
    """Pure-JAX reference mirroring the kernel math (incl. bf16 FFN casts)."""
    wqkvb, wo, l1wb, l2w, pvecs = params
    S, B, H = x_sbh.shape
    N = B * S
    hi = jax.lax.Precision.HIGHEST
    scale = 1.0 / math.sqrt(HEAD_DIM)
    pe = positional_encoding(S, H)
    x = jnp.transpose(x_sbh, (1, 0, 2)).reshape(N, H) + jnp.tile(pe, (B, 1))
    for l in range(NUM_LAYERS):
        last = (l == NUM_LAYERS - 1)
        r = 6 * l
        opb, l2b, n1w, n1b, n2w, n2b = (pvecs[r + i][None, :] for i in range(6))
        attn_out = 0.0
        for h in range(NUM_HEADS):
            iq = (l * 3 + 0) * NUM_HEADS + h
            ik = (l * 3 + 1) * NUM_HEADS + h
            iv = (l * 3 + 2) * NUM_HEADS + h
            qh = jnp.dot(x, wqkvb[iq, :H], precision=hi) + wqkvb[iq, H]
            kh = jnp.dot(x, wqkvb[ik, :H], precision=hi) + wqkvb[ik, H]
            vh = jnp.dot(x, wqkvb[iv, :H], precision=hi) + wqkvb[iv, H]
            q3 = qh.reshape(B, S, HEAD_DIM)
            k3 = kh.reshape(B, S, HEAD_DIM)
            v3 = vh.reshape(B, S, HEAD_DIM)
            s = jnp.einsum('bse,bte->bst', q3, k3, precision=hi) * scale
            p = jax.nn.softmax(s, axis=-1)
            ctx = jnp.einsum('bst,bte->bse', p, v3, precision=hi)
            ctx2 = ctx[:, S - 1, :] if last else ctx.reshape(N, HEAD_DIM)
            attn_out = attn_out + jnp.dot(ctx2, wo[l * NUM_HEADS + h], precision=hi)
        attn_out = attn_out + opb
        x_res = x.reshape(B, S, H)[:, S - 1, :] if last else x
        y = _layer_norm(x_res + attn_out, n1w, n1b)
        w1 = l1wb[l, :HIDDEN]
        b1 = l1wb[l, HIDDEN][None, :].astype(jnp.float32)
        h1 = jnp.maximum(
            jnp.dot(y.astype(jnp.bfloat16), w1,
                    preferred_element_type=jnp.float32) + b1, 0.0)
        h2 = jnp.dot(h1.astype(jnp.bfloat16), l2w[l],
                     preferred_element_type=jnp.float32) + l2b
        x = _layer_norm(y + h2, n2w, n2b)
    fcw = pvecs[6 * NUM_LAYERS][None, :]
    fcb = pvecs[6 * NUM_LAYERS + 1, 0]
    return jnp.sum(x * fcw, axis=-1, keepdims=True) + fcb


if __name__ == "__main__":
    key = jax.random.PRNGKey(0)
    kx, kp = jax.random.split(key)

    # module input: (sequence_length, batch_size, hidden_units)
    x = jax.random.normal(kx, (SEQ, BATCH, HIDDEN), jnp.float32)
    params = init_params(kp)

    out = transformer_forecaster(x, params)
    jax.block_until_ready(out)
    assert out.shape == (BATCH, OUTPUT_SIZE), out.shape
    assert bool(jnp.all(jnp.isfinite(out)))

    ref = ref_forward(x, params)
    err = float(jnp.max(jnp.abs(out - ref)))
    assert err < 2e-2, f"max |kernel - ref| = {err}"
    print("KERNEL_OK")
</pallas_src>

<mosaic_0001>
module attributes {stable_mosaic.version = 11 : i64} {
  func.func @transformer_forecaster_kernel(%arg0: memref<16x32xf32, #tpu.memory_space<vmem>>, %arg1: memref<30x32xf32, #tpu.memory_space<vmem>>, %arg2: memref<24x33x8xf32, #tpu.memory_space<vmem>>, %arg3: memref<8x8x32xf32, #tpu.memory_space<vmem>>, %arg4: memref<2x33x2048xbf16, #tpu.memory_space<vmem>>, %arg5: memref<2x2048x32xbf16, #tpu.memory_space<vmem>>, %arg6: memref<2x1xf32, #tpu.memory_space<vmem>>) attributes {dimension_semantics = [], scalar_prefetch = 0 : i64, scratch_operands = 0 : i64, tpu.core_type = #tpu.core_type<tc>} {
    %c0 = arith.constant 0 : index
    %c0_0 = arith.constant 0 : index
    %0 = vector.load %arg0[%c0, %c0_0] : memref<16x32xf32, #tpu.memory_space<vmem>>, vector<16x32xf32>
    %c0_1 = arith.constant 0 : index
    %c0_2 = arith.constant 0 : index
    %1 = vector.load %arg1[%c0_1, %c0_2] : memref<30x32xf32, #tpu.memory_space<vmem>>, vector<16x32xf32>
    %2 = arith.addf %0, %1 : vector<16x32xf32>
    %c16 = arith.constant 16 : index
    %c0_3 = arith.constant 0 : index
    %3 = vector.load %arg1[%c16, %c0_3] : memref<30x32xf32, #tpu.memory_space<vmem>>, vector<1x32xf32>
    %c17 = arith.constant 17 : index
    %c0_4 = arith.constant 0 : index
    %4 = vector.load %arg1[%c17, %c0_4] : memref<30x32xf32, #tpu.memory_space<vmem>>, vector<1x32xf32>
    %c18 = arith.constant 18 : index
    %c0_5 = arith.constant 0 : index
    %5 = vector.load %arg1[%c18, %c0_5] : memref<30x32xf32, #tpu.memory_space<vmem>>, vector<1x32xf32>
    %c19 = arith.constant 19 : index
    %c0_6 = arith.constant 0 : index
    %6 = vector.load %arg1[%c19, %c0_6] : memref<30x32xf32, #tpu.memory_space<vmem>>, vector<1x32xf32>
    %c20 = arith.constant 20 : index
    %c0_7 = arith.constant 0 : index
    %7 = vector.load %arg1[%c20, %c0_7] : memref<30x32xf32, #tpu.memory_space<vmem>>, vector<1x32xf32>
    %c21 = arith.constant 21 : index
    %c0_8 = arith.constant 0 : index
    %8 = vector.load %arg1[%c21, %c0_8] : memref<30x32xf32, #tpu.memory_space<vmem>>, vector<1x32xf32>
    %c0_9 = arith.constant 0 : index
    %c0_10 = arith.constant 0 : index
    %c0_11 = arith.constant 0 : index
    %9 = vector.load %arg2[%c0_9, %c0_10, %c0_11] : memref<24x33x8xf32, #tpu.memory_space<vmem>>, vector<1x32x8xf32>
    %10 = vector.shape_cast %9 : vector<1x32x8xf32> to vector<32x8xf32>
    %cst = arith.constant dense<0.000000e+00> : vector<16x8xf32>
    %11 = tpu.matmul %2, %10, %cst {dimension_numbers = #tpu.dot_dimension_numbers<[1], [0], [0], [1], [0, 0, 1, 1], [], []>} : vector<16x32xf32>, vector<32x8xf32>, vector<16x8xf32> -> vector<16x8xf32>
    %c0_12 = arith.constant 0 : index
    %c32 = arith.constant 32 : index
    %c0_13 = arith.constant 0 : index
    %12 = vector.load %arg2[%c0_12, %c32, %c0_13] : memref<24x33x8xf32, #tpu.memory_space<vmem>>, vector<1x1x8xf32>
    %13 = vector.shape_cast %12 : vector<1x1x8xf32> to vector<1x8xf32>
    %14 = vector.broadcast %13 : vector<1x8xf32> to vector<16x8xf32>
    %15 = arith.addf %11, %14 : vector<16x8xf32>
    %c4 = arith.constant 4 : index
    %c0_14 = arith.constant 0 : index
    %c0_15 = arith.constant 0 : index
    %16 = vector.load %arg2[%c4, %c0_14, %c0_15] : memref<24x33x8xf32, #tpu.memory_space<vmem>>, vector<1x32x8xf32>
    %17 = vector.shape_cast %16 : vector<1x32x8xf32> to vector<32x8xf32>
    %cst_16 = arith.constant dense<0.000000e+00> : vector<16x8xf32>
    %18 = tpu.matmul %2, %17, %cst_16 {dimension_numbers = #tpu.dot_dimension_numbers<[1], [0], [0], [1], [0, 0, 1, 1], [], []>} : vector<16x32xf32>, vector<32x8xf32>, vector<16x8xf32> -> vector<16x8xf32>
    %c4_17 = arith.constant 4 : index
    %c32_18 = arith.constant 32 : index
    %c0_19 = arith.constant 0 : index
    %19 = vector.load %arg2[%c4_17, %c32_18, %c0_19] : memref<24x33x8xf32, #tpu.memory_space<vmem>>, vector<1x1x8xf32>
    %20 = vector.shape_cast %19 : vector<1x1x8xf32> to vector<1x8xf32>
    %21 = vector.broadcast %20 : vector<1x8xf32> to vector<16x8xf32>
    %22 = arith.addf %18, %21 : vector<16x8xf32>
    %c8 = arith.constant 8 : index
    %c0_20 = arith.constant 0 : index
    %c0_21 = arith.constant 0 : index
    %23 = vector.load %arg2[%c8, %c0_20, %c0_21] : memref<24x33x8xf32, #tpu.memory_space<vmem>>, vector<1x32x8xf32>
    %24 = vector.shape_cast %23 : vector<1x32x8xf32> to vector<32x8xf32>
    %cst_22 = arith.constant dense<0.000000e+00> : vector<16x8xf32>
    %25 = tpu.matmul %2, %24, %cst_22 {dimension_numbers = #tpu.dot_dimension_numbers<[1], [0], [0], [1], [0, 0, 1, 1], [], []>} : vector<16x32xf32>, vector<32x8xf32>, vector<16x8xf32> -> vector<16x8xf32>
    %c8_23 = arith.constant 8 : index
    %c32_24 = arith.constant 32 : index
    %c0_25 = arith.constant 0 : index
    %26 = vector.load %arg2[%c8_23, %c32_24, %c0_25] : memref<24x33x8xf32, #tpu.memory_space<vmem>>, vector<1x1x8xf32>
    %27 = vector.shape_cast %26 : vector<1x1x8xf32> to vector<1x8xf32>
    %28 = vector.broadcast %27 : vector<1x8xf32> to vector<16x8xf32>
    %29 = arith.addf %25, %28 : vector<16x8xf32>
    %30 = vector.shape_cast %15 : vector<16x8xf32> to vector<2x8x8xf32>
    %31 = vector.shape_cast %22 : vector<16x8xf32> to vector<2x8x8xf32>
    %32 = vector.shape_cast %29 : vector<16x8xf32> to vector<2x8x8xf32>
    "tpu.trace_start"() <{level = 10 : i32, message = "bse,bte->bst"}> : () -> ()
    %cst_26 = arith.constant dense<0.000000e+00> : vector<2x8x8xf32>
    %33 = tpu.matmul %30, %31, %cst_26 {dimension_numbers = #tpu.dot_dimension_numbers<[2], [2], [1], [1], [0, 0, 0, 1, 1, 1], [0], [0]>} : vector<2x8x8xf32>, vector<2x8x8xf32>, vector<2x8x8xf32> -> vector<2x8x8xf32>
    "tpu.trace_stop"() : () -> ()
    %cst_27 = arith.constant 0.353553385 : f32
    %34 = vector.broadcast %cst_27 : f32 to vector<2x8x8xf32>
    %35 = arith.mulf %33, %34 : vector<2x8x8xf32>
    %cst_28 = arith.constant dense<0xFF800000> : vector<2x8xf32>
    %36 = vector.multi_reduction <maximumf>, %35, %cst_28 [2] : vector<2x8x8xf32> to vector<2x8xf32>
    %37 = vector.shape_cast %36 : vector<2x8xf32> to vector<2x8x1xf32>
    %38 = vector.broadcast %37 : vector<2x8x1xf32> to vector<2x8x8xf32>
    %39 = arith.subf %35, %38 : vector<2x8x8xf32>
    %40 = math.exp %39 : vector<2x8x8xf32>
    %cst_29 = arith.constant dense<0.000000e+00> : vector<2x8xf32>
    %41 = vector.multi_reduction <add>, %40, %cst_29 [2] : vector<2x8x8xf32> to vector<2x8xf32>
    %42 = vector.shape_cast %41 : vector<2x8xf32> to vector<2x8x1xf32>
    %43 = tpu.reciprocal %42 {approx = true} : vector<2x8x1xf32> -> vector<2x8x1xf32>
    %44 = vector.broadcast %43 : vector<2x8x1xf32> to vector<2x8x8xf32>
    %45 = arith.mulf %40, %44 : vector<2x8x8xf32>
    "tpu.trace_start"() <{level = 10 : i32, message = "bst,bte->bse"}> : () -> ()
    %cst_30 = arith.constant dense<0.000000e+00> : vector<2x8x8xf32>
    %46 = tpu.matmul %45, %32, %cst_30 {dimension_numbers = #tpu.dot_dimension_numbers<[2], [1], [1], [2], [0, 0, 0, 1, 1, 2], [0], [0]>} : vector<2x8x8xf32>, vector<2x8x8xf32>, vector<2x8x8xf32> -> vector<2x8x8xf32>
    "tpu.trace_stop"() : () -> ()
    %47 = vector.shape_cast %46 : vector<2x8x8xf32> to vector<16x8xf32>
    %c0_31 = arith.constant 0 : index
    %c0_32 = arith.constant 0 : index
    %c0_33 = arith.constant 0 : index
    %48 = vector.load %arg3[%c0_31, %c0_32, %c0_33] : memref<8x8x32xf32, #tpu.memory_space<vmem>>, vector<1x8x32xf32>
    %49 = vector.shape_cast %48 : vector<1x8x32xf32> to vector<8x32xf32>
    %cst_34 = arith.constant dense<0.000000e+00> : vector<16x32xf32>
    %50 = tpu.matmul %47, %49, %cst_34 {dimension_numbers = #tpu.dot_dimension_numbers<[1], [0], [0], [1], [0, 0, 1, 1], [], []>} : vector<16x8xf32>, vector<8x32xf32>, vector<16x32xf32> -> vector<16x32xf32>
    %c1 = arith.constant 1 : index
    %c0_35 = arith.constant 0 : index
    %c0_36 = arith.constant 0 : index
    %51 = vector.load %arg2[%c1, %c0_35, %c0_36] : memref<24x33x8xf32, #tpu.memory_space<vmem>>, vector<1x32x8xf32>
    %52 = vector.shape_cast %51 : vector<1x32x8xf32> to vector<32x8xf32>
    %cst_37 = arith.constant dense<0.000000e+00> : vector<16x8xf32>
    %53 = tpu.matmul %2, %52, %cst_37 {dimension_numbers = #tpu.dot_dimension_numbers<[1], [0], [0], [1], [0, 0, 1, 1], [], []>} : vector<16x32xf32>, vector<32x8xf32>, vector<16x8xf32> -> vector<16x8xf32>
    %c1_38 = arith.constant 1 : index
    %c32_39 = arith.constant 32 : index
    %c0_40 = arith.constant 0 : index
    %54 = vector.load %arg2[%c1_38, %c32_39, %c0_40] : memref<24x33x8xf32, #tpu.memory_space<vmem>>, vector<1x1x8xf32>
    %55 = vector.shape_cast %54 : vector<1x1x8xf32> to vector<1x8xf32>
    %56 = vector.broadcast %55 : vector<1x8xf32> to vector<16x8xf32>
    %57 = arith.addf %53, %56 : vector<16x8xf32>
    %c5 = arith.constant 5 : index
    %c0_41 = arith.constant 0 : index
    %c0_42 = arith.constant 0 : index
    %58 = vector.load %arg2[%c5, %c0_41, %c0_42] : memref<24x33x8xf32, #tpu.memory_space<vmem>>, vector<1x32x8xf32>
    %59 = vector.shape_cast %58 : vector<1x32x8xf32> to vector<32x8xf32>
    %cst_43 = arith.constant dense<0.000000e+00> : vector<16x8xf32>
    %60 = tpu.matmul %2, %59, %cst_43 {dimension_numbers = #tpu.dot_dimension_numbers<[1], [0], [0], [1], [0, 0, 1, 1], [], []>} : vector<16x32xf32>, vector<32x8xf32>, vector<16x8xf32> -> vector<16x8xf32>
    %c5_44 = arith.constant 5 : index
    %c32_45 = arith.constant 32 : index
    %c0_46 = arith.constant 0 : index
    %61 = vector.load %arg2[%c5_44, %c32_45, %c0_46] : memref<24x33x8xf32, #tpu.memory_space<vmem>>, vector<1x1x8xf32>
    %62 = vector.shape_cast %61 : vector<1x1x8xf32> to vector<1x8xf32>
    %63 = vector.broadcast %62 : vector<1x8xf32> to vector<16x8xf32>
    %64 = arith.addf %60, %63 : vector<16x8xf32>
    %c9 = arith.constant 9 : index
    %c0_47 = arith.constant 0 : index
    %c0_48 = arith.constant 0 : index
    %65 = vector.load %arg2[%c9, %c0_47, %c0_48] : memref<24x33x8xf32, #tpu.memory_space<vmem>>, vector<1x32x8xf32>
    %66 = vector.shape_cast %65 : vector<1x32x8xf32> to vector<32x8xf32>
    %cst_49 = arith.constant dense<0.000000e+00> : vector<16x8xf32>
    %67 = tpu.matmul %2, %66, %cst_49 {dimension_numbers = #tpu.dot_dimension_numbers<[1], [0], [0], [1], [0, 0, 1, 1], [], []>} : vector<16x32xf32>, vector<32x8xf32>, vector<16x8xf32> -> vector<16x8xf32>
    %c9_50 = arith.constant 9 : index
    %c32_51 = arith.constant 32 : index
    %c0_52 = arith.constant 0 : index
    %68 = vector.load %arg2[%c9_50, %c32_51, %c0_52] : memref<24x33x8xf32, #tpu.memory_space<vmem>>, vector<1x1x8xf32>
    %69 = vector.shape_cast %68 : vector<1x1x8xf32> to vector<1x8xf32>
    %70 = vector.broadcast %69 : vector<1x8xf32> to vector<16x8xf32>
    %71 = arith.addf %67, %70 : vector<16x8xf32>
    %72 = vector.shape_cast %57 : vector<16x8xf32> to vector<2x8x8xf32>
    %73 = vector.shape_cast %64 : vector<16x8xf32> to vector<2x8x8xf32>
    %74 = vector.shape_cast %71 : vector<16x8xf32> to vector<2x8x8xf32>
    "tpu.trace_start"() <{level = 10 : i32, message = "bse,bte->bst"}> : () -> ()
    %cst_53 = arith.constant dense<0.000000e+00> : vector<2x8x8xf32>
    %75 = tpu.matmul %72, %73, %cst_53 {dimension_numbers = #tpu.dot_dimension_numbers<[2], [2], [1], [1], [0, 0, 0, 1, 1, 1], [0], [0]>} : vector<2x8x8xf32>, vector<2x8x8xf32>, vector<2x8x8xf32> -> vector<2x8x8xf32>
    "tpu.trace_stop"() : () -> ()
    %cst_54 = arith.constant 0.353553385 : f32
    %76 = vector.broadcast %cst_54 : f32 to vector<2x8x8xf32>
    %77 = arith.mulf %75, %76 : vector<2x8x8xf32>
    %cst_55 = arith.constant dense<0xFF800000> : vector<2x8xf32>
    %78 = vector.multi_reduction <maximumf>, %77, %cst_55 [2] : vector<2x8x8xf32> to vector<2x8xf32>
    %79 = vector.shape_cast %78 : vector<2x8xf32> to vector<2x8x1xf32>
    %80 = vector.broadcast %79 : vector<2x8x1xf32> to vector<2x8x8xf32>
    %81 = arith.subf %77, %80 : vector<2x8x8xf32>
    %82 = math.exp %81 : vector<2x8x8xf32>
    %cst_56 = arith.constant dense<0.000000e+00> : vector<2x8xf32>
    %83 = vector.multi_reduction <add>, %82, %cst_56 [2] : vector<2x8x8xf32> to vector<2x8xf32>
    %84 = vector.shape_cast %83 : vector<2x8xf32> to vector<2x8x1xf32>
    %85 = tpu.reciprocal %84 {approx = true} : vector<2x8x1xf32> -> vector<2x8x1xf32>
    %86 = vector.broadcast %85 : vector<2x8x1xf32> to vector<2x8x8xf32>
    %87 = arith.mulf %82, %86 : vector<2x8x8xf32>
    "tpu.trace_start"() <{level = 10 : i32, message = "bst,bte->bse"}> : () -> ()
    %cst_57 = arith.constant dense<0.000000e+00> : vector<2x8x8xf32>
    %88 = tpu.matmul %87, %74, %cst_57 {dimension_numbers = #tpu.dot_dimension_numbers<[2], [1], [1], [2], [0, 0, 0, 1, 1, 2], [0], [0]>} : vector<2x8x8xf32>, vector<2x8x8xf32>, vector<2x8x8xf32> -> vector<2x8x8xf32>
    "tpu.trace_stop"() : () -> ()
    %89 = vector.shape_cast %88 : vector<2x8x8xf32> to vector<16x8xf32>
    %c1_58 = arith.constant 1 : index
    %c0_59 = arith.constant 0 : index
    %c0_60 = arith.constant 0 : index
    %90 = vector.load %arg3[%c1_58, %c0_59, %c0_60] : memref<8x8x32xf32, #tpu.memory_space<vmem>>, vector<1x8x32xf32>
    %91 = vector.shape_cast %90 : vector<1x8x32xf32> to vector<8x32xf32>
    %cst_61 = arith.constant dense<0.000000e+00> : vector<16x32xf32>
    %92 = tpu.matmul %89, %91, %cst_61 {dimension_numbers = #tpu.dot_dimension_numbers<[1], [0], [0], [1], [0, 0, 1, 1], [], []>} : vector<16x8xf32>, vector<8x32xf32>, vector<16x32xf32> -> vector<16x32xf32>
    %93 = arith.addf %50, %92 : vector<16x32xf32>
    %c2 = arith.constant 2 : index
    %c0_62 = arith.constant 0 : index
    %c0_63 = arith.constant 0 : index
    %94 = vector.load %arg2[%c2, %c0_62, %c0_63] : memref<24x33x8xf32, #tpu.memory_space<vmem>>, vector<1x32x8xf32>
    %95 = vector.shape_cast %94 : vector<1x32x8xf32> to vector<32x8xf32>
    %cst_64 = arith.constant dense<0.000000e+00> : vector<16x8xf32>
    %96 = tpu.matmul %2, %95, %cst_64 {dimension_numbers = #tpu.dot_dimension_numbers<[1], [0], [0], [1], [0, 0, 1, 1], [], []>} : vector<16x32xf32>, vector<32x8xf32>, vector<16x8xf32> -> vector<16x8xf32>
    %c2_65 = arith.constant 2 : index
    %c32_66 = arith.constant 32 : index
    %c0_67 = arith.constant 0 : index
    %97 = vector.load %arg2[%c2_65, %c32_66, %c0_67] : memref<24x33x8xf32, #tpu.memory_space<vmem>>, vector<1x1x8xf32>
    %98 = vector.shape_cast %97 : vector<1x1x8xf32> to vector<1x8xf32>
    %99 = vector.broadcast %98 : vector<1x8xf32> to vector<16x8xf32>
    %100 = arith.addf %96, %99 : vector<16x8xf32>
    %c6 = arith.constant 6 : index
    %c0_68 = arith.constant 0 : index
    %c0_69 = arith.constant 0 : index
    %101 = vector.load %arg2[%c6, %c0_68, %c0_69] : memref<24x33x8xf32, #tpu.memory_space<vmem>>, vector<1x32x8xf32>
    %102 = vector.shape_cast %101 : vector<1x32x8xf32> to vector<32x8xf32>
    %cst_70 = arith.constant dense<0.000000e+00> : vector<16x8xf32>
    %103 = tpu.matmul %2, %102, %cst_70 {dimension_numbers = #tpu.dot_dimension_numbers<[1], [0], [0], [1], [0, 0, 1, 1], [], []>} : vector<16x32xf32>, vector<32x8xf32>, vector<16x8xf32> -> vector<16x8xf32>
    %c6_71 = arith.constant 6 : index
    %c32_72 = arith.constant 32 : index
    %c0_73 = arith.constant 0 : index
    %104 = vector.load %arg2[%c6_71, %c32_72, %c0_73] : memref<24x33x8xf32, #tpu.memory_space<vmem>>, vector<1x1x8xf32>
    %105 = vector.shape_cast %104 : vector<1x1x8xf32> to vector<1x8xf32>
    %106 = vector.broadcast %105 : vector<1x8xf32> to vector<16x8xf32>
    %107 = arith.addf %103, %106 : vector<16x8xf32>
    %c10 = arith.constant 10 : index
    %c0_74 = arith.constant 0 : index
    %c0_75 = arith.constant 0 : index
    %108 = vector.load %arg2[%c10, %c0_74, %c0_75] : memref<24x33x8xf32, #tpu.memory_space<vmem>>, vector<1x32x8xf32>
    %109 = vector.shape_cast %108 : vector<1x32x8xf32> to vector<32x8xf32>
    %cst_76 = arith.constant dense<0.000000e+00> : vector<16x8xf32>
    %110 = tpu.matmul %2, %109, %cst_76 {dimension_numbers = #tpu.dot_dimension_numbers<[1], [0], [0], [1], [0, 0, 1, 1], [], []>} : vector<16x32xf32>, vector<32x8xf32>, vector<16x8xf32> -> vector<16x8xf32>
    %c10_77 = arith.constant 10 : index
    %c32_78 = arith.constant 32 : index
    %c0_79 = arith.constant 0 : index
    %111 = vector.load %arg2[%c10_77, %c32_78, %c0_79] : memref<24x33x8xf32, #tpu.memory_space<vmem>>, vector<1x1x8xf32>
    %112 = vector.shape_cast %111 : vector<1x1x8xf32> to vector<1x8xf32>
    %113 = vector.broadcast %112 : vector<1x8xf32> to vector<16x8xf32>
    %114 = arith.addf %110, %113 : vector<16x8xf32>
    %115 = vector.shape_cast %100 : vector<16x8xf32> to vector<2x8x8xf32>
    %116 = vector.shape_cast %107 : vector<16x8xf32> to vector<2x8x8xf32>
    %117 = vector.shape_cast %114 : vector<16x8xf32> to vector<2x8x8xf32>
    "tpu.trace_start"() <{level = 10 : i32, message = "bse,bte->bst"}> : () -> ()
    %cst_80 = arith.constant dense<0.000000e+00> : vector<2x8x8xf32>
    %118 = tpu.matmul %115, %116, %cst_80 {dimension_numbers = #tpu.dot_dimension_numbers<[2], [2], [1], [1], [0, 0, 0, 1, 1, 1], [0], [0]>} : vector<2x8x8xf32>, vector<2x8x8xf32>, vector<2x8x8xf32> -> vector<2x8x8xf32>
    "tpu.trace_stop"() : () -> ()
    %cst_81 = arith.constant 0.353553385 : f32
    %119 = vector.broadcast %cst_81 : f32 to vector<2x8x8xf32>
    %120 = arith.mulf %118, %119 : vector<2x8x8xf32>
    %cst_82 = arith.constant dense<0xFF800000> : vector<2x8xf32>
    %121 = vector.multi_reduction <maximumf>, %120, %cst_82 [2] : vector<2x8x8xf32> to vector<2x8xf32>
    %122 = vector.shape_cast %121 : vector<2x8xf32> to vector<2x8x1xf32>
    %123 = vector.broadcast %122 : vector<2x8x1xf32> to vector<2x8x8xf32>
    %124 = arith.subf %120, %123 : vector<2x8x8xf32>
    %125 = math.exp %124 : vector<2x8x8xf32>
    %cst_83 = arith.constant dense<0.000000e+00> : vector<2x8xf32>
    %126 = vector.multi_reduction <add>, %125, %cst_83 [2] : vector<2x8x8xf32> to vector<2x8xf32>
    %127 = vector.shape_cast %126 : vector<2x8xf32> to vector<2x8x1xf32>
    %128 = tpu.reciprocal %127 {approx = true} : vector<2x8x1xf32> -> vector<2x8x1xf32>
    %129 = vector.broadcast %128 : vector<2x8x1xf32> to vector<2x8x8xf32>
    %130 = arith.mulf %125, %129 : vector<2x8x8xf32>
    "tpu.trace_start"() <{level = 10 : i32, message = "bst,bte->bse"}> : () -> ()
    %cst_84 = arith.constant dense<0.000000e+00> : vector<2x8x8xf32>
    %131 = tpu.matmul %130, %117, %cst_84 {dimension_numbers = #tpu.dot_dimension_numbers<[2], [1], [1], [2], [0, 0, 0, 1, 1, 2], [0], [0]>} : vector<2x8x8xf32>, vector<2x8x8xf32>, vector<2x8x8xf32> -> vector<2x8x8xf32>
    "tpu.trace_stop"() : () -> ()
    %132 = vector.shape_cast %131 : vector<2x8x8xf32> to vector<16x8xf32>
    %c2_85 = arith.constant 2 : index
    %c0_86 = arith.constant 0 : index
    %c0_87 = arith.constant 0 : index
    %133 = vector.load %arg3[%c2_85, %c0_86, %c0_87] : memref<8x8x32xf32, #tpu.memory_space<vmem>>, vector<1x8x32xf32>
    %134 = vector.shape_cast %133 : vector<1x8x32xf32> to vector<8x32xf32>
    %cst_88 = arith.constant dense<0.000000e+00> : vector<16x32xf32>
    %135 = tpu.matmul %132, %134, %cst_88 {dimension_numbers = #tpu.dot_dimension_numbers<[1], [0], [0], [1], [0, 0, 1, 1], [], []>} : vector<16x8xf32>, vector<8x32xf32>, vector<16x32xf32> -> vector<16x32xf32>
    %136 = arith.addf %93, %135 : vector<16x32xf32>
    %c3 = arith.constant 3 : index
    %c0_89 = arith.constant 0 : index
    %c0_90 = arith.constant 0 : index
    %137 = vector.load %arg2[%c3, %c0_89, %c0_90] : memref<24x33x8xf32, #tpu.memory_space<vmem>>, vector<1x32x8xf32>
    %138 = vector.shape_cast %137 : vector<1x32x8xf32> to vector<32x8xf32>
    %cst_91 = arith.constant dense<0.000000e+00> : vector<16x8xf32>
    %139 = tpu.matmul %2, %138, %cst_91 {dimension_numbers = #tpu.dot_dimension_numbers<[1], [0], [0], [1], [0, 0, 1, 1], [], []>} : vector<16x32xf32>, vector<32x8xf32>, vector<16x8xf32> -> vector<16x8xf32>
    %c3_92 = arith.constant 3 : index
    %c32_93 = arith.constant 32 : index
    %c0_94 = arith.constant 0 : index
    %140 = vector.load %arg2[%c3_92, %c32_93, %c0_94] : memref<24x33x8xf32, #tpu.memory_space<vmem>>, vector<1x1x8xf32>
    %141 = vector.shape_cast %140 : vector<1x1x8xf32> to vector<1x8xf32>
    %142 = vector.broadcast %141 : vector<1x8xf32> to vector<16x8xf32>
    %143 = arith.addf %139, %142 : vector<16x8xf32>
    %c7 = arith.constant 7 : index
    %c0_95 = arith.constant 0 : index
    %c0_96 = arith.constant 0 : index
    %144 = vector.load %arg2[%c7, %c0_95, %c0_96] : memref<24x33x8xf32, #tpu.memory_space<vmem>>, vector<1x32x8xf32>
    %145 = vector.shape_cast %144 : vector<1x32x8xf32> to vector<32x8xf32>
    %cst_97 = arith.constant dense<0.000000e+00> : vector<16x8xf32>
    %146 = tpu.matmul %2, %145, %cst_97 {dimension_numbers = #tpu.dot_dimension_numbers<[1], [0], [0], [1], [0, 0, 1, 1], [], []>} : vector<16x32xf32>, vector<32x8xf32>, vector<16x8xf32> -> vector<16x8xf32>
    %c7_98 = arith.constant 7 : index
    %c32_99 = arith.constant 32 : index
    %c0_100 = arith.constant 0 : index
    %147 = vector.load %arg2[%c7_98, %c32_99, %c0_100] : memref<24x33x8xf32, #tpu.memory_space<vmem>>, vector<1x1x8xf32>
    %148 = vector.shape_cast %147 : vector<1x1x8xf32> to vector<1x8xf32>
    %149 = vector.broadcast %148 : vector<1x8xf32> to vector<16x8xf32>
    %150 = arith.addf %146, %149 : vector<16x8xf32>
    %c11 = arith.constant 11 : index
    %c0_101 = arith.constant 0 : index
    %c0_102 = arith.constant 0 : index
    %151 = vector.load %arg2[%c11, %c0_101, %c0_102] : memref<24x33x8xf32, #tpu.memory_space<vmem>>, vector<1x32x8xf32>
    %152 = vector.shape_cast %151 : vector<1x32x8xf32> to vector<32x8xf32>
    %cst_103 = arith.constant dense<0.000000e+00> : vector<16x8xf32>
    %153 = tpu.matmul %2, %152, %cst_103 {dimension_numbers = #tpu.dot_dimension_numbers<[1], [0], [0], [1], [0, 0, 1, 1], [], []>} : vector<16x32xf32>, vector<32x8xf32>, vector<16x8xf32> -> vector<16x8xf32>
    %c11_104 = arith.constant 11 : index
    %c32_105 = arith.constant 32 : index
    %c0_106 = arith.constant 0 : index
    %154 = vector.load %arg2[%c11_104, %c32_105, %c0_106] : memref<24x33x8xf32, #tpu.memory_space<vmem>>, vector<1x1x8xf32>
    %155 = vector.shape_cast %154 : vector<1x1x8xf32> to vector<1x8xf32>
    %156 = vector.broadcast %155 : vector<1x8xf32> to vector<16x8xf32>
    %157 = arith.addf %153, %156 : vector<16x8xf32>
    %158 = vector.shape_cast %143 : vector<16x8xf32> to vector<2x8x8xf32>
    %159 = vector.shape_cast %150 : vector<16x8xf32> to vector<2x8x8xf32>
    %160 = vector.shape_cast %157 : vector<16x8xf32> to vector<2x8x8xf32>
    "tpu.trace_start"() <{level = 10 : i32, message = "bse,bte->bst"}> : () -> ()
    %cst_107 = arith.constant dense<0.000000e+00> : vector<2x8x8xf32>
    %161 = tpu.matmul %158, %159, %cst_107 {dimension_numbers = #tpu.dot_dimension_numbers<[2], [2], [1], [1], [0, 0, 0, 1, 1, 1], [0], [0]>} : vector<2x8x8xf32>, vector<2x8x8xf32>, vector<2x8x8xf32> -> vector<2x8x8xf32>
    "tpu.trace_stop"() : () -> ()
    %cst_108 = arith.constant 0.353553385 : f32
    %162 = vector.broadcast %cst_108 : f32 to vector<2x8x8xf32>
    %163 = arith.mulf %161, %162 : vector<2x8x8xf32>
    %cst_109 = arith.constant dense<0xFF800000> : vector<2x8xf32>
    %164 = vector.multi_reduction <maximumf>, %163, %cst_109 [2] : vector<2x8x8xf32> to vector<2x8xf32>
    %165 = vector.shape_cast %164 : vector<2x8xf32> to vector<2x8x1xf32>
    %166 = vector.broadcast %165 : vector<2x8x1xf32> to vector<2x8x8xf32>
    %167 = arith.subf %163, %166 : vector<2x8x8xf32>
    %168 = math.exp %167 : vector<2x8x8xf32>
    %cst_110 = arith.constant dense<0.000000e+00> : vector<2x8xf32>
    %169 = vector.multi_reduction <add>, %168, %cst_110 [2] : vector<2x8x8xf32> to vector<2x8xf32>
    %170 = vector.shape_cast %169 : vector<2x8xf32> to vector<2x8x1xf32>
    %171 = tpu.reciprocal %170 {approx = true} : vector<2x8x1xf32> -> vector<2x8x1xf32>
    %172 = vector.broadcast %171 : vector<2x8x1xf32> to vector<2x8x8xf32>
    %173 = arith.mulf %168, %172 : vector<2x8x8xf32>
    "tpu.trace_start"() <{level = 10 : i32, message = "bst,bte->bse"}> : () -> ()
    %cst_111 = arith.constant dense<0.000000e+00> : vector<2x8x8xf32>
    %174 = tpu.matmul %173, %160, %cst_111 {dimension_numbers = #tpu.dot_dimension_numbers<[2], [1], [1], [2], [0, 0, 0, 1, 1, 2], [0], [0]>} : vector<2x8x8xf32>, vector<2x8x8xf32>, vector<2x8x8xf32> -> vector<2x8x8xf32>
    "tpu.trace_stop"() : () -> ()
    %175 = vector.shape_cast %174 : vector<2x8x8xf32> to vector<16x8xf32>
    %c3_112 = arith.constant 3 : index
    %c0_113 = arith.constant 0 : index
    %c0_114 = arith.constant 0 : index
    %176 = vector.load %arg3[%c3_112, %c0_113, %c0_114] : memref<8x8x32xf32, #tpu.memory_space<vmem>>, vector<1x8x32xf32>
    %177 = vector.shape_cast %176 : vector<1x8x32xf32> to vector<8x32xf32>
    %cst_115 = arith.constant dense<0.000000e+00> : vector<16x32xf32>
    %178 = tpu.matmul %175, %177, %cst_115 {dimension_numbers = #tpu.dot_dimension_numbers<[1], [0], [0], [1], [0, 0, 1, 1], [], []>} : vector<16x8xf32>, vector<8x32xf32>, vector<16x32xf32> -> vector<16x32xf32>
    %179 = arith.addf %136, %178 : vector<16x32xf32>
    %180 = vector.broadcast %3 : vector<1x32xf32> to vector<16x32xf32>
    %181 = arith.addf %179, %180 : vector<16x32xf32>
    %182 = arith.addf %2, %181 : vector<16x32xf32>
    %cst_116 = arith.constant dense<0.000000e+00> : vector<16xf32>
    %183 = vector.multi_reduction <add>, %182, %cst_116 [1] : vector<16x32xf32> to vector<16xf32>
    %184 = vector.shape_cast %183 : vector<16xf32> to vector<16x1xf32>
    %cst_117 = arith.constant 3.200000e+01 : f32
    %185 = vector.broadcast %cst_117 : f32 to vector<16x1xf32>
    %186 = arith.divf %184, %185 : vector<16x1xf32>
    %187 = vector.broadcast %186 : vector<16x1xf32> to vector<16x32xf32>
    %188 = arith.subf %182, %187 : vector<16x32xf32>
    %189 = arith.mulf %188, %188 : vector<16x32xf32>
    %cst_118 = arith.constant dense<0.000000e+00> : vector<16xf32>
    %190 = vector.multi_reduction <add>, %189, %cst_118 [1] : vector<16x32xf32> to vector<16xf32>
    %191 = vector.shape_cast %190 : vector<16xf32> to vector<16x1xf32>
    %cst_119 = arith.constant 3.200000e+01 : f32
    %192 = vector.broadcast %cst_119 : f32 to vector<16x1xf32>
    %193 = arith.divf %191, %192 : vector<16x1xf32>
    %194 = vector.broadcast %186 : vector<16x1xf32> to vector<16x32xf32>
    %195 = arith.subf %182, %194 : vector<16x32xf32>
    %cst_120 = arith.constant 9.99999974E-6 : f32
    %196 = vector.broadcast %cst_120 : f32 to vector<16x1xf32>
    %197 = arith.addf %193, %196 : vector<16x1xf32>
    %198 = math.rsqrt %197 : vector<16x1xf32>
    %199 = vector.broadcast %198 : vector<16x1xf32> to vector<16x32xf32>
    %200 = arith.mulf %195, %199 : vector<16x32xf32>
    %201 = vector.broadcast %5 : vector<1x32xf32> to vector<16x32xf32>
    %202 = arith.mulf %200, %201 : vector<16x32xf32>
    %203 = vector.broadcast %6 : vector<1x32xf32> to vector<16x32xf32>
    %204 = arith.addf %202, %203 : vector<16x32xf32>
    %c0_121 = arith.constant 0 : index
    %c0_122 = arith.constant 0 : index
    %c0_123 = arith.constant 0 : index
    %205 = vector.load %arg4[%c0_121, %c0_122, %c0_123] : memref<2x33x2048xbf16, #tpu.memory_space<vmem>>, vector<1x32x2048xbf16>
    %206 = vector.shape_cast %205 : vector<1x32x2048xbf16> to vector<32x2048xbf16>
    %c0_124 = arith.constant 0 : index
    %c32_125 = arith.constant 32 : index
    %c0_126 = arith.constant 0 : index
    %207 = vector.load %arg4[%c0_124, %c32_125, %c0_126] : memref<2x33x2048xbf16, #tpu.memory_space<vmem>>, vector<1x1x2048xbf16>
    %208 = vector.shape_cast %207 : vector<1x1x2048xbf16> to vector<1x2048xbf16>
    %209 = arith.extf %208 : vector<1x2048xbf16> to vector<1x2048xf32>
    %210 = arith.truncf %204 : vector<16x32xf32> to vector<16x32xbf16>
    %cst_127 = arith.constant dense<0.000000e+00> : vector<16x2048xf32>
    %211 = tpu.matmul %210, %206, %cst_127 {dimension_numbers = #tpu.dot_dimension_numbers<[1], [0], [0], [1], [0, 0, 1, 1], [], []>} : vector<16x32xbf16>, vector<32x2048xbf16>, vector<16x2048xf32> -> vector<16x2048xf32>
    %212 = vector.broadcast %209 : vector<1x2048xf32> to vector<16x2048xf32>
    %213 = arith.addf %211, %212 : vector<16x2048xf32>
    %cst_128 = arith.constant 0.000000e+00 : f32
    %214 = vector.broadcast %cst_128 : f32 to vector<16x2048xf32>
    %215 = arith.maximumf %213, %214 : vector<16x2048xf32>
    %216 = arith.truncf %215 : vector<16x2048xf32> to vector<16x2048xbf16>
    %c0_129 = arith.constant 0 : index
    %c0_130 = arith.constant 0 : index
    %c0_131 = arith.constant 0 : index
    %217 = vector.load %arg5[%c0_129, %c0_130, %c0_131] : memref<2x2048x32xbf16, #tpu.memory_space<vmem>>, vector<1x2048x32xbf16>
    %218 = vector.shape_cast %217 : vector<1x2048x32xbf16> to vector<2048x32xbf16>
    %cst_132 = arith.constant dense<0.000000e+00> : vector<16x32xf32>
    %219 = tpu.matmul %216, %218, %cst_132 {dimension_numbers = #tpu.dot_dimension_numbers<[1], [0], [0], [1], [0, 0, 1, 1], [], []>} : vector<16x2048xbf16>, vector<2048x32xbf16>, vector<16x32xf32> -> vector<16x32xf32>
    %220 = vector.broadcast %4 : vector<1x32xf32> to vector<16x32xf32>
    %221 = arith.addf %219, %220 : vector<16x32xf32>
    %222 = arith.addf %204, %221 : vector<16x32xf32>
    %cst_133 = arith.constant dense<0.000000e+00> : vector<16xf32>
    %223 = vector.multi_reduction <add>, %222, %cst_133 [1] : vector<16x32xf32> to vector<16xf32>
    %224 = vector.shape_cast %223 : vector<16xf32> to vector<16x1xf32>
    %cst_134 = arith.constant 3.200000e+01 : f32
    %225 = vector.broadcast %cst_134 : f32 to vector<16x1xf32>
    %226 = arith.divf %224, %225 : vector<16x1xf32>
    %227 = vector.broadcast %226 : vector<16x1xf32> to vector<16x32xf32>
    %228 = arith.subf %222, %227 : vector<16x32xf32>
    %229 = arith.mulf %228, %228 : vector<16x32xf32>
    %cst_135 = arith.constant dense<0.000000e+00> : vector<16xf32>
    %230 = vector.multi_reduction <add>, %229, %cst_135 [1] : vector<16x32xf32> to vector<16xf32>
    %231 = vector.shape_cast %230 : vector<16xf32> to vector<16x1xf32>
    %cst_136 = arith.constant 3.200000e+01 : f32
    %232 = vector.broadcast %cst_136 : f32 to vector<16x1xf32>
    %233 = arith.divf %231, %232 : vector<16x1xf32>
    %234 = vector.broadcast %226 : vector<16x1xf32> to vector<16x32xf32>
    %235 = arith.subf %222, %234 : vector<16x32xf32>
    %cst_137 = arith.constant 9.99999974E-6 : f32
    %236 = vector.broadcast %cst_137 : f32 to vector<16x1xf32>
    %237 = arith.addf %233, %236 : vector<16x1xf32>
    %238 = math.rsqrt %237 : vector<16x1xf32>
    %239 = vector.broadcast %238 : vector<16x1xf32> to vector<16x32xf32>
    %240 = arith.mulf %235, %239 : vector<16x32xf32>
    %241 = vector.broadcast %7 : vector<1x32xf32> to vector<16x32xf32>
    %242 = arith.mulf %240, %241 : vector<16x32xf32>
    %243 = vector.broadcast %8 : vector<1x32xf32> to vector<16x32xf32>
    %244 = arith.addf %242, %243 : vector<16x32xf32>
    %c22 = arith.constant 22 : index
    %c0_138 = arith.constant 0 : index
    %245 = vector.load %arg1[%c22, %c0_138] : memref<30x32xf32, #tpu.memory_space<vmem>>, vector<1x32xf32>
    %c23 = arith.constant 23 : index
    %c0_139 = arith.constant 0 : index
    %246 = vector.load %arg1[%c23, %c0_139] : memref<30x32xf32, #tpu.memory_space<vmem>>, vector<1x32xf32>
    %c24 = arith.constant 24 : index
    %c0_140 = arith.constant 0 : index
    %247 = vector.load %arg1[%c24, %c0_140] : memref<30x32xf32, #tpu.memory_space<vmem>>, vector<1x32xf32>
    %c25 = arith.constant 25 : index
    %c0_141 = arith.constant 0 : index
    %248 = vector.load %arg1[%c25, %c0_141] : memref<30x32xf32, #tpu.memory_space<vmem>>, vector<1x32xf32>
    %c26 = arith.constant 26 : index
    %c0_142 = arith.constant 0 : index
    %249 = vector.load %arg1[%c26, %c0_142] : memref<30x32xf32, #tpu.memory_space<vmem>>, vector<1x32xf32>
    %c27 = arith.constant 27 : index
    %c0_143 = arith.constant 0 : index
    %250 = vector.load %arg1[%c27, %c0_143] : memref<30x32xf32, #tpu.memory_space<vmem>>, vector<1x32xf32>
    %c12 = arith.constant 12 : index
    %c0_144 = arith.constant 0 : index
    %c0_145 = arith.constant 0 : index
    %251 = vector.load %arg2[%c12, %c0_144, %c0_145] : memref<24x33x8xf32, #tpu.memory_space<vmem>>, vector<1x32x8xf32>
    %252 = vector.shape_cast %251 : vector<1x32x8xf32> to vector<32x8xf32>
    %cst_146 = arith.constant dense<0.000000e+00> : vector<16x8xf32>
    %253 = tpu.matmul %244, %252, %cst_146 {dimension_numbers = #tpu.dot_dimension_numbers<[1], [0], [0], [1], [0, 0, 1, 1], [], []>} : vector<16x32xf32>, vector<32x8xf32>, vector<16x8xf32> -> vector<16x8xf32>
    %c12_147 = arith.constant 12 : index
    %c32_148 = arith.constant 32 : index
    %c0_149 = arith.constant 0 : index
    %254 = vector.load %arg2[%c12_147, %c32_148, %c0_149] : memref<24x33x8xf32, #tpu.memory_space<vmem>>, vector<1x1x8xf32>
    %255 = vector.shape_cast %254 : vector<1x1x8xf32> to vector<1x8xf32>
    %256 = vector.broadcast %255 : vector<1x8xf32> to vector<16x8xf32>
    %257 = arith.addf %253, %256 : vector<16x8xf32>
    %c16_150 = arith.constant 16 : index
    %c0_151 = arith.constant 0 : index
    %c0_152 = arith.constant 0 : index
    %258 = vector.load %arg2[%c16_150, %c0_151, %c0_152] : memref<24x33x8xf32, #tpu.memory_space<vmem>>, vector<1x32x8xf32>
    %259 = vector.shape_cast %258 : vector<1x32x8xf32> to vector<32x8xf32>
    %cst_153 = arith.constant dense<0.000000e+00> : vector<16x8xf32>
    %260 = tpu.matmul %244, %259, %cst_153 {dimension_numbers = #tpu.dot_dimension_numbers<[1], [0], [0], [1], [0, 0, 1, 1], [], []>} : vector<16x32xf32>, vector<32x8xf32>, vector<16x8xf32> -> vector<16x8xf32>
    %c16_154 = arith.constant 16 : index
    %c32_155 = arith.constant 32 : index
    %c0_156 = arith.constant 0 : index
    %261 = vector.load %arg2[%c16_154, %c32_155, %c0_156] : memref<24x33x8xf32, #tpu.memory_space<vmem>>, vector<1x1x8xf32>
    %262 = vector.shape_cast %261 : vector<1x1x8xf32> to vector<1x8xf32>
    %263 = vector.broadcast %262 : vector<1x8xf32> to vector<16x8xf32>
    %264 = arith.addf %260, %263 : vector<16x8xf32>
    %c20_157 = arith.constant 20 : index
    %c0_158 = arith.constant 0 : index
    %c0_159 = arith.constant 0 : index
    %265 = vector.load %arg2[%c20_157, %c0_158, %c0_159] : memref<24x33x8xf32, #tpu.memory_space<vmem>>, vector<1x32x8xf32>
    %266 = vector.shape_cast %265 : vector<1x32x8xf32> to vector<32x8xf32>
    %cst_160 = arith.constant dense<0.000000e+00> : vector<16x8xf32>
    %267 = tpu.matmul %244, %266, %cst_160 {dimension_numbers = #tpu.dot_dimension_numbers<[1], [0], [0], [1], [0, 0, 1, 1], [], []>} : vector<16x32xf32>, vector<32x8xf32>, vector<16x8xf32> -> vector<16x8xf32>
    %c20_161 = arith.constant 20 : index
    %c32_162 = arith.constant 32 : index
    %c0_163 = arith.constant 0 : index
    %268 = vector.load %arg2[%c20_161, %c32_162, %c0_163] : memref<24x33x8xf32, #tpu.memory_space<vmem>>, vector<1x1x8xf32>
    %269 = vector.shape_cast %268 : vector<1x1x8xf32> to vector<1x8xf32>
    %270 = vector.broadcast %269 : vector<1x8xf32> to vector<16x8xf32>
    %271 = arith.addf %267, %270 : vector<16x8xf32>
    %272 = vector.shape_cast %257 : vector<16x8xf32> to vector<2x8x8xf32>
    %273 = vector.shape_cast %264 : vector<16x8xf32> to vector<2x8x8xf32>
    %274 = vector.shape_cast %271 : vector<16x8xf32> to vector<2x8x8xf32>
    "tpu.trace_start"() <{level = 10 : i32, message = "bse,bte->bst"}> : () -> ()
    %cst_164 = arith.constant dense<0.000000e+00> : vector<2x8x8xf32>
    %275 = tpu.matmul %272, %273, %cst_164 {dimension_numbers = #tpu.dot_dimension_numbers<[2], [2], [1], [1], [0, 0, 0, 1, 1, 1], [0], [0]>} : vector<2x8x8xf32>, vector<2x8x8xf32>, vector<2x8x8xf32> -> vector<2x8x8xf32>
    "tpu.trace_stop"() : () -> ()
    %cst_165 = arith.constant 0.353553385 : f32
    %276 = vector.broadcast %cst_165 : f32 to vector<2x8x8xf32>
    %277 = arith.mulf %275, %276 : vector<2x8x8xf32>
    %cst_166 = arith.constant dense<0xFF800000> : vector<2x8xf32>
    %278 = vector.multi_reduction <maximumf>, %277, %cst_166 [2] : vector<2x8x8xf32> to vector<2x8xf32>
    %279 = vector.shape_cast %278 : vector<2x8xf32> to vector<2x8x1xf32>
    %280 = vector.broadcast %279 : vector<2x8x1xf32> to vector<2x8x8xf32>
    %281 = arith.subf %277, %280 : vector<2x8x8xf32>
    %282 = math.exp %281 : vector<2x8x8xf32>
    %cst_167 = arith.constant dense<0.000000e+00> : vector<2x8xf32>
    %283 = vector.multi_reduction <add>, %282, %cst_167 [2] : vector<2x8x8xf32> to vector<2x8xf32>
    %284 = vector.shape_cast %283 : vector<2x8xf32> to vector<2x8x1xf32>
    %285 = tpu.reciprocal %284 {approx = true} : vector<2x8x1xf32> -> vector<2x8x1xf32>
    %286 = vector.broadcast %285 : vector<2x8x1xf32> to vector<2x8x8xf32>
    %287 = arith.mulf %282, %286 : vector<2x8x8xf32>
    "tpu.trace_start"() <{level = 10 : i32, message = "bst,bte->bse"}> : () -> ()
    %cst_168 = arith.constant dense<0.000000e+00> : vector<2x8x8xf32>
    %288 = tpu.matmul %287, %274, %cst_168 {dimension_numbers = #tpu.dot_dimension_numbers<[2], [1], [1], [2], [0, 0, 0, 1, 1, 2], [0], [0]>} : vector<2x8x8xf32>, vector<2x8x8xf32>, vector<2x8x8xf32> -> vector<2x8x8xf32>
    "tpu.trace_stop"() : () -> ()
    %289 = vector.extract_strided_slice %288 {offsets = [0, 7, 0], sizes = [2, 1, 8], strides = [1, 1, 1]} : vector<2x8x8xf32> to vector<2x1x8xf32>
    %290 = vector.shape_cast %289 : vector<2x1x8xf32> to vector<2x8xf32>
    %c4_169 = arith.constant 4 : index
    %c0_170 = arith.constant 0 : index
    %c0_171 = arith.constant 0 : index
    %291 = vector.load %arg3[%c4_169, %c0_170, %c0_171] : memref<8x8x32xf32, #tpu.memory_space<vmem>>, vector<1x8x32xf32>
    %292 = vector.shape_cast %291 : vector<1x8x32xf32> to vector<8x32xf32>
    %cst_172 = arith.constant dense<0.000000e+00> : vector<2x32xf32>
    %293 = tpu.matmul %290, %292, %cst_172 {dimension_numbers = #tpu.dot_dimension_numbers<[1], [0], [0], [1], [0, 0, 1, 1], [], []>} : vector<2x8xf32>, vector<8x32xf32>, vector<2x32xf32> -> vector<2x32xf32>
    %c13 = arith.constant 13 : index
    %c0_173 = arith.constant 0 : index
    %c0_174 = arith.constant 0 : index
    %294 = vector.load %arg2[%c13, %c0_173, %c0_174] : memref<24x33x8xf32, #tpu.memory_space<vmem>>, vector<1x32x8xf32>
    %295 = vector.shape_cast %294 : vector<1x32x8xf32> to vector<32x8xf32>
    %cst_175 = arith.constant dense<0.000000e+00> : vector<16x8xf32>
    %296 = tpu.matmul %244, %295, %cst_175 {dimension_numbers = #tpu.dot_dimension_numbers<[1], [0], [0], [1], [0, 0, 1, 1], [], []>} : vector<16x32xf32>, vector<32x8xf32>, vector<16x8xf32> -> vector<16x8xf32>
    %c13_176 = arith.constant 13 : index
    %c32_177 = arith.constant 32 : index
    %c0_178 = arith.constant 0 : index
    %297 = vector.load %arg2[%c13_176, %c32_177, %c0_178] : memref<24x33x8xf32, #tpu.memory_space<vmem>>, vector<1x1x8xf32>
    %298 = vector.shape_cast %297 : vector<1x1x8xf32> to vector<1x8xf32>
    %299 = vector.broadcast %298 : vector<1x8xf32> to vector<16x8xf32>
    %300 = arith.addf %296, %299 : vector<16x8xf32>
    %c17_179 = arith.constant 17 : index
    %c0_180 = arith.constant 0 : index
    %c0_181 = arith.constant 0 : index
    %301 = vector.load %arg2[%c17_179, %c0_180, %c0_181] : memref<24x33x8xf32, #tpu.memory_space<vmem>>, vector<1x32x8xf32>
    %302 = vector.shape_cast %301 : vector<1x32x8xf32> to vector<32x8xf32>
    %cst_182 = arith.constant dense<0.000000e+00> : vector<16x8xf32>
    %303 = tpu.matmul %244, %302, %cst_182 {dimension_numbers = #tpu.dot_dimension_numbers<[1], [0], [0], [1], [0, 0, 1, 1], [], []>} : vector<16x32xf32>, vector<32x8xf32>, vector<16x8xf32> -> vector<16x8xf32>
    %c17_183 = arith.constant 17 : index
    %c32_184 = arith.constant 32 : index
    %c0_185 = arith.constant 0 : index
    %304 = vector.load %arg2[%c17_183, %c32_184, %c0_185] : memref<24x33x8xf32, #tpu.memory_space<vmem>>, vector<1x1x8xf32>
    %305 = vector.shape_cast %304 : vector<1x1x8xf32> to vector<1x8xf32>
    %306 = vector.broadcast %305 : vector<1x8xf32> to vector<16x8xf32>
    %307 = arith.addf %303, %306 : vector<16x8xf32>
    %c21_186 = arith.constant 21 : index
    %c0_187 = arith.constant 0 : index
    %c0_188 = arith.constant 0 : index
    %308 = vector.load %arg2[%c21_186, %c0_187, %c0_188] : memref<24x33x8xf32, #tpu.memory_space<vmem>>, vector<1x32x8xf32>
    %309 = vector.shape_cast %308 : vector<1x32x8xf32> to vector<32x8xf32>
    %cst_189 = arith.constant dense<0.000000e+00> : vector<16x8xf32>
    %310 = tpu.matmul %244, %309, %cst_189 {dimension_numbers = #tpu.dot_dimension_numbers<[1], [0], [0], [1], [0, 0, 1, 1], [], []>} : vector<16x32xf32>, vector<32x8xf32>, vector<16x8xf32> -> vector<16x8xf32>
    %c21_190 = arith.constant 21 : index
    %c32_191 = arith.constant 32 : index
    %c0_192 = arith.constant 0 : index
    %311 = vector.load %arg2[%c21_190, %c32_191, %c0_192] : memref<24x33x8xf32, #tpu.memory_space<vmem>>, vector<1x1x8xf32>
    %312 = vector.shape_cast %311 : vector<1x1x8xf32> to vector<1x8xf32>
    %313 = vector.broadcast %312 : vector<1x8xf32> to vector<16x8xf32>
    %314 = arith.addf %310, %313 : vector<16x8xf32>
    %315 = vector.shape_cast %300 : vector<16x8xf32> to vector<2x8x8xf32>
    %316 = vector.shape_cast %307 : vector<16x8xf32> to vector<2x8x8xf32>
    %317 = vector.shape_cast %314 : vector<16x8xf32> to vector<2x8x8xf32>
    "tpu.trace_start"() <{level = 10 : i32, message = "bse,bte->bst"}> : () -> ()
    %cst_193 = arith.constant dense<0.000000e+00> : vector<2x8x8xf32>
    %318 = tpu.matmul %315, %316, %cst_193 {dimension_numbers = #tpu.dot_dimension_numbers<[2], [2], [1], [1], [0, 0, 0, 1, 1, 1], [0], [0]>} : vector<2x8x8xf32>, vector<2x8x8xf32>, vector<2x8x8xf32> -> vector<2x8x8xf32>
    "tpu.trace_stop"() : () -> ()
    %cst_194 = arith.constant 0.353553385 : f32
    %319 = vector.broadcast %cst_194 : f32 to vector<2x8x8xf32>
    %320 = arith.mulf %318, %319 : vector<2x8x8xf32>
    %cst_195 = arith.constant dense<0xFF800000> : vector<2x8xf32>
    %321 = vector.multi_reduction <maximumf>, %320, %cst_195 [2] : vector<2x8x8xf32> to vector<2x8xf32>
    %322 = vector.shape_cast %321 : vector<2x8xf32> to vector<2x8x1xf32>
    %323 = vector.broadcast %322 : vector<2x8x1xf32> to vector<2x8x8xf32>
    %324 = arith.subf %320, %323 : vector<2x8x8xf32>
    %325 = math.exp %324 : vector<2x8x8xf32>
    %cst_196 = arith.constant dense<0.000000e+00> : vector<2x8xf32>
    %326 = vector.multi_reduction <add>, %325, %cst_196 [2] : vector<2x8x8xf32> to vector<2x8xf32>
    %327 = vector.shape_cast %326 : vector<2x8xf32> to vector<2x8x1xf32>
    %328 = tpu.reciprocal %327 {approx = true} : vector<2x8x1xf32> -> vector<2x8x1xf32>
    %329 = vector.broadcast %328 : vector<2x8x1xf32> to vector<2x8x8xf32>
    %330 = arith.mulf %325, %329 : vector<2x8x8xf32>
    "tpu.trace_start"() <{level = 10 : i32, message = "bst,bte->bse"}> : () -> ()
    %cst_197 = arith.constant dense<0.000000e+00> : vector<2x8x8xf32>
    %331 = tpu.matmul %330, %317, %cst_197 {dimension_numbers = #tpu.dot_dimension_numbers<[2], [1], [1], [2], [0, 0, 0, 1, 1, 2], [0], [0]>} : vector<2x8x8xf32>, vector<2x8x8xf32>, vector<2x8x8xf32> -> vector<2x8x8xf32>
    "tpu.trace_stop"() : () -> ()
    %332 = vector.extract_strided_slice %331 {offsets = [0, 7, 0], sizes = [2, 1, 8], strides = [1, 1, 1]} : vector<2x8x8xf32> to vector<2x1x8xf32>
    %333 = vector.shape_cast %332 : vector<2x1x8xf32> to vector<2x8xf32>
    %c5_198 = arith.constant 5 : index
    %c0_199 = arith.constant 0 : index
    %c0_200 = arith.constant 0 : index
    %334 = vector.load %arg3[%c5_198, %c0_199, %c0_200] : memref<8x8x32xf32, #tpu.memory_space<vmem>>, vector<1x8x32xf32>
    %335 = vector.shape_cast %334 : vector<1x8x32xf32> to vector<8x32xf32>
    %cst_201 = arith.constant dense<0.000000e+00> : vector<2x32xf32>
    %336 = tpu.matmul %333, %335, %cst_201 {dimension_numbers = #tpu.dot_dimension_numbers<[1], [0], [0], [1], [0, 0, 1, 1], [], []>} : vector<2x8xf32>, vector<8x32xf32>, vector<2x32xf32> -> vector<2x32xf32>
    %337 = arith.addf %293, %336 : vector<2x32xf32>
    %c14 = arith.constant 14 : index
    %c0_202 = arith.constant 0 : index
    %c0_203 = arith.constant 0 : index
    %338 = vector.load %arg2[%c14, %c0_202, %c0_203] : memref<24x33x8xf32, #tpu.memory_space<vmem>>, vector<1x32x8xf32>
    %339 = vector.shape_cast %338 : vector<1x32x8xf32> to vector<32x8xf32>
    %cst_204 = arith.constant dense<0.000000e+00> : vector<16x8xf32>
    %340 = tpu.matmul %244, %339, %cst_204 {dimension_numbers = #tpu.dot_dimension_numbers<[1], [0], [0], [1], [0, 0, 1, 1], [], []>} : vector<16x32xf32>, vector<32x8xf32>, vector<16x8xf32> -> vector<16x8xf32>
    %c14_205 = arith.constant 14 : index
    %c32_206 = arith.constant 32 : index
    %c0_207 = arith.constant 0 : index
    %341 = vector.load %arg2[%c14_205, %c32_206, %c0_207] : memref<24x33x8xf32, #tpu.memory_space<vmem>>, vector<1x1x8xf32>
    %342 = vector.shape_cast %341 : vector<1x1x8xf32> to vector<1x8xf32>
    %343 = vector.broadcast %342 : vector<1x8xf32> to vector<16x8xf32>
    %344 = arith.addf %340, %343 : vector<16x8xf32>
    %c18_208 = arith.constant 18 : index
    %c0_209 = arith.constant 0 : index
    %c0_210 = arith.constant 0 : index
    %345 = vector.load %arg2[%c18_208, %c0_209, %c0_210] : memref<24x33x8xf32, #tpu.memory_space<vmem>>, vector<1x32x8xf32>
    %346 = vector.shape_cast %345 : vector<1x32x8xf32> to vector<32x8xf32>
    %cst_211 = arith.constant dense<0.000000e+00> : vector<16x8xf32>
    %347 = tpu.matmul %244, %346, %cst_211 {dimension_numbers = #tpu.dot_dimension_numbers<[1], [0], [0], [1], [0, 0, 1, 1], [], []>} : vector<16x32xf32>, vector<32x8xf32>, vector<16x8xf32> -> vector<16x8xf32>
    %c18_212 = arith.constant 18 : index
    %c32_213 = arith.constant 32 : index
    %c0_214 = arith.constant 0 : index
    %348 = vector.load %arg2[%c18_212, %c32_213, %c0_214] : memref<24x33x8xf32, #tpu.memory_space<vmem>>, vector<1x1x8xf32>
    %349 = vector.shape_cast %348 : vector<1x1x8xf32> to vector<1x8xf32>
    %350 = vector.broadcast %349 : vector<1x8xf32> to vector<16x8xf32>
    %351 = arith.addf %347, %350 : vector<16x8xf32>
    %c22_215 = arith.constant 22 : index
    %c0_216 = arith.constant 0 : index
    %c0_217 = arith.constant 0 : index
    %352 = vector.load %arg2[%c22_215, %c0_216, %c0_217] : memref<24x33x8xf32, #tpu.memory_space<vmem>>, vector<1x32x8xf32>
    %353 = vector.shape_cast %352 : vector<1x32x8xf32> to vector<32x8xf32>
    %cst_218 = arith.constant dense<0.000000e+00> : vector<16x8xf32>
    %354 = tpu.matmul %244, %353, %cst_218 {dimension_numbers = #tpu.dot_dimension_numbers<[1], [0], [0], [1], [0, 0, 1, 1], [], []>} : vector<16x32xf32>, vector<32x8xf32>, vector<16x8xf32> -> vector<16x8xf32>
    %c22_219 = arith.constant 22 : index
    %c32_220 = arith.constant 32 : index
    %c0_221 = arith.constant 0 : index
    %355 = vector.load %arg2[%c22_219, %c32_220, %c0_221] : memref<24x33x8xf32, #tpu.memory_space<vmem>>, vector<1x1x8xf32>
    %356 = vector.shape_cast %355 : vector<1x1x8xf32> to vector<1x8xf32>
    %357 = vector.broadcast %356 : vector<1x8xf32> to vector<16x8xf32>
    %358 = arith.addf %354, %357 : vector<16x8xf32>
    %359 = vector.shape_cast %344 : vector<16x8xf32> to vector<2x8x8xf32>
    %360 = vector.shape_cast %351 : vector<16x8xf32> to vector<2x8x8xf32>
    %361 = vector.shape_cast %358 : vector<16x8xf32> to vector<2x8x8xf32>
    "tpu.trace_start"() <{level = 10 : i32, message = "bse,bte->bst"}> : () -> ()
    %cst_222 = arith.constant dense<0.000000e+00> : vector<2x8x8xf32>
    %362 = tpu.matmul %359, %360, %cst_222 {dimension_numbers = #tpu.dot_dimension_numbers<[2], [2], [1], [1], [0, 0, 0, 1, 1, 1], [0], [0]>} : vector<2x8x8xf32>, vector<2x8x8xf32>, vector<2x8x8xf32> -> vector<2x8x8xf32>
    "tpu.trace_stop"() : () -> ()
    %cst_223 = arith.constant 0.353553385 : f32
    %363 = vector.broadcast %cst_223 : f32 to vector<2x8x8xf32>
    %364 = arith.mulf %362, %363 : vector<2x8x8xf32>
    %cst_224 = arith.constant dense<0xFF800000> : vector<2x8xf32>
    %365 = vector.multi_reduction <maximumf>, %364, %cst_224 [2] : vector<2x8x8xf32> to vector<2x8xf32>
    %366 = vector.shape_cast %365 : vector<2x8xf32> to vector<2x8x1xf32>
    %367 = vector.broadcast %366 : vector<2x8x1xf32> to vector<2x8x8xf32>
    %368 = arith.subf %364, %367 : vector<2x8x8xf32>
    %369 = math.exp %368 : vector<2x8x8xf32>
    %cst_225 = arith.constant dense<0.000000e+00> : vector<2x8xf32>
    %370 = vector.multi_reduction <add>, %369, %cst_225 [2] : vector<2x8x8xf32> to vector<2x8xf32>
    %371 = vector.shape_cast %370 : vector<2x8xf32> to vector<2x8x1xf32>
    %372 = tpu.reciprocal %371 {approx = true} : vector<2x8x1xf32> -> vector<2x8x1xf32>
    %373 = vector.broadcast %372 : vector<2x8x1xf32> to vector<2x8x8xf32>
    %374 = arith.mulf %369, %373 : vector<2x8x8xf32>
    "tpu.trace_start"() <{level = 10 : i32, message = "bst,bte->bse"}> : () -> ()
    %cst_226 = arith.constant dense<0.000000e+00> : vector<2x8x8xf32>
    %375 = tpu.matmul %374, %361, %cst_226 {dimension_numbers = #tpu.dot_dimension_numbers<[2], [1], [1], [2], [0, 0, 0, 1, 1, 2], [0], [0]>} : vector<2x8x8xf32>, vector<2x8x8xf32>, vector<2x8x8xf32> -> vector<2x8x8xf32>
    "tpu.trace_stop"() : () -> ()
    %376 = vector.extract_strided_slice %375 {offsets = [0, 7, 0], sizes = [2, 1, 8], strides = [1, 1, 1]} : vector<2x8x8xf32> to vector<2x1x8xf32>
    %377 = vector.shape_cast %376 : vector<2x1x8xf32> to vector<2x8xf32>
    %c6_227 = arith.constant 6 : index
    %c0_228 = arith.constant 0 : index
    %c0_229 = arith.constant 0 : index
    %378 = vector.load %arg3[%c6_227, %c0_228, %c0_229] : memref<8x8x32xf32, #tpu.memory_space<vmem>>, vector<1x8x32xf32>
    %379 = vector.shape_cast %378 : vector<1x8x32xf32> to vector<8x32xf32>
    %cst_230 = arith.constant dense<0.000000e+00> : vector<2x32xf32>
    %380 = tpu.matmul %377, %379, %cst_230 {dimension_numbers = #tpu.dot_dimension_numbers<[1], [0], [0], [1], [0, 0, 1, 1], [], []>} : vector<2x8xf32>, vector<8x32xf32>, vector<2x32xf32> -> vector<2x32xf32>
    %381 = arith.addf %337, %380 : vector<2x32xf32>
    %c15 = arith.constant 15 : index
    %c0_231 = arith.constant 0 : index
    %c0_232 = arith.constant 0 : index
    %382 = vector.load %arg2[%c15, %c0_231, %c0_232] : memref<24x33x8xf32, #tpu.memory_space<vmem>>, vector<1x32x8xf32>
    %383 = vector.shape_cast %382 : vector<1x32x8xf32> to vector<32x8xf32>
    %cst_233 = arith.constant dense<0.000000e+00> : vector<16x8xf32>
    %384 = tpu.matmul %244, %383, %cst_233 {dimension_numbers = #tpu.dot_dimension_numbers<[1], [0], [0], [1], [0, 0, 1, 1], [], []>} : vector<16x32xf32>, vector<32x8xf32>, vector<16x8xf32> -> vector<16x8xf32>
    %c15_234 = arith.constant 15 : index
    %c32_235 = arith.constant 32 : index
    %c0_236 = arith.constant 0 : index
    %385 = vector.load %arg2[%c15_234, %c32_235, %c0_236] : memref<24x33x8xf32, #tpu.memory_space<vmem>>, vector<1x1x8xf32>
    %386 = vector.shape_cast %385 : vector<1x1x8xf32> to vector<1x8xf32>
    %387 = vector.broadcast %386 : vector<1x8xf32> to vector<16x8xf32>
    %388 = arith.addf %384, %387 : vector<16x8xf32>
    %c19_237 = arith.constant 19 : index
    %c0_238 = arith.constant 0 : index
    %c0_239 = arith.constant 0 : index
    %389 = vector.load %arg2[%c19_237, %c0_238, %c0_239] : memref<24x33x8xf32, #tpu.memory_space<vmem>>, vector<1x32x8xf32>
    %390 = vector.shape_cast %389 : vector<1x32x8xf32> to vector<32x8xf32>
    %cst_240 = arith.constant dense<0.000000e+00> : vector<16x8xf32>
    %391 = tpu.matmul %244, %390, %cst_240 {dimension_numbers = #tpu.dot_dimension_numbers<[1], [0], [0], [1], [0, 0, 1, 1], [], []>} : vector<16x32xf32>, vector<32x8xf32>, vector<16x8xf32> -> vector<16x8xf32>
    %c19_241 = arith.constant 19 : index
    %c32_242 = arith.constant 32 : index
    %c0_243 = arith.constant 0 : index
    %392 = vector.load %arg2[%c19_241, %c32_242, %c0_243] : memref<24x33x8xf32, #tpu.memory_space<vmem>>, vector<1x1x8xf32>
    %393 = vector.shape_cast %392 : vector<1x1x8xf32> to vector<1x8xf32>
    %394 = vector.broadcast %393 : vector<1x8xf32> to vector<16x8xf32>
    %395 = arith.addf %391, %394 : vector<16x8xf32>
    %c23_244 = arith.constant 23 : index
    %c0_245 = arith.constant 0 : index
    %c0_246 = arith.constant 0 : index
    %396 = vector.load %arg2[%c23_244, %c0_245, %c0_246] : memref<24x33x8xf32, #tpu.memory_space<vmem>>, vector<1x32x8xf32>
    %397 = vector.shape_cast %396 : vector<1x32x8xf32> to vector<32x8xf32>
    %cst_247 = arith.constant dense<0.000000e+00> : vector<16x8xf32>
    %398 = tpu.matmul %244, %397, %cst_247 {dimension_numbers = #tpu.dot_dimension_numbers<[1], [0], [0], [1], [0, 0, 1, 1], [], []>} : vector<16x32xf32>, vector<32x8xf32>, vector<16x8xf32> -> vector<16x8xf32>
    %c23_248 = arith.constant 23 : index
    %c32_249 = arith.constant 32 : index
    %c0_250 = arith.constant 0 : index
    %399 = vector.load %arg2[%c23_248, %c32_249, %c0_250] : memref<24x33x8xf32, #tpu.memory_space<vmem>>, vector<1x1x8xf32>
    %400 = vector.shape_cast %399 : vector<1x1x8xf32> to vector<1x8xf32>
    %401 = vector.broadcast %400 : vector<1x8xf32> to vector<16x8xf32>
    %402 = arith.addf %398, %401 : vector<16x8xf32>
    %403 = vector.shape_cast %388 : vector<16x8xf32> to vector<2x8x8xf32>
    %404 = vector.shape_cast %395 : vector<16x8xf32> to vector<2x8x8xf32>
    %405 = vector.shape_cast %402 : vector<16x8xf32> to vector<2x8x8xf32>
    "tpu.trace_start"() <{level = 10 : i32, message = "bse,bte->bst"}> : () -> ()
    %cst_251 = arith.constant dense<0.000000e+00> : vector<2x8x8xf32>
    %406 = tpu.matmul %403, %404, %cst_251 {dimension_numbers = #tpu.dot_dimension_numbers<[2], [2], [1], [1], [0, 0, 0, 1, 1, 1], [0], [0]>} : vector<2x8x8xf32>, vector<2x8x8xf32>, vector<2x8x8xf32> -> vector<2x8x8xf32>
    "tpu.trace_stop"() : () -> ()
    %cst_252 = arith.constant 0.353553385 : f32
    %407 = vector.broadcast %cst_252 : f32 to vector<2x8x8xf32>
    %408 = arith.mulf %406, %407 : vector<2x8x8xf32>
    %cst_253 = arith.constant dense<0xFF800000> : vector<2x8xf32>
    %409 = vector.multi_reduction <maximumf>, %408, %cst_253 [2] : vector<2x8x8xf32> to vector<2x8xf32>
    %410 = vector.shape_cast %409 : vector<2x8xf32> to vector<2x8x1xf32>
    %411 = vector.broadcast %410 : vector<2x8x1xf32> to vector<2x8x8xf32>
    %412 = arith.subf %408, %411 : vector<2x8x8xf32>
    %413 = math.exp %412 : vector<2x8x8xf32>
    %cst_254 = arith.constant dense<0.000000e+00> : vector<2x8xf32>
    %414 = vector.multi_reduction <add>, %413, %cst_254 [2] : vector<2x8x8xf32> to vector<2x8xf32>
    %415 = vector.shape_cast %414 : vector<2x8xf32> to vector<2x8x1xf32>
    %416 = tpu.reciprocal %415 {approx = true} : vector<2x8x1xf32> -> vector<2x8x1xf32>
    %417 = vector.broadcast %416 : vector<2x8x1xf32> to vector<2x8x8xf32>
    %418 = arith.mulf %413, %417 : vector<2x8x8xf32>
    "tpu.trace_start"() <{level = 10 : i32, message = "bst,bte->bse"}> : () -> ()
    %cst_255 = arith.constant dense<0.000000e+00> : vector<2x8x8xf32>
    %419 = tpu.matmul %418, %405, %cst_255 {dimension_numbers = #tpu.dot_dimension_numbers<[2], [1], [1], [2], [0, 0, 0, 1, 1, 2], [0], [0]>} : vector<2x8x8xf32>, vector<2x8x8xf32>, vector<2x8x8xf32> -> vector<2x8x8xf32>
    "tpu.trace_stop"() : () -> ()
    %420 = vector.extract_strided_slice %419 {offsets = [0, 7, 0], sizes = [2, 1, 8], strides = [1, 1, 1]} : vector<2x8x8xf32> to vector<2x1x8xf32>
    %421 = vector.shape_cast %420 : vector<2x1x8xf32> to vector<2x8xf32>
    %c7_256 = arith.constant 7 : index
    %c0_257 = arith.constant 0 : index
    %c0_258 = arith.constant 0 : index
    %422 = vector.load %arg3[%c7_256, %c0_257, %c0_258] : memref<8x8x32xf32, #tpu.memory_space<vmem>>, vector<1x8x32xf32>
    %423 = vector.shape_cast %422 : vector<1x8x32xf32> to vector<8x32xf32>
    %cst_259 = arith.constant dense<0.000000e+00> : vector<2x32xf32>
    %424 = tpu.matmul %421, %423, %cst_259 {dimension_numbers = #tpu.dot_dimension_numbers<[1], [0], [0], [1], [0, 0, 1, 1], [], []>} : vector<2x8xf32>, vector<8x32xf32>, vector<2x32xf32> -> vector<2x32xf32>
    %425 = arith.addf %381, %424 : vector<2x32xf32>
    %426 = vector.broadcast %245 : vector<1x32xf32> to vector<2x32xf32>
    %427 = arith.addf %425, %426 : vector<2x32xf32>
    %428 = vector.shape_cast %244 : vector<16x32xf32> to vector<2x8x32xf32>
    %429 = vector.extract_strided_slice %428 {offsets = [0, 7, 0], sizes = [2, 1, 32], strides = [1, 1, 1]} : vector<2x8x32xf32> to vector<2x1x32xf32>
    %430 = vector.shape_cast %429 : vector<2x1x32xf32> to vector<2x32xf32>
    %431 = arith.addf %430, %427 : vector<2x32xf32>
    %cst_260 = arith.constant dense<0.000000e+00> : vector<2xf32>
    %432 = vector.multi_reduction <add>, %431, %cst_260 [1] : vector<2x32xf32> to vector<2xf32>
    %433 = vector.shape_cast %432 : vector<2xf32> to vector<2x1xf32>
    %cst_261 = arith.constant 3.200000e+01 : f32
    %434 = vector.broadcast %cst_261 : f32 to vector<2x1xf32>
    %435 = arith.divf %433, %434 : vector<2x1xf32>
    %436 = vector.broadcast %435 : vector<2x1xf32> to vector<2x32xf32>
    %437 = arith.subf %431, %436 : vector<2x32xf32>
    %438 = arith.mulf %437, %437 : vector<2x32xf32>
    %cst_262 = arith.constant dense<0.000000e+00> : vector<2xf32>
    %439 = vector.multi_reduction <add>, %438, %cst_262 [1] : vector<2x32xf32> to vector<2xf32>
    %440 = vector.shape_cast %439 : vector<2xf32> to vector<2x1xf32>
    %cst_263 = arith.constant 3.200000e+01 : f32
    %441 = vector.broadcast %cst_263 : f32 to vector<2x1xf32>
    %442 = arith.divf %440, %441 : vector<2x1xf32>
    %443 = vector.broadcast %435 : vector<2x1xf32> to vector<2x32xf32>
    %444 = arith.subf %431, %443 : vector<2x32xf32>
    %cst_264 = arith.constant 9.99999974E-6 : f32
    %445 = vector.broadcast %cst_264 : f32 to vector<2x1xf32>
    %446 = arith.addf %442, %445 : vector<2x1xf32>
    %447 = math.rsqrt %446 : vector<2x1xf32>
    %448 = vector.broadcast %447 : vector<2x1xf32> to vector<2x32xf32>
    %449 = arith.mulf %444, %448 : vector<2x32xf32>
    %450 = vector.broadcast %247 : vector<1x32xf32> to vector<2x32xf32>
    %451 = arith.mulf %449, %450 : vector<2x32xf32>
    %452 = vector.broadcast %248 : vector<1x32xf32> to vector<2x32xf32>
    %453 = arith.addf %451, %452 : vector<2x32xf32>
    %c1_265 = arith.constant 1 : index
    %c0_266 = arith.constant 0 : index
    %c0_267 = arith.constant 0 : index
    %454 = vector.load %arg4[%c1_265, %c0_266, %c0_267] : memref<2x33x2048xbf16, #tpu.memory_space<vmem>>, vector<1x32x2048xbf16>
    %455 = vector.shape_cast %454 : vector<1x32x2048xbf16> to vector<32x2048xbf16>
    %c1_268 = arith.constant 1 : index
    %c32_269 = arith.constant 32 : index
    %c0_270 = arith.constant 0 : index
    %456 = vector.load %arg4[%c1_268, %c32_269, %c0_270] : memref<2x33x2048xbf16, #tpu.memory_space<vmem>>, vector<1x1x2048xbf16>
    %457 = vector.shape_cast %456 : vector<1x1x2048xbf16> to vector<1x2048xbf16>
    %458 = arith.extf %457 : vector<1x2048xbf16> to vector<1x2048xf32>
    %459 = arith.truncf %453 : vector<2x32xf32> to vector<2x32xbf16>
    %cst_271 = arith.constant dense<0.000000e+00> : vector<2x2048xf32>
    %460 = tpu.matmul %459, %455, %cst_271 {dimension_numbers = #tpu.dot_dimension_numbers<[1], [0], [0], [1], [0, 0, 1, 1], [], []>} : vector<2x32xbf16>, vector<32x2048xbf16>, vector<2x2048xf32> -> vector<2x2048xf32>
    %461 = vector.broadcast %458 : vector<1x2048xf32> to vector<2x2048xf32>
    %462 = arith.addf %460, %461 : vector<2x2048xf32>
    %cst_272 = arith.constant 0.000000e+00 : f32
    %463 = vector.broadcast %cst_272 : f32 to vector<2x2048xf32>
    %464 = arith.maximumf %462, %463 : vector<2x2048xf32>
    %465 = arith.truncf %464 : vector<2x2048xf32> to vector<2x2048xbf16>
    %c1_273 = arith.constant 1 : index
    %c0_274 = arith.constant 0 : index
    %c0_275 = arith.constant 0 : index
    %466 = vector.load %arg5[%c1_273, %c0_274, %c0_275] : memref<2x2048x32xbf16, #tpu.memory_space<vmem>>, vector<1x2048x32xbf16>
    %467 = vector.shape_cast %466 : vector<1x2048x32xbf16> to vector<2048x32xbf16>
    %cst_276 = arith.constant dense<0.000000e+00> : vector<2x32xf32>
    %468 = tpu.matmul %465, %467, %cst_276 {dimension_numbers = #tpu.dot_dimension_numbers<[1], [0], [0], [1], [0, 0, 1, 1], [], []>} : vector<2x2048xbf16>, vector<2048x32xbf16>, vector<2x32xf32> -> vector<2x32xf32>
    %469 = vector.broadcast %246 : vector<1x32xf32> to vector<2x32xf32>
    %470 = arith.addf %468, %469 : vector<2x32xf32>
    %471 = arith.addf %453, %470 : vector<2x32xf32>
    %cst_277 = arith.constant dense<0.000000e+00> : vector<2xf32>
    %472 = vector.multi_reduction <add>, %471, %cst_277 [1] : vector<2x32xf32> to vector<2xf32>
    %473 = vector.shape_cast %472 : vector<2xf32> to vector<2x1xf32>
    %cst_278 = arith.constant 3.200000e+01 : f32
    %474 = vector.broadcast %cst_278 : f32 to vector<2x1xf32>
    %475 = arith.divf %473, %474 : vector<2x1xf32>
    %476 = vector.broadcast %475 : vector<2x1xf32> to vector<2x32xf32>
    %477 = arith.subf %471, %476 : vector<2x32xf32>
    %478 = arith.mulf %477, %477 : vector<2x32xf32>
    %cst_279 = arith.constant dense<0.000000e+00> : vector<2xf32>
    %479 = vector.multi_reduction <add>, %478, %cst_279 [1] : vector<2x32xf32> to vector<2xf32>
    %480 = vector.shape_cast %479 : vector<2xf32> to vector<2x1xf32>
    %cst_280 = arith.constant 3.200000e+01 : f32
    %481 = vector.broadcast %cst_280 : f32 to vector<2x1xf32>
    %482 = arith.divf %480, %481 : vector<2x1xf32>
    %483 = vector.broadcast %475 : vector<2x1xf32> to vector<2x32xf32>
    %484 = arith.subf %471, %483 : vector<2x32xf32>
    %cst_281 = arith.constant 9.99999974E-6 : f32
    %485 = vector.broadcast %cst_281 : f32 to vector<2x1xf32>
    %486 = arith.addf %482, %485 : vector<2x1xf32>
    %487 = math.rsqrt %486 : vector<2x1xf32>
    %488 = vector.broadcast %487 : vector<2x1xf32> to vector<2x32xf32>
    %489 = arith.mulf %484, %488 : vector<2x32xf32>
    %490 = vector.broadcast %249 : vector<1x32xf32> to vector<2x32xf32>
    %491 = arith.mulf %489, %490 : vector<2x32xf32>
    %492 = vector.broadcast %250 : vector<1x32xf32> to vector<2x32xf32>
    %493 = arith.addf %491, %492 : vector<2x32xf32>
    %c28 = arith.constant 28 : index
    %c0_282 = arith.constant 0 : index
    %494 = vector.load %arg1[%c28, %c0_282] : memref<30x32xf32, #tpu.memory_space<vmem>>, vector<1x32xf32>
    %c29 = arith.constant 29 : index
    %c0_283 = arith.constant 0 : index
    %495 = vector.load %arg1[%c29, %c0_283] : memref<30x32xf32, #tpu.memory_space<vmem>>, vector<1x1xf32>
    %496 = vector.broadcast %494 : vector<1x32xf32> to vector<2x32xf32>
    %497 = arith.mulf %493, %496 : vector<2x32xf32>
    %cst_284 = arith.constant dense<0.000000e+00> : vector<2xf32>
    %498 = vector.multi_reduction <add>, %497, %cst_284 [1] : vector<2x32xf32> to vector<2xf32>
    %499 = vector.shape_cast %498 : vector<2xf32> to vector<2x1xf32>
    %500 = vector.broadcast %495 : vector<1x1xf32> to vector<2x1xf32>
    %501 = arith.addf %499, %500 : vector<2x1xf32>
    %c0_285 = arith.constant 0 : index
    %c0_286 = arith.constant 0 : index
    %502 = vector.load %arg6[%c0_285, %c0_286] : memref<2x1xf32, #tpu.memory_space<vmem>>, vector<2x1xf32>
    tpu.vector_store %arg6[%c0_285, %c0_286], %501 {strides = array<i32>} : memref<2x1xf32, #tpu.memory_space<vmem>>, vector<2x1xf32>,
    return
  }
}

</mosaic_0001>

<bundles_post_ra>
// kernel: tpu_custom_call.1
= control target key start
LH: loop header
LB: loop body
LE: loop exit
PB: predicated region body
PF: predicated region fallthrough
CT: control target
= control target key end

     0   :  { %vm45_vm0 = vcmask 261120   ;;  %v11900_v14 = vmov 0.0   ;;  %vm11901_vm1 = vmmov 0   ;;  %vm297_vm2 = vcmask 64512   ;;  %s13969_s2 = inlined_call_operand.vmem [shape: f32[24,33,8], index: 2, kind: input, shape index: {}]   ;;  %s13970_s0 = inlined_call_operand.vmem [shape: f32[16,32], index: 0, kind: input, shape index: {}]   ;;  %s13971_s1 = inlined_call_operand.vmem [shape: f32[30,32], index: 1, kind: input, shape index: {}]   ;;  %s13972_s3 = inlined_call_operand.vmem [shape: f32[8,8,32], index: 3, kind: input, shape index: {}]   ;;  %s13973_s4 = inlined_call_operand.vmem [shape: bf16[2,33,2048], index: 4, kind: input, shape index: {}]   ;;  %s13974_s5 = inlined_call_operand.vmem [shape: bf16[2,2048,32], index: 5, kind: input, shape index: {}]   ;;  %s13975_s6 = inlined_call_operand.vmem [shape: f32[2,1], index: 6, kind: output, shape index: {}]  }
   0x1   :  { %v9623_v0 = vld [vmem:[%s13969_s2 + $0xb8] sm:$0xff]  ;;  %v9622_v2 = vld [vmem:[%s13969_s2 + $0xb0] sm:$0xff]  ;;  %v9621_v4 = vld [vmem:[%s13969_s2 + $0xa8] sm:$0xff]  ;;  %vm5979_vm3 = vcmask 1041409   ;;  %vm7461_vm4 = vcmask 261127   ;;  %vm7465_vm5 = vcmask 253952  }
   0x2   :  { %v39_v1 = vld [vmem:[%s13969_s2 + $0x18] sm:$0xff]  ;;  %11108 = vmatprep.subr.mxu1 %v9623_v0  ;;  %v38_v3 = vld [vmem:[%s13969_s2 + $0x10] sm:$0xff]  ;;  %v37_v5 = vld [vmem:[%s13969_s2 + $0x8] sm:$0xff]  ;;  %vm9609_vm6 = vcmask 7175   ;;  %vm9611_vm7 = vcmask 0  }
   0x3   :  { %11097 = vmatprep.subr.mxu0 %v39_v1  ;;  %11109 = vmatpush3.msra.mxu1 %v9623_v0  ;;  %v24_v6 = vld [vmem:[%s13970_s0] sm:$0xff]  ;;  %v25_v8 = vld [vmem:[%s13970_s0 + $0x8] sm:$0xff]  ;;  %v9631_v25 = vld [vmem:[%s13969_s2 + $0x158] sm:$0xff] }
   0x4   :  { %11098 = vmatpush3.msra.mxu0 %v39_v1  ;;  %11110 = vmatprep.subr.mxu1 %v9622_v2  ;;  %v26_v7 = vld [vmem:[%s13971_s1] sm:$0xff]  ;;  %v27_v9 = vld [vmem:[%s13971_s1 + $0x8] sm:$0xff]  ;;  %v9630_v26 = vld [vmem:[%s13969_s2 + $0x150] sm:$0xff] }
   0x5   :  { %11099 = vmatprep.subr.mxu0 %v38_v3  ;;  %11111 = vmatpush3.msra.mxu1 %v9622_v2  ;;  %v9620_v10 = vld [vmem:[%s13969_s2 + $0xa0] sm:$0xff]  ;;  %v11974_v12 = vadd.f32 %v26_v7, %v24_v6  ;;  %v11976_v13 = vadd.f32 %v27_v9, %v25_v8  ;;  %v9629_v27 = vld [vmem:[%s13969_s2 + $0x148] sm:$0xff]  ;;  %v9652_v58 = vld [vmem:[%s13969_s2 + $0xd8] sm:$0xff] }
   0x6   :  { %11100 = vmatpush3.msra.mxu0 %v38_v3  ;;  %v36_v11 = vld [vmem:[%s13969_s2] sm:$0xff]  ;;  %11112 = vmatprep.subr.mxu1 %v9621_v4  ;;  %v9651_v60 = vld [vmem:[%s13969_s2 + $0xd0] sm:$0xff]  ;;  %v9644_v62 = vld [vmem:[%s13969_s2 + $0x38] sm:$0xff] }
   0x7   :  { %11101 = vmatprep.subr.mxu0 %v37_v5  ;;  %11113 = vmatpush3.msra.mxu1 %v9621_v4  ;;  %v9625_v17 = vld [vmem:[%s13969_s2 + $0xc0] ss:$0 sm:$0xff]  ;;  %v9650_v63 = vld [vmem:[%s13969_s2 + $0xc8] sm:$0xff]  ;;  %v9643_v0 = vld [vmem:[%s13969_s2 + $0x30] sm:$0xff] }
   0x8   :  { %11102 = vmatpush3.msra.mxu0 %v37_v5  ;;  %11114 = vmatprep.subr.mxu1 %v9620_v10  ;;  %v9617_v19 = vld [vmem:[%s13969_s2 + $0x20] ss:$0 sm:$0xff]  ;;  %v9642_v1 = vld [vmem:[%s13969_s2 + $0x28] sm:$0xff] }
   0x9   :  { %11103 = vmatprep.subr.mxu0 %v36_v11  ;;  %11115 = vmatpush3.msra.mxu1 %v9620_v10  ;;  %v9628_v28 = vld [vmem:[%s13969_s2 + $0x140] sm:$0xff]  ;;  %v9655_v7 = vld [vmem:[%s13969_s2 + $0xe8] ss:$0 sm:$0xff] }
   0xa   :  { %11116 = vmatprep.mubr.msk.f32.mxu1 %vm45_vm0, %v11974_v12  ;;  %11104 = vmatpush3.msra.mxu0 %v36_v11  ;;  %v9633_v48 = vld [vmem:[%s13969_s2 + $0x160] ss:$0 sm:$0xff]  ;;  %v9647_v11 = vld [vmem:[%s13969_s2 + $0x48] ss:$0 sm:$0xff] }
   0xb   :  { %11105 = vmatprep.mubr.msk.f32.mxu0 %vm45_vm0, %v11974_v12  ;;  %11117 = vmatmul.mubr.msk.f32.vlgmr.msra.gmra.mxu1 %vm45_vm0, %v11976_v13  ;;  %v9653_v50 = vld [vmem:[%s13969_s2 + $0xe0] sm:$0xff] }
   0xc   :  { %11106 = vmatmul.mubr.msk.f32.vlgmr.msra.gmra.mxu0 %vm45_vm0, %v11976_v13  ;;  %11130 = vmatprep.subr.mxu1 %v11900_v14  ;;  %v9645_v53 = vld [vmem:[%s13969_s2 + $0x40] sm:$0xff] }
   0xd   :  { %11127 = vmatprep.mubr.msk.f32.mxu0 %vm45_vm0, %v11974_v12  ;;  %11132 = vmatprep.mubr.msk.f32.mxu1 %vm11901_vm1, %v11900_v14 }
   0xe   :  { %11119 = vmatprep.subr.mxu0 %v9631_v25 }
   0xf   :  { %11120 = vmatpush3.msra.mxu0 %v9631_v25 }
  0x10   :  { %11121 = vmatprep.subr.mxu0 %v9630_v26 }
  0x11   :  { %11122 = vmatpush3.msra.mxu0 %v9630_v26 }
  0x12   :  { %11123 = vmatprep.subr.mxu0 %v9629_v27 }
  0x13   :  { %11124 = vmatpush3.msra.mxu0 %v9629_v27 }
  0x14   :  { %11125 = vmatprep.subr.mxu0 %v9628_v28 }
  0x15   :  { %11126 = vmatpush3.msra.mxu0 %v9628_v28 }
  0x16   :  { %11128 = vmatmul.mubr.msk.f32.vlgmr.msra.gmra.mxu0 %vm45_vm0, %v11976_v13  ;;  %11140 = vmatprep.subr.mxu0 %v11900_v14 }
  0x17   :  { %11142 = vmatprep.mubr.msk.f32.mxu0 %vm11901_vm1, %v11900_v14 }
  0xcb   :  { %v11118_v15 = vpop.f32.mrf.mxu1 }
  0xcc   :  { %v11107_v16 = vpop.f32.mrf.mxu0  ;;  %v209_v23 = vadd.f32 %v11118_v15, %v9625_v17 }
  0xcd   :  { %v203_v18 = vpop.f32.mrf.mxu1  ;;  %v124_v24 = vadd.f32 %v11107_v16, %v9617_v19 }
  0xce   :  { %v204_v20 = vadd.f32 %v9625_v17, %v203_v18  ;;  %v118_v21 = vpop.f32.mrf.mxu0 }
  0xcf   :  { %v119_v22 = vadd.f32 %v9617_v19, %v118_v21  ;;  %v9661_v19 = vld [vmem:[%s13969_s2 + $0x180] sm:$0xff]  ;;  %v9659_v21 = vld [vmem:[%s13969_s2 + $0x170] sm:$0xff] }
  0xd0   :  { %11131 = vmatpush3.xpose.msk.msra.mxu1 %vm297_vm2, %v204_v20  ;;  %v9660_v20 = vld [vmem:[%s13969_s2 + $0x178] sm:$0xff] }
  0xd1   :  { %11135 = vmatprep.subr.mxu1 %v11900_v14 }
  0xd3   :  { %11133 = vmatmul.mubr.msk.f32.vlgmr.msra.gmra.mxu1 %vm297_vm2, %v119_v22  ;;  %v9658_v22 = vld [vmem:[%s13969_s2 + $0x168] sm:$0xff] }
  0xd4   :  { %11136 = vmatpush3.xpose.msk.msra.mxu1 %vm297_vm2, %v209_v23  ;;  %11137 = vmatprep.mubr.msk.f32.mxu1 %vm11901_vm1, %v11900_v14 }
  0xd5   :  { %11145 = vmatprep.subr.mxu1 %v11900_v14 }
  0xd6   :  { %v11129_v47 = vpop.f32.mrf.mxu0 }
  0xd7   :  { %11138 = vmatmul.mubr.msk.f32.vlgmr.msra.gmra.mxu1 %vm297_vm2, %v124_v24  ;;  %v294_v49 = vadd.f32 %v11129_v47, %v9633_v48 }
  0xd8   :  { %11147 = vmatprep.mubr.msk.f32.mxu1 %vm11901_vm1, %v11900_v14  ;;  %v288_v51 = vpop.f32.mrf.mxu0 }
  0xd9   :  { %v289_v52 = vadd.f32 %v9633_v48, %v288_v51  ;;  %11146 = vmatpush3.msra.mxu1 %v294_v49 }
  0xda   :  { %11161 = vmatprep.subr.mxu1 %v9653_v50 }
  0xdb   :  { %11141 = vmatpush3.msra.mxu0 %v289_v52 }
  0xdc   :  { %11150 = vmatprep.subr.mxu0 %v9645_v53 }
 0x193   :  { %v370_v29 = vpop.f32.mrf.mxu1 }
 0x194   :  { %v450_v34 = vmul.f32 0.35355338, %v370_v29 }
 0x195   :  { %v11134_v30 = vpop.f32.mrf.mxu1 }
 0x196   :  { %v452_v36 = vsel %vm297_vm2, %v450_v34, -inf }
 0x197   :  { %v446_v31 = vpop.f32.mrf.mxu1 }
 0x198   :  { %v451_v32 = vmul.f32 0.35355338, %v446_v31 }
 0x199   :  { %v11139_v33 = vpop.f32.mrf.mxu1 }
 0x19a   :  { %v455_v35 = vsel %vm297_vm2, %v451_v32, -inf }
 0x19b   :  { %456 = vmax.xlane.f32.xlu0 %v455_v35 }
 0x19f   :  { %453 = vmax.xlane.f32.xlu0 %v452_v36 }
 0x224   :  { %v457_v37 = vpop.xlane.xlu0 %456 }
 0x225   :  { %v459_v38 = vsub.f32 %v451_v32, %v457_v37 }
 0x227   :  { %v462_v39 = vmul.f32 1.442695, %v459_v38 }
 0x228   :  { %v454_v40 = vpop.xlane.xlu0 %453 }
 0x229   :  { %11820 = vpow2.f32 %v462_v39  ;;  %v458_v41 = vsub.f32 %v450_v34, %v454_v40 }
 0x22b   :  { %v460_v42 = vmul.f32 1.442695, %v458_v41 }
 0x22d   :  { %11822 = vpow2.f32 %v460_v42  ;;  %v9663_v42 = vld [vmem:[%s13969_s2 + $0x188] ss:$0 sm:$0xff] }
 0x236   :  { %v11821_v43 = vpop.eup %11820 }
 0x237   :  { %v467_v44 = vsel %vm297_vm2, %v11821_v43, 0.0 }
 0x238   :  { %468 = vadd.xlane.f32.xlu1 %v467_v44 }
 0x23a   :  { %v11823_v45 = vpop.eup %11822 }
 0x23b   :  { %v464_v46 = vsel %vm297_vm2, %v11823_v45, 0.0 }
 0x23c   :  { %465 = vadd.xlane.f32.xlu1 %v464_v46  ;;  %v620_v46 = vld [vmem:[%s13972_s3] sm:$0xff] }
 0x2c1   :  { %v469_v54 = vpop.xlane.xlu1 %468 }
 0x2c2   :  { %11824 = vrcp.f32 %v469_v54  ;;  %v9672_v54 = vld [vmem:[%s13972_s3 + $0x8] sm:$0xff] }
 0x2c5   :  { %v466_v55 = vpop.xlane.xlu1 %465 }
 0x2c6   :  { %11826 = vrcp.f32 %v466_v55  ;;  %v9687_v55 = vld [vmem:[%s13969_s2 + $0x100] sm:$0xff] }
 0x2cf   :  { %v11825_v56 = vpop.eup %11824 }
 0x2d0   :  { %v473_v57 = vmul.f32 %v11825_v56, %v11821_v43  ;;  %v9686_v56 = vld [vmem:[%s13969_s2 + $0xf8] sm:$0xff] }
 0x2d2   :  { %11148 = vmatmul.mubr.msk.f32.vlgmr.msra.gmra.mxu1 %vm297_vm2, %v473_v57  ;;  %v9680_v57 = vld [vmem:[%s13969_s2 + $0x68] sm:$0xff] }
 0x2d3   :  { %v11827_v59 = vpop.eup %11826  ;;  %11162 = vmatpush3.msra.mxu1 %v9653_v50  ;;  %11169 = vmatprep.mubr.msk.f32.mxu1 %vm45_vm0, %v11974_v12 }
 0x2d4   :  { %11163 = vmatprep.subr.mxu1 %v9652_v58  ;;  %v472_v61 = vmul.f32 %v11827_v59, %v11823_v45 }
 0x2d5   :  { %11164 = vmatpush3.msra.mxu1 %v9652_v58  ;;  %v9685_v58 = vld [vmem:[%s13969_s2 + $0xf0] sm:$0xff] }
 0x2d6   :  { %11165 = vmatprep.subr.mxu1 %v9651_v60  ;;  %11143 = vmatmul.mubr.msk.f32.vlgmr.msra.gmra.mxu0 %vm297_vm2, %v472_v61 }
 0x2d7   :  { %11151 = vmatpush3.msra.mxu0 %v9645_v53  ;;  %11166 = vmatpush3.msra.mxu1 %v9651_v60  ;;  %v9688_v53 = vld [vmem:[%s13969_s2 + $0x108] sm:$0xff] }
 0x2d8   :  { %11152 = vmatprep.subr.mxu0 %v9644_v62  ;;  %11167 = vmatprep.subr.mxu1 %v9650_v63 }
 0x2d9   :  { %11153 = vmatpush3.msra.mxu0 %v9644_v62  ;;  %11168 = vmatpush3.msra.mxu1 %v9650_v63  ;;  %v9679_v62 = vld [vmem:[%s13969_s2 + $0x60] sm:$0xff] }
 0x2da   :  { %11154 = vmatprep.subr.mxu0 %v9643_v0  ;;  %11170 = vmatmul.mubr.msk.f32.vlgmr.msra.gmra.mxu1 %vm45_vm0, %v11976_v13 }
 0x2db   :  { %11155 = vmatpush3.msra.mxu0 %v9643_v0  ;;  %11158 = vmatprep.mubr.msk.f32.mxu0 %vm45_vm0, %v11974_v12  ;;  %v9678_v0 = vld [vmem:[%s13969_s2 + $0x58] sm:$0xff] }
 0x2dc   :  { %11156 = vmatprep.subr.mxu0 %v9642_v1  ;;  %11183 = vmatprep.subr.mxu1 %v11900_v14 }
 0x2dd   :  { %11157 = vmatpush3.msra.mxu0 %v9642_v1  ;;  %11185 = vmatprep.mubr.msk.f32.mxu1 %vm11901_vm1, %v11900_v14  ;;  %v9677_v1 = vld [vmem:[%s13969_s2 + $0x50] sm:$0xff] }
 0x2de   :  { %11159 = vmatmul.mubr.msk.f32.vlgmr.msra.gmra.mxu0 %vm45_vm0, %v11976_v13  ;;  %11172 = vmatprep.subr.mxu0 %v9661_v19 }
 0x2df   :  { %11180 = vmatprep.mubr.msk.f32.mxu0 %vm45_vm0, %v11974_v12  ;;  %11173 = vmatpush3.msra.mxu0 %v9661_v19  ;;  %v9696_v19 = vld [vmem:[%s13969_s2 + $0x1a8] sm:$0xff] }
 0x2e0   :  { %11174 = vmatprep.subr.mxu0 %v9660_v20 }
 0x2e1   :  { %11175 = vmatpush3.msra.mxu0 %v9660_v20  ;;  %v9695_v20 = vld [vmem:[%s13969_s2 + $0x1a0] sm:$0xff] }
 0x2e2   :  { %11176 = vmatprep.subr.mxu0 %v9659_v21 }
 0x2e3   :  { %11177 = vmatpush3.msra.mxu0 %v9659_v21  ;;  %v9694_v21 = vld [vmem:[%s13969_s2 + $0x198] sm:$0xff] }
 0x2e4   :  { %11178 = vmatprep.subr.mxu0 %v9658_v22 }
 0x2e5   :  { %11179 = vmatpush3.msra.mxu0 %v9658_v22  ;;  %v9693_v22 = vld [vmem:[%s13969_s2 + $0x190] sm:$0xff] }
 0x2e6   :  { %11181 = vmatmul.mubr.msk.f32.vlgmr.msra.gmra.mxu0 %vm45_vm0, %v11976_v13  ;;  %11193 = vmatprep.subr.mxu0 %v11900_v14 }
 0x2e7   :  { %11195 = vmatprep.mubr.msk.f32.mxu0 %vm11901_vm1, %v11900_v14 }
 0x392   :  { %v12070_v2 = vpop.f32.mrf.mxu1 }
 0x394   :  { %v11149_v3 = vpop.f32.mrf.mxu1 }
 0x396   :  { %v12072_v4 = vpop.f32.mrf.mxu0 }
 0x398   :  { %v11144_v5 = vpop.f32.mrf.mxu0 }
 0x399   :  { %v9690_v5 = vld [vmem:[%s13969_s2 + $0x110] ss:$0 sm:$0xff] }
 0x39a   :  { %v11171_v6 = vpop.f32.mrf.mxu1 }
 0x39b   :  { %v788_v17 = vadd.f32 %v11171_v6, %v9655_v7 }
 0x39c   :  { %v782_v8 = vpop.f32.mrf.mxu1 }
 0x39d   :  { %v783_v9 = vadd.f32 %v9655_v7, %v782_v8 }
 0x39e   :  { %v11160_v10 = vpop.f32.mrf.mxu0 }
 0x39f   :  { %11184 = vmatpush3.xpose.msk.msra.mxu1 %vm297_vm2, %v783_v9  ;;  %v703_v18 = vadd.f32 %v11160_v10, %v9647_v11 }
 0x3a0   :  { %v697_v15 = vpop.f32.mrf.mxu0  ;;  %11188 = vmatprep.subr.mxu1 %v11900_v14 }
 0x3a1   :  { %v698_v16 = vadd.f32 %v9647_v11, %v697_v15  ;;  %v9682_v15 = vld [vmem:[%s13969_s2 + $0x70] ss:$0 sm:$0xff] }
 0x3a3   :  { %11186 = vmatmul.mubr.msk.f32.vlgmr.msra.gmra.mxu1 %vm297_vm2, %v698_v16 }
 0x3a4   :  { %11189 = vmatpush3.xpose.msk.msra.mxu1 %vm297_vm2, %v788_v17  ;;  %11190 = vmatprep.mubr.msk.f32.mxu1 %vm11901_vm1, %v11900_v14 }
 0x3a5   :  { %11198 = vmatprep.subr.mxu1 %v11900_v14 }
 0x3a6   :  { %v11182_v41 = vpop.f32.mrf.mxu0 }
 0x3a7   :  { %11191 = vmatmul.mubr.msk.f32.vlgmr.msra.gmra.mxu1 %vm297_vm2, %v703_v18  ;;  %v873_v43 = vadd.f32 %v11182_v41, %v9663_v42 }
 0x3a8   :  { %11200 = vmatprep.mubr.msk.f32.mxu1 %vm11901_vm1, %v11900_v14  ;;  %v867_v44 = vpop.f32.mrf.mxu0 }
 0x3a9   :  { %v868_v45 = vadd.f32 %v9663_v42, %v867_v44  ;;  %11199 = vmatpush3.msra.mxu1 %v873_v43  ;;  %v9698_v42 = vld [vmem:[%s13969_s2 + $0x1b0] ss:$0 sm:$0xff] }
 0x3aa   :  { %11208 = vmatprep.subr.mxu1 %v620_v46 }
 0x3ab   :  { %11194 = vmatpush3.msra.mxu0 %v868_v45 }
 0x3ac   :  { %11203 = vmatprep.subr.mxu0 %v9672_v54 }
 0x463   :  { %v948_v23 = vpop.f32.mrf.mxu1 }
 0x464   :  { %v1028_v24 = vmul.f32 0.35355338, %v948_v23 }
 0x465   :  { %v11187_v25 = vpop.f32.mrf.mxu1 }
 0x466   :  { %v1030_v26 = vsel %vm297_vm2, %v1028_v24, -inf }
 0x467   :  { %1031 = vmax.xlane.f32.xlu0 %v1030_v26  ;;  %v1024_v27 = vpop.f32.mrf.mxu1 }
 0x468   :  { %v1029_v28 = vmul.f32 0.35355338, %v1024_v27 }
 0x469   :  { %v11192_v29 = vpop.f32.mrf.mxu1 }
 0x46a   :  { %v1033_v30 = vsel %vm297_vm2, %v1029_v28, -inf }
 0x46b   :  { %1034 = vmax.xlane.f32.xlu1 %v1033_v30 }
 0x4f0   :  { %v1032_v31 = vpop.xlane.xlu0 %1031 }
 0x4f1   :  { %v1036_v32 = vsub.f32 %v1028_v24, %v1032_v31 }
 0x4f3   :  { %v1038_v33 = vmul.f32 1.442695, %v1036_v32 }
 0x4f4   :  { %v1035_v34 = vpop.xlane.xlu1 %1034 }
 0x4f5   :  { %11828 = vpow2.f32 %v1038_v33  ;;  %v1037_v35 = vsub.f32 %v1029_v28, %v1035_v34 }
 0x4f7   :  { %v1040_v36 = vmul.f32 1.442695, %v1037_v35 }
 0x4f9   :  { %11830 = vpow2.f32 %v1040_v36 }
 0x502   :  { %v11829_v37 = vpop.eup %11828 }
 0x503   :  { %v1042_v38 = vsel %vm297_vm2, %v11829_v37, 0.0 }
 0x504   :  { %1043 = vadd.xlane.f32.xlu0 %v1042_v38 }
 0x506   :  { %v11831_v39 = vpop.eup %11830 }
 0x507   :  { %v1045_v40 = vsel %vm297_vm2, %v11831_v39, 0.0 }
 0x508   :  { %1046 = vadd.xlane.f32.xlu1 %v1045_v40 }
 0x58d   :  { %v1044_v47 = vpop.xlane.xlu0 %1043 }
 0x58e   :  { %11832 = vrcp.f32 %v1044_v47 }
 0x591   :  { %v1047_v48 = vpop.xlane.xlu1 %1046 }
 0x592   :  { %11834 = vrcp.f32 %v1047_v48 }
 0x59b   :  { %v11833_v49 = vpop.eup %11832 }
 0x59c   :  { %v1050_v50 = vmul.f32 %v11833_v49, %v11829_v37 }
 0x59e   :  { %11196 = vmatmul.mubr.msk.f32.vlgmr.msra.gmra.mxu0 %vm297_vm2, %v1050_v50 }
 0x59f   :  { %v11835_v51 = vpop.eup %11834  ;;  %11204 = vmatpush3.msra.mxu0 %v9672_v54  ;;  %v9713_v54 = vld [vmem:[%s13969_s2 + $0x90] sm:$0xff] }
 0x5a0   :  { %v1051_v52 = vmul.f32 %v11835_v51, %v11831_v39  ;;  %11213 = vmatprep.subr.mxu0 %v9680_v57 }
 0x5a2   :  { %11201 = vmatmul.mubr.msk.f32.vlgmr.msra.gmra.mxu1 %vm297_vm2, %v1051_v52  ;;  %v9707_v52 = vld [vmem:[%s13972_s3 + $0x10] sm:$0xff] }
 0x5a3   :  { %11210 = vmatprep.mubr.msk.f32.mxu1 %vm297_vm2, %v12072_v4  ;;  %11209 = vmatpush3.msra.mxu1 %v620_v46 }
 0x5a4   :  { %11224 = vmatprep.subr.mxu1 %v9688_v53 }
 0x5a6   :  { %11211 = vmatmul.mubr.msk.f32.vlgmr.msra.gmra.mxu1 %vm297_vm2, %v12070_v2 }
 0x5a7   :  { %11225 = vmatpush3.msra.mxu1 %v9688_v53  ;;  %11232 = vmatprep.mubr.msk.f32.mxu1 %vm45_vm0, %v11974_v12  ;;  %v9721_v53 = vld [vmem:[%s13969_s2 + $0x130] sm:$0xff] }
 0x5a8   :  { %11226 = vmatprep.subr.mxu1 %v9687_v55 }
 0x5a9   :  { %11227 = vmatpush3.msra.mxu1 %v9687_v55  ;;  %v9712_v55 = vld [vmem:[%s13969_s2 + $0x88] sm:$0xff] }
 0x5aa   :  { %11228 = vmatprep.subr.mxu1 %v9686_v56 }
 0x5ab   :  { %11229 = vmatpush3.msra.mxu1 %v9686_v56  ;;  %v9711_v56 = vld [vmem:[%s13969_s2 + $0x80] sm:$0xff] }
 0x5ac   :  { %11230 = vmatprep.subr.mxu1 %v9685_v58 }
 0x5ad   :  { %11231 = vmatpush3.msra.mxu1 %v9685_v58 }
 0x5ae   :  { %11233 = vmatmul.mubr.msk.f32.vlgmr.msra.gmra.mxu1 %vm45_vm0, %v11976_v13  ;;  %11246 = vmatprep.subr.mxu1 %v11900_v14 }
 0x5af   :  { %11248 = vmatprep.mubr.msk.f32.mxu1 %vm11901_vm1, %v11900_v14 }
 0x65e   :  { %v1121_v59 = vpop.f32.mrf.mxu0 }
 0x65f   :  { %11205 = vmatprep.mubr.msk.f32.mxu0 %vm297_vm2, %v1121_v59 }
 0x660   :  { %v11197_v60 = vpop.f32.mrf.mxu0 }
 0x662   :  { %v1194_v61 = vpop.f32.mrf.mxu1 }
 0x663   :  { %11206 = vmatmul.mubr.msk.f32.vlgmr.msra.gmra.mxu0 %vm297_vm2, %v1194_v61  ;;  %v9720_v61 = vld [vmem:[%s13969_s2 + $0x128] sm:$0xff] }
 0x664   :  { %11214 = vmatpush3.msra.mxu0 %v9680_v57  ;;  %v11202_v63 = vpop.f32.mrf.mxu1  ;;  %11221 = vmatprep.mubr.msk.f32.mxu0 %vm45_vm0, %v11974_v12  ;;  %v9710_v57 = vld [vmem:[%s13969_s2 + $0x78] sm:$0xff] }
 0x665   :  { %11215 = vmatprep.subr.mxu0 %v9679_v62  ;;  %v9719_v63 = vld [vmem:[%s13969_s2 + $0x120] sm:$0xff] }
 0x666   :  { %11216 = vmatpush3.msra.mxu0 %v9679_v62  ;;  %v12165_v2 = vpop.f32.mrf.mxu1 }
 0x667   :  { %11217 = vmatprep.subr.mxu0 %v9678_v0 }
 0x668   :  { %11218 = vmatpush3.msra.mxu0 %v9678_v0  ;;  %v12167_v3 = vpop.f32.mrf.mxu1  ;;  %v9718_v0 = vld [vmem:[%s13969_s2 + $0x118] sm:$0xff] }
 0x669   :  { %11219 = vmatprep.subr.mxu0 %v9677_v1 }
 0x66a   :  { %11220 = vmatpush3.msra.mxu0 %v9677_v1 }
 0x66b   :  { %11222 = vmatmul.mubr.msk.f32.vlgmr.msra.gmra.mxu0 %vm45_vm0, %v11976_v13  ;;  %11235 = vmatprep.subr.mxu0 %v9696_v19 }
 0x66c   :  { %11243 = vmatprep.mubr.msk.f32.mxu0 %vm45_vm0, %v11974_v12  ;;  %11236 = vmatpush3.msra.mxu0 %v9696_v19 }
 0x66d   :  { %11237 = vmatprep.subr.mxu0 %v9695_v20 }
 0x66e   :  { %v11234_v4 = vpop.f32.mrf.mxu1  ;;  %11238 = vmatpush3.msra.mxu0 %v9695_v20  ;;  %v9729_v20 = vld [vmem:[%s13969_s2 + $0x1d0] sm:$0xff] }
 0x66f   :  { %v1529_v6 = vadd.f32 %v11234_v4, %v9690_v5  ;;  %11239 = vmatprep.subr.mxu0 %v9694_v21 }
 0x670   :  { %v1523_v7 = vpop.f32.mrf.mxu1  ;;  %11240 = vmatpush3.msra.mxu0 %v9694_v21  ;;  %v9728_v21 = vld [vmem:[%s13969_s2 + $0x1c8] sm:$0xff] }
 0x671   :  { %v1524_v8 = vadd.f32 %v9690_v5, %v1523_v7  ;;  %11241 = vmatprep.subr.mxu0 %v9693_v22 }
 0x672   :  { %11242 = vmatpush3.msra.mxu0 %v9693_v22  ;;  %v9727_v22 = vld [vmem:[%s13969_s2 + $0x1c0] sm:$0xff] }
 0x673   :  { %11247 = vmatpush3.xpose.msk.msra.mxu1 %vm297_vm2, %v1524_v8  ;;  %11244 = vmatmul.mubr.msk.f32.vlgmr.msra.gmra.mxu0 %vm45_vm0, %v11976_v13 }
 0x674   :  { %11251 = vmatprep.subr.mxu1 %v11900_v14  ;;  %11256 = vmatprep.subr.mxu0 %v11900_v14 }
 0x675   :  { %11258 = vmatprep.mubr.msk.f32.mxu0 %vm11901_vm1, %v11900_v14 }
 0x723   :  { %v12174_v9 = vpop.f32.mrf.mxu0 }
 0x724   :  { %v1359_v1 = vadd.f32 %v12165_v2, %v12174_v9  ;;  %v9715_v2 = vld [vmem:[%s13969_s2 + $0x98] ss:$0 sm:$0xff] }
 0x725   :  { %v12176_v10 = vpop.f32.mrf.mxu0 }
 0x726   :  { %v1354_v5 = vadd.f32 %v12167_v3, %v12176_v10 }
 0x72b   :  { %v11223_v11 = vpop.f32.mrf.mxu0 }
 0x72c   :  { %v1444_v18 = vadd.f32 %v11223_v11, %v9682_v15 }
 0x72d   :  { %v1438_v16 = vpop.f32.mrf.mxu0 }
 0x72e   :  { %v1439_v17 = vadd.f32 %v9682_v15, %v1438_v16  ;;  %v9723_v16 = vld [vmem:[%s13969_s2 + $0x138] ss:$0 sm:$0xff] }
 0x730   :  { %11249 = vmatmul.mubr.msk.f32.vlgmr.msra.gmra.mxu1 %vm297_vm2, %v1439_v17 }
 0x731   :  { %11252 = vmatpush3.xpose.msk.msra.mxu1 %vm297_vm2, %v1529_v6  ;;  %11253 = vmatprep.mubr.msk.f32.mxu1 %vm11901_vm1, %v11900_v14 }
 0x732   :  { %11261 = vmatprep.subr.mxu1 %v11900_v14 }
 0x733   :  { %v11245_v41 = vpop.f32.mrf.mxu0 }
 0x734   :  { %11254 = vmatmul.mubr.msk.f32.vlgmr.msra.gmra.mxu1 %vm297_vm2, %v1444_v18  ;;  %v1614_v43 = vadd.f32 %v11245_v41, %v9698_v42 }
 0x735   :  { %11263 = vmatprep.mubr.msk.f32.mxu1 %vm11901_vm1, %v11900_v14  ;;  %v1608_v44 = vpop.f32.mrf.mxu0 }
 0x736   :  { %v1609_v45 = vadd.f32 %v9698_v42, %v1608_v44  ;;  %11262 = vmatpush3.msra.mxu1 %v1614_v43  ;;  %v9731_v43 = vld [vmem:[%s13969_s2 + $0x1d8] ss:$0 sm:$0xff] }
 0x737   :  { %11271 = vmatprep.subr.mxu1 %v9713_v54 }
 0x738   :  { %11257 = vmatpush3.msra.mxu0 %v1609_v45 }
 0x739   :  { %11266 = vmatprep.subr.mxu0 %v9707_v52 }
 0x7f0   :  { %v1689_v23 = vpop.f32.mrf.mxu1 }
 0x7f1   :  { %v1769_v24 = vmul.f32 0.35355338, %v1689_v23  ;;  %v9726_v23 = vld [vmem:[%s13969_s2 + $0x1b8] sm:$0xff] }
 0x7f2   :  { %v11250_v25 = vpop.f32.mrf.mxu1 }
 0x7f3   :  { %v1771_v26 = vsel %vm297_vm2, %v1769_v24, -inf }
 0x7f4   :  { %1772 = vmax.xlane.f32.xlu0 %v1771_v26  ;;  %v1765_v27 = vpop.f32.mrf.mxu1 }
 0x7f5   :  { %v1770_v28 = vmul.f32 0.35355338, %v1765_v27 }
 0x7f6   :  { %v11255_v29 = vpop.f32.mrf.mxu1 }
 0x7f7   :  { %v1774_v30 = vsel %vm297_vm2, %v1770_v28, -inf }
 0x7f8   :  { %1775 = vmax.xlane.f32.xlu1 %v1774_v30 }
 0x87d   :  { %v1773_v31 = vpop.xlane.xlu0 %1772 }
 0x87e   :  { %v1777_v32 = vsub.f32 %v1769_v24, %v1773_v31 }
 0x880   :  { %v1779_v33 = vmul.f32 1.442695, %v1777_v32 }
 0x881   :  { %v1776_v34 = vpop.xlane.xlu1 %1775 }
 0x882   :  { %11836 = vpow2.f32 %v1779_v33  ;;  %v1778_v35 = vsub.f32 %v1770_v28, %v1776_v34 }
 0x884   :  { %v1781_v36 = vmul.f32 1.442695, %v1778_v35 }
 0x886   :  { %11838 = vpow2.f32 %v1781_v36 }
 0x88f   :  { %v11837_v37 = vpop.eup %11836 }
 0x890   :  { %v1783_v38 = vsel %vm297_vm2, %v11837_v37, 0.0 }
 0x891   :  { %1784 = vadd.xlane.f32.xlu0 %v1783_v38 }
 0x893   :  { %v11839_v39 = vpop.eup %11838 }
 0x894   :  { %v1786_v40 = vsel %vm297_vm2, %v11839_v39, 0.0 }
 0x895   :  { %1787 = vadd.xlane.f32.xlu1 %v1786_v40 }
 0x91a   :  { %v1785_v46 = vpop.xlane.xlu0 %1784 }
 0x91b   :  { %11840 = vrcp.f32 %v1785_v46 }
 0x91e   :  { %v1788_v47 = vpop.xlane.xlu1 %1787 }
 0x91f   :  { %11842 = vrcp.f32 %v1788_v47 }
 0x928   :  { %v11841_v48 = vpop.eup %11840 }
 0x929   :  { %v1791_v49 = vmul.f32 %v11841_v48, %v11837_v37 }
 0x92b   :  { %11259 = vmatmul.mubr.msk.f32.vlgmr.msra.gmra.mxu0 %vm297_vm2, %v1791_v49 }
 0x92c   :  { %v11843_v50 = vpop.eup %11842  ;;  %11267 = vmatpush3.msra.mxu0 %v9707_v52 }
 0x92d   :  { %v1792_v51 = vmul.f32 %v11843_v50, %v11839_v39  ;;  %11282 = vmatprep.subr.mxu0 %v9721_v53 }
 0x92f   :  { %11264 = vmatmul.mubr.msk.f32.vlgmr.msra.gmra.mxu1 %vm297_vm2, %v1792_v51 }
 0x930   :  { %11279 = vmatprep.mubr.msk.f32.mxu1 %vm45_vm0, %v11974_v12  ;;  %11272 = vmatpush3.msra.mxu1 %v9713_v54 }
 0x931   :  { %11273 = vmatprep.subr.mxu1 %v9712_v55 }
 0x932   :  { %11274 = vmatpush3.msra.mxu1 %v9712_v55 }
 0x933   :  { %11275 = vmatprep.subr.mxu1 %v9711_v56 }
 0x934   :  { %11276 = vmatpush3.msra.mxu1 %v9711_v56 }
 0x935   :  { %11277 = vmatprep.subr.mxu1 %v9710_v57 }
 0x936   :  { %11278 = vmatpush3.msra.mxu1 %v9710_v57 }
 0x937   :  { %11280 = vmatmul.mubr.msk.f32.vlgmr.msra.gmra.mxu1 %vm45_vm0, %v11976_v13  ;;  %11293 = vmatprep.subr.mxu1 %v9729_v20 }
 0x938   :  { %11301 = vmatprep.mubr.msk.f32.mxu1 %vm45_vm0, %v11974_v12  ;;  %11294 = vmatpush3.msra.mxu1 %v9729_v20  ;;  %v2758_v20 = vld [vmem:[%s13973_s4 + $0xc8] sm:$0xff] }
 0x939   :  { %11295 = vmatprep.subr.mxu1 %v9728_v21 }
 0x93a   :  { %11296 = vmatpush3.msra.mxu1 %v9728_v21 }
 0x93b   :  { %11297 = vmatprep.subr.mxu1 %v9727_v22 }
 0x93c   :  { %11298 = vmatpush3.msra.mxu1 %v9727_v22 }
 0x93d   :  { %11299 = vmatprep.subr.mxu1 %v9726_v23 }
 0x93e   :  { %11300 = vmatpush3.msra.mxu1 %v9726_v23 }
 0x93f   :  { %11302 = vmatmul.mubr.msk.f32.vlgmr.msra.gmra.mxu1 %vm45_vm0, %v11976_v13  ;;  %11314 = vmatprep.subr.mxu1 %v11900_v14 }
 0x940   :  { %11316 = vmatprep.mubr.msk.f32.mxu1 %vm11901_vm1, %v11900_v14 }
 0x9eb   :  { %v1862_v58 = vpop.f32.mrf.mxu0 }
 0x9ec   :  { %11268 = vmatprep.mubr.msk.f32.mxu0 %vm297_vm2, %v1862_v58  ;;  %v9743_v58 = vld [vmem:[%s13971_s1 + $0x10] ss:$0 sm:$0xff] }
 0x9ed   :  { %v11260_v59 = vpop.f32.mrf.mxu0 }
 0x9ef   :  { %v1935_v60 = vpop.f32.mrf.mxu1 }
 0x9f0   :  { %11269 = vmatmul.mubr.msk.f32.vlgmr.msra.gmra.mxu0 %vm297_vm2, %v1935_v60 }
 0x9f1   :  { %11283 = vmatpush3.msra.mxu0 %v9721_v53  ;;  %v11265_v62 = vpop.f32.mrf.mxu1  ;;  %11290 = vmatprep.mubr.msk.f32.mxu0 %vm45_vm0, %v11974_v12  ;;  %v9740_v53 = vld [vmem:[%s13972_s3 + $0x18] sm:$0xff] }
 0x9f2   :  { %11284 = vmatprep.subr.mxu0 %v9720_v61 }
 0x9f3   :  { %11285 = vmatpush3.msra.mxu0 %v9720_v61 }
 0x9f4   :  { %11286 = vmatprep.subr.mxu0 %v9719_v63 }
 0x9f5   :  { %11287 = vmatpush3.msra.mxu0 %v9719_v63 }
 0x9f6   :  { %11288 = vmatprep.subr.mxu0 %v9718_v0 }
 0x9f7   :  { %11289 = vmatpush3.msra.mxu0 %v9718_v0  ;;  %v11281_v11 = vpop.f32.mrf.mxu1 }
 0x9f8   :  { %11291 = vmatmul.mubr.msk.f32.vlgmr.msra.gmra.mxu0 %vm45_vm0, %v11976_v13  ;;  %11304 = vmatprep.subr.mxu0 %v11900_v14  ;;  %v2106_v19 = vadd.f32 %v11281_v11, %v9715_v2 }
 0x9f9   :  { %11306 = vmatprep.mubr.msk.f32.mxu0 %vm11901_vm1, %v11900_v14  ;;  %v2100_v18 = vpop.f32.mrf.mxu1 }
 0x9fa   :  { %v2101_v3 = vadd.f32 %v9715_v2, %v2100_v18 }
 0x9ff   :  { %v11303_v42 = vpop.f32.mrf.mxu1 }
 0xa00   :  { %v2276_v44 = vadd.f32 %v11303_v42, %v9731_v43 }
 0xa01   :  { %v2270_v45 = vpop.f32.mrf.mxu1 }
 0xa02   :  { %v2271_v46 = vadd.f32 %v9731_v43, %v2270_v45 }
 0xa04   :  { %11315 = vmatpush3.msra.mxu1 %v2271_v46 }
 0xa05   :  { %11324 = vmatprep.subr.mxu1 %v9740_v53 }
 0xab0   :  { %v11270_v4 = vpop.f32.mrf.mxu0 }
 0xab1   :  { %v12261_v6 = vadd.f32 %v11270_v4, %v1359_v1 }
 0xab2   :  { %v2013_v7 = vpop.f32.mrf.mxu0 }
 0xab3   :  { %v12263_v8 = vadd.f32 %v2013_v7, %v1354_v5 }
 0xab8   :  { %v11292_v15 = vpop.f32.mrf.mxu0 }
 0xab9   :  { %v2191_v10 = vadd.f32 %v11292_v15, %v9723_v16 }
 0xaba   :  { %v2185_v17 = vpop.f32.mrf.mxu0 }
 0xabb   :  { %v2186_v9 = vadd.f32 %v9723_v16, %v2185_v17 }
 0xabd   :  { %11305 = vmatpush3.xpose.msk.msra.mxu0 %vm297_vm2, %v2186_v9 }
 0xabe   :  { %11309 = vmatprep.subr.mxu0 %v11900_v14 }
 0xac0   :  { %11307 = vmatmul.mubr.msk.f32.vlgmr.msra.gmra.mxu0 %vm297_vm2, %v2101_v3  ;;  %v2757_v3 = vld [vmem:[%s13973_s4 + $0xc0] sm:$0xff] }
 0xac1   :  { %11310 = vmatpush3.xpose.msk.msra.mxu0 %vm297_vm2, %v2191_v10  ;;  %11311 = vmatprep.mubr.msk.f32.mxu0 %vm11901_vm1, %v11900_v14  ;;  %v2750_v10 = vld [vmem:[%s13973_s4 + $0x88] sm:$0xff] }
 0xac2   :  { %11319 = vmatprep.subr.mxu0 %v11900_v14  ;;  %v9764_v22 = vcombine.low %v2750_v10, %v2758_v20  ;;  %v9765_v23 = vcombine.high %v2750_v10, %v2758_v20  ;;  %v2764_v10 = vld [vmem:[%s13973_s4 + $0xf8] sm:$0xff] }
 0xac4   :  { %11312 = vmatmul.mubr.msk.f32.vlgmr.msra.gmra.mxu0 %vm297_vm2, %v2106_v19 }
 0xac5   :  { %11321 = vmatprep.mubr.msk.f32.mxu0 %vm11901_vm1, %v11900_v14  ;;  %11320 = vmatpush3.msra.mxu0 %v2276_v44 }
 0xb80   :  { %v2351_v24 = vpop.f32.mrf.mxu0 }
 0xb81   :  { %v2431_v25 = vmul.f32 0.35355338, %v2351_v24  ;;  %v2733_v24 = vld [vmem:[%s13973_s4] sm:$0xff] }
 0xb82   :  { %v11308_v26 = vpop.f32.mrf.mxu0 }
 0xb83   :  { %v2433_v27 = vsel %vm297_vm2, %v2431_v25, -inf  ;;  %v2734_v26 = vld [vmem:[%s13973_s4 + $0x8] sm:$0xff] }
 0xb84   :  { %2434 = vmax.xlane.f32.xlu0 %v2433_v27  ;;  %v2427_v28 = vpop.f32.mrf.mxu0 }
 0xb85   :  { %v2432_v29 = vmul.f32 0.35355338, %v2427_v28  ;;  %v2742_v28 = vld [vmem:[%s13973_s4 + $0x48] sm:$0xff] }
 0xb86   :  { %v11313_v30 = vpop.f32.mrf.mxu0 }
 0xb87   :  { %v2436_v31 = vsel %vm297_vm2, %v2432_v29, -inf  ;;  %v9748_v30 = vcombine.low %v2734_v26, %v2742_v28 }
 0xb88   :  { %2437 = vmax.xlane.f32.xlu1 %v2436_v31  ;;  %v9749_v31 = vcombine.high %v2734_v26, %v2742_v28  ;;  %v2748_v26 = vld [vmem:[%s13973_s4 + $0x78] sm:$0xff] }
 0xc0d   :  { %v2435_v32 = vpop.xlane.xlu0 %2434 }
 0xc0e   :  { %v2439_v33 = vsub.f32 %v2431_v25, %v2435_v32  ;;  %v2741_v25 = vld [vmem:[%s13973_s4 + $0x40] sm:$0xff]  ;;  %v2751_v32 = vld [vmem:[%s13973_s4 + $0x90] sm:$0xff] }
 0xc0f   :  { %v9747_v27 = vcombine.high %v2733_v24, %v2741_v25 }
 0xc10   :  { %v2441_v34 = vmul.f32 1.442695, %v2439_v33  ;;  %v2759_v33 = vld [vmem:[%s13973_s4 + $0xd0] sm:$0xff] }
 0xc11   :  { %v2438_v35 = vpop.xlane.xlu1 %2437 }
 0xc12   :  { %11844 = vpow2.f32 %v2441_v34  ;;  %v2440_v36 = vsub.f32 %v2432_v29, %v2438_v35  ;;  %v9746_v29 = vcombine.low %v2733_v24, %v2741_v25  ;;  %v2752_v34 = vld [vmem:[%s13973_s4 + $0x98] sm:$0xff]  ;;  %v9767_v35 = vcombine.high %v2751_v32, %v2759_v33  ;;  %v2747_v24 = vld [vmem:[%s13973_s4 + $0x70] sm:$0xff] }
 0xc13   :  { %v2740_v25 = vld [vmem:[%s13973_s4 + $0x38] sm:$0xff] }
 0xc14   :  { %v2443_v37 = vmul.f32 1.442695, %v2440_v36  ;;  %v2760_v36 = vld [vmem:[%s13973_s4 + $0xd8] sm:$0xff] }
 0xc16   :  { %11846 = vpow2.f32 %v2443_v37  ;;  %v11902_v37 = vmov 0  }
 0xc1f   :  { %v11845_v38 = vpop.eup %11844 }
 0xc20   :  { %v2445_v39 = vsel %vm297_vm2, %v11845_v38, 0.0 }
 0xc21   :  { %2446 = vadd.xlane.f32.xlu0 %v2445_v39  ;;  %v9768_v39 = vcombine.low %v2752_v34, %v2760_v36 }
 0xc23   :  { %v11847_v40 = vpop.eup %11846 }
 0xc24   :  { %v2448_v41 = vsel %vm297_vm2, %v11847_v40, 0.0 }
 0xc25   :  { %2449 = vadd.xlane.f32.xlu1 %v2448_v41 }
 0xcaa   :  { %v2447_v47 = vpop.xlane.xlu0 %2446 }
 0xcab   :  { %11848 = vrcp.f32 %v2447_v47  ;;  %v9744_v47 = vld [vmem:[%s13971_s1 + $0x12] ss:$0 sm:$0xff] }
 0xcae   :  { %v2450_v48 = vpop.xlane.xlu1 %2449 }
 0xcaf   :  { %11850 = vrcp.f32 %v2450_v48 }
 0xcb8   :  { %v11849_v49 = vpop.eup %11848 }
 0xcb9   :  { %v2453_v50 = vmul.f32 %v11849_v49, %v11845_v38  ;;  %v9766_v38 = vcombine.low %v2751_v32, %v2759_v33  ;;  %v9761_v32 = vcombine.high %v2740_v25, %v2748_v26  ;;  %v11564_v33 = vld [vmem:[%s13974_s5 + $0x78] sm:$0xff]  }
 0xcbb   :  { %11317 = vmatmul.mubr.msk.f32.vlgmr.msra.gmra.mxu1 %vm297_vm2, %v2453_v50 }
 0xcbc   :  { %v11851_v51 = vpop.eup %11850  ;;  %11325 = vmatpush3.msra.mxu1 %v9740_v53 }
 0xcbd   :  { %v2454_v52 = vmul.f32 %v11851_v51, %v11847_v40  ;;  %3072 = vmatprep.subr.bf16.mxu1 %v9765_v23  ;;  %v9769_v40 = vcombine.high %v2752_v34, %v2760_v36  ;;  %v9745_v51 = vld [vmem:[%s13971_s1 + $0x13] ss:$0 sm:$0xff]  ;;  %v11565_v34 = vld [vmem:[%s13974_s5 + $0xf8] sm:$0xff]   ;;  %v9760_v36 = vcombine.low %v2740_v25, %v2748_v26  ;;  %v12574_v26 = vld [vmem:[%s13973_s4 + $0x110] sm:$0x11] }
 0xcbe   :  { %v2739_v23 = vld [vmem:[%s13973_s4 + $0x30] sm:$0xff] }
 0xcbf   :  { %11322 = vmatmul.mubr.msk.f32.vlgmr.msra.gmra.mxu0 %vm297_vm2, %v2454_v52 }
 0xcc0   :  { %3049 = vmatprep.mubr.bf16.mxu0 %v11902_v37 }
 0xd7b   :  { %v2524_v54 = vpop.f32.mrf.mxu1 }
 0xd7c   :  { %11326 = vmatprep.mubr.msk.f32.mxu1 %vm297_vm2, %v2524_v54  ;;  %v2735_v54 = vld [vmem:[%s13973_s4 + $0x10] sm:$0xff] }
 0xd7d   :  { %v11318_v55 = vpop.f32.mrf.mxu1 }
 0xd7e   :  { %v2743_v55 = vld [vmem:[%s13973_s4 + $0x50] sm:$0xff] }
 0xd7f   :  { %v2597_v56 = vpop.f32.mrf.mxu0 }
 0xd80   :  { %11327 = vmatmul.mubr.msk.f32.vlgmr.msra.gmra.mxu1 %vm297_vm2, %v2597_v56  ;;  %v2736_v56 = vld [vmem:[%s13973_s4 + $0x18] sm:$0xff] }
 0xd81   :  { %v11323_v57 = vpop.f32.mrf.mxu0  ;;  %3073 = vmatpush1.bf16.msra.mxu1 %v9764_v22  ;;  %3092 = vmatprep.mubr.bf16.mxu1 %v11902_v37 }
 0xd82   :  { %3074 = vmatprep.subr.bf16.mxu1 %v9749_v31  ;;  %v2744_v57 = vld [vmem:[%s13973_s4 + $0x58] sm:$0xff]  ;;  %v9759_v31 = vcombine.high %v2739_v23, %v2747_v24 }
 0xd85   :  { %3075 = vmatpush1.bf16.msra.mxu1 %v9748_v30 }
 0xd86   :  { %3158 = vmatprep.subr.bf16.mxu1 %v9769_v40  ;;  %v11568_v40 = vld [vmem:[%s13974_s5 + $0x70] sm:$0xff]  }
 0xe40   :  { %v11328_v59 = vpop.f32.mrf.mxu1 }
 0xe41   :  { %v2685_v60 = vadd.f32 %v11328_v59, %v12261_v6 }
 0xe42   :  { %v2675_v61 = vpop.f32.mrf.mxu1 }
 0xe43   :  { %v2691_v62 = vadd.f32 %v9743_v58, %v2685_v60  ;;  %v2684_v63 = vadd.f32 %v2675_v61, %v12263_v8  ;;  %v2753_v61 = vld [vmem:[%s13973_s4 + $0xa0] sm:$0xff] }
 0xe45   :  { %v2690_v0 = vadd.f32 %v9743_v58, %v2684_v63  ;;  %v2693_v1 = vadd.f32 %v2691_v62, %v11976_v13  ;;  %v2761_v62 = vld [vmem:[%s13973_s4 + $0xe0] sm:$0xff]  ;;  %v2754_v63 = vld [vmem:[%s13973_s4 + $0xa8] sm:$0xff] }
 0xe47   :  { %v2697_v4 = vsel %vm45_vm0, %v2693_v1, 0.0  ;;  %v2692_v5 = vadd.f32 %v2690_v0, %v11974_v12  ;;  %v2749_v12 = vld [vmem:[%s13973_s4 + $0x80] sm:$0xff]  ;;  %v2762_v0 = vld [vmem:[%s13973_s4 + $0xe8] sm:$0xff] }
 0xe48   :  { %2698 = vadd.xlane.f32.xlu1 %v2697_v4  ;;  %v9763_v19 = vcombine.high %v2749_v12, %v2757_v3  ;;  %v9762_v21 = vcombine.low %v2749_v12, %v2757_v3  ;;  %v9751_v4 = vcombine.high %v2735_v54, %v2743_v55  ;;  %v2763_v12 = vld [vmem:[%s13973_s4 + $0xf0] sm:$0xff]  ;;  %v2756_v3 = vld [vmem:[%s13973_s4 + $0xb8] sm:$0xff] }
 0xe49   :  { %v2694_v7 = vsel %vm45_vm0, %v2692_v5, 0.0  ;;  %v9777_v28 = vcombine.high %v2756_v3, %v2764_v10  ;;  %v9776_v30 = vcombine.low %v2756_v3, %v2764_v10 }
 0xe4a   :  { %2695 = vadd.xlane.f32.xlu0 %v2694_v7  ;;  %3029 = vmatprep.subr.bf16.mxu0 %v9763_v19  ;;  %v9750_v7 = vcombine.low %v2735_v54, %v2743_v55  ;;  %v11582_v54 = vld [vmem:[%s13974_s5 + $0x18] sm:$0xff]  }
 0xe4b   :  { %3030 = vmatpush1.bf16.msra.mxu0 %v9762_v21  ;;  %v11583_v55 = vld [vmem:[%s13974_s5 + $0x98] sm:$0xff]  }
 0xe4c   :  { %3031 = vmatprep.subr.bf16.mxu0 %v9747_v27 }
 0xe4f   :  { %3032 = vmatpush1.bf16.msra.mxu0 %v9746_v29 }
 0xe50   :  { %3115 = vmatprep.subr.bf16.mxu0 %v9767_v35  ;;  %v9758_v35 = vcombine.low %v2739_v23, %v2747_v24 }
 0xed1   :  { %v2699_v11 = vpop.xlane.xlu1 %2698 }
 0xed2   :  { %v2702_v15 = vmul.f32 0.03125, %v2699_v11  ;;  %v9752_v11 = vcombine.low %v2736_v56, %v2744_v57 }
 0xed3   :  { %v2696_v16 = vpop.xlane.xlu0 %2695 }
 0xed4   :  { %v2704_v17 = vsub.f32 %v2693_v1, %v2702_v15  ;;  %v2701_v6 = vmul.f32 0.03125, %v2696_v16  ;;  %v2737_v15 = vld [vmem:[%s13973_s4 + $0x20] sm:$0xff] }
 0xed5   :  { %v2745_v16 = vld [vmem:[%s13973_s4 + $0x60] sm:$0xff] }
 0xed6   :  { %v2703_v2 = vsub.f32 %v2692_v5, %v2701_v6  ;;  %v2706_v9 = vmul.f32 %v2704_v17, %v2704_v17  ;;  %v9753_v5 = vcombine.high %v2736_v56, %v2744_v57  ;;  %v2746_v6 = vld [vmem:[%s13973_s4 + $0x68] sm:$0xff]  ;;  %v9755_v19 = vcombine.high %v2737_v15, %v2745_v16  ;;  %v11584_v56 = vld [vmem:[%s13974_s5 + $0x50] sm:$0xff]  }
 0xed7   :  { %v9754_v21 = vcombine.low %v2737_v15, %v2745_v16  ;;  %v11585_v57 = vld [vmem:[%s13974_s5 + $0xd0] sm:$0xff]   ;;  %v11596_v15 = vld [vmem:[%s13974_s5 + $0x178] sm:$0xff]  }
 0xed8   :  { %v2710_v8 = vsel %vm45_vm0, %v2706_v9, 0.0  ;;  %v2705_v18 = vmul.f32 %v2703_v2, %v2703_v2  ;;  %v9773_v9 = vcombine.high %v2754_v63, %v2762_v0  ;;  %v11597_v16 = vld [vmem:[%s13974_s5 + $0x1f8] sm:$0xff]  }
 0xed9   :  { %2711 = vadd.xlane.f32.xlu1 %v2710_v8  ;;  %v9770_v8 = vcombine.low %v2753_v61, %v2761_v62 }
 0xeda   :  { %v2707_v13 = vsel %vm45_vm0, %v2705_v18, 0.0  ;;  %v9772_v18 = vcombine.low %v2754_v63, %v2762_v0  ;;  %v11589_v63 = vld [vmem:[%s13974_s5 + $0xc8] sm:$0xff]  }
 0xedb   :  { %2708 = vadd.xlane.f32.xlu0 %v2707_v13  ;;  %v2755_v13 = vld [vmem:[%s13973_s4 + $0xb0] sm:$0xff]  ;;  %v11590_v0 = vld [vmem:[%s13974_s5 + $0x8] sm:$0xff]  }
 0xedc   :  { %v9775_v27 = vcombine.high %v2755_v13, %v2763_v12  ;;  %v9774_v29 = vcombine.low %v2755_v13, %v2763_v12 }
 0xf62   :  { %v2712_v41 = vpop.xlane.xlu1 %2711 }
 0xf63   :  { %v2714_v42 = vmul.f32 0.03125, %v2712_v41  ;;  %v11569_v41 = vld [vmem:[%s13974_s5 + $0xf0] sm:$0xff]  }
 0xf64   :  { %v2709_v43 = vpop.xlane.xlu0 %2708 }
 0xf65   :  { %v2716_v44 = vadd.f32 1e-05, %v2714_v42  ;;  %v2713_v45 = vmul.f32 0.03125, %v2709_v43  ;;  %v11570_v42 = vld [vmem:[%s13974_s5 + $0x30] sm:$0xff]  }
 0xf66   :  { %v11571_v43 = vld [vmem:[%s13974_s5 + $0xb0] sm:$0xff]  }
 0xf67   :  { %11852 = vrsqrt.f32 %v2716_v44  ;;  %v2715_v46 = vadd.f32 1e-05, %v2713_v45  ;;  %v11572_v44 = vld [vmem:[%s13974_s5 + $0x68] sm:$0xff]  }
 0xf68   :  { %v11573_v45 = vld [vmem:[%s13974_s5 + $0xe8] sm:$0xff]  }
 0xf69   :  { %11854 = vrsqrt.f32 %v2715_v46  ;;  %v11574_v46 = vld [vmem:[%s13974_s5 + $0x28] sm:$0xff]  }
 0xf74   :  { %v11853_v48 = vpop.eup %11852 }
 0xf75   :  { %v2720_v49 = vmul.f32 %v11853_v48, %v2704_v17  ;;  %v2738_v17 = vld [vmem:[%s13973_s4 + $0x28] sm:$0xff]  ;;  %v11576_v48 = vld [vmem:[%s13974_s5 + $0x60] sm:$0xff]  }
 0xf76   :  { %v11855_v50 = vpop.eup %11854  ;;  %v9757_v20 = vcombine.high %v2738_v17, %v2746_v6  ;;  %v9756_v22 = vcombine.low %v2738_v17, %v2746_v6  ;;  %v2790_v17 = vlaneseq }
 0xf77   :  { %v2726_v52 = vmul.f32 %v9744_v47, %v2720_v49  ;;  %v2719_v53 = vmul.f32 %v11855_v50, %v2703_v2  ;;  %v9771_v2 = vcombine.high %v2753_v61, %v2761_v62  ;;  %v11577_v49 = vld [vmem:[%s13974_s5 + $0xe0] sm:$0xff]   ;;  %v11587_v61 = vld [vmem:[%s13974_s5 + $0x90] sm:$0xff]   ;;  %v11588_v62 = vld [vmem:[%s13974_s5 + $0x48] sm:$0xff]  }
 0xf78   :  { %v11578_v50 = vld [vmem:[%s13974_s5 + $0x20] sm:$0xff]   ;;  %v2791_v6 = vshrl.u32 %v2790_v17, 7 }
 0xf79   :  { %v2725_v58 = vmul.f32 %v9744_v47, %v2719_v53  ;;  %v12379_v59 = vadd.f32 %v9745_v51, %v2726_v52  ;;  %v11575_v47 = vld [vmem:[%s13974_s5 + $0xa8] sm:$0xff]   ;;  %v11580_v52 = vld [vmem:[%s13974_s5 + $0x58] sm:$0xff]  }
 0xf7a   :  { %v11581_v53 = vld [vmem:[%s13974_s5 + $0xd8] sm:$0xff]   ;;  %v12565_v12 = vsub.s32 0, %v2791_v6 }
 0xf7b   :  { %v12381_v60 = vadd.f32 %v9745_v51, %v2725_v58  ;;  %v11579_v51 = vld [vmem:[%s13974_s5 + $0xa0] sm:$0xff]   ;;  %v11586_v58 = vld [vmem:[%s13974_s5 + $0x10] sm:$0xff]  }
 0xf7d   :  { %v12397_v1 = vpack.c.bf16 %v12379_v59, %v12381_v60 }
 0xf7f   :  { %9778 = vmatmul.mubr.msk.bf16.vlgmr.msra.gmra.mxu0 %vm45_vm0, %v12397_v1  ;;  %9779 = vmatmul.mubr.msk.bf16.vlgmr.msra.gmra.mxu1 %vm45_vm0, %v12397_v1 }
 0xf80   :  { %3116 = vmatpush1.bf16.msra.mxu0 %v9766_v38  ;;  %3159 = vmatpush1.bf16.msra.mxu1 %v9768_v39  ;;  %v11566_v38 = vld [vmem:[%s13974_s5 + $0x38] sm:$0xff]  }
 0xf81   :  { %3117 = vmatprep.subr.bf16.mxu0 %v9751_v4  ;;  %3160 = vmatprep.subr.bf16.mxu1 %v9753_v5  ;;  %v11567_v39 = vld [vmem:[%s13974_s5 + $0xb8] sm:$0xff]   ;;  %v11592_v4 = vld [vmem:[%s13974_s5 + $0x40] sm:$0xff]  }
 0xf82   :  { %3135 = vmatprep.mubr.bf16.mxu0 %v11902_v37  ;;  %3178 = vmatprep.mubr.bf16.mxu1 %v11902_v37  ;;  %v11593_v5 = vld [vmem:[%s13974_s5 + $0xc0] sm:$0xff]  }
 0xf84   :  { %3118 = vmatpush1.bf16.msra.mxu0 %v9750_v7  ;;  %3161 = vmatpush1.bf16.msra.mxu1 %v9752_v11  ;;  %v11594_v7 = vld [vmem:[%s13974_s5] sm:$0xff]  }
 0xf85   :  { %3201 = vmatprep.subr.bf16.mxu0 %v9771_v2  ;;  %3244 = vmatprep.subr.bf16.mxu1 %v9773_v9  ;;  %v11595_v11 = vld [vmem:[%s13974_s5 + $0x80] sm:$0xff]   ;;  %v2766_v9 = vld [vmem:[%s13973_s4 + $0x108] sm:$0x11] }
 0xf86   :  { %v2765_v2 = vld [vmem:[%s13973_s4 + $0x100] sm:$0x11]  ;;  %v2775_v3 = vunpack.c.l.bf16 %v2766_v9 }
 0xf87   :  { %9780 = vmatmul.mubr.msk.bf16.vlgmr.msra.gmra.mxu0 %vm45_vm0, %v12397_v1  ;;  %9781 = vmatmul.mubr.msk.bf16.vlgmr.msra.gmra.mxu1 %vm45_vm0, %v12397_v1  ;;  %v2773_v13 = vunpack.c.l.bf16 %v2765_v2 }
 0xf88   :  { %3202 = vmatpush1.bf16.msra.mxu0 %v9770_v8  ;;  %3245 = vmatpush1.bf16.msra.mxu1 %v9772_v18  ;;  %v2774_v8 = vunpack.c.h.bf16 %v2765_v2  ;;  %v2776_v18 = vunpack.c.h.bf16 %v2766_v9  ;;  %v2801_v23 = vrot.slane %v2775_v3, %v12565_v12  ;;  %v11602_v9 = vld [vmem:[%s13974_s5 + $0x130] sm:$0xff]  }
 0xf89   :  { %3203 = vmatprep.subr.bf16.mxu0 %v9755_v19  ;;  %3246 = vmatprep.subr.bf16.mxu1 %v9757_v20 }
 0xf8a   :  { %3221 = vmatprep.mubr.bf16.mxu0 %v11902_v37  ;;  %3264 = vmatprep.mubr.bf16.mxu1 %v11902_v37  ;;  %v2797_v20 = vrot.slane %v2774_v8, %v12565_v12  ;;  %v11603_v8 = vld [vmem:[%s13974_s5 + $0x1b0] sm:$0xff]  }
 0xf8c   :  { %3204 = vmatpush1.bf16.msra.mxu0 %v9754_v21  ;;  %3247 = vmatpush1.bf16.msra.mxu1 %v9756_v22  ;;  %v2805_v21 = vrot.slane %v2776_v18, %v12565_v12  ;;  %v2793_v22 = vrot.slane %v2773_v13, %v12565_v12  ;;  %v11604_v18 = vld [vmem:[%s13974_s5 + $0x168] sm:$0xff]  }
 0xf8d   :  { %3287 = vmatprep.subr.bf16.mxu0 %v9775_v27  ;;  %3330 = vmatprep.subr.bf16.mxu1 %v9777_v28  ;;  %v12579_v27 = vld [vmem:[%s13973_s4 + $0x118] sm:$0x11] }
 0xf8f   :  { %9782 = vmatmul.mubr.msk.bf16.vlgmr.msra.gmra.mxu0 %vm45_vm0, %v12397_v1  ;;  %9783 = vmatmul.mubr.msk.bf16.vlgmr.msra.gmra.mxu1 %vm45_vm0, %v12397_v1 }
 0xf90   :  { %3288 = vmatpush1.bf16.msra.mxu0 %v9774_v29  ;;  %3331 = vmatpush1.bf16.msra.mxu1 %v9776_v30  ;;  %v2778_v30 = vunpack.c.h.bf16 %v12574_v26 }
 0xf91   :  { %3289 = vmatprep.subr.bf16.mxu0 %v9759_v31  ;;  %3332 = vmatprep.subr.bf16.mxu1 %v9761_v32  ;;  %v2780_v31 = vunpack.c.h.bf16 %v12579_v27 }
 0xf92   :  { %3307 = vmatprep.mubr.bf16.mxu0 %v11902_v37  ;;  %3350 = vmatprep.mubr.bf16.mxu1 %v11902_v37 }
 0xf94   :  { %3290 = vmatpush1.bf16.msra.mxu0 %v9758_v35  ;;  %3333 = vmatpush1.bf16.msra.mxu1 %v9760_v36 }
 0xf95   :  { %10633 = vmatprep.subr.bf16.mxu0 %v11564_v33  ;;  %10655 = vmatprep.subr.bf16.mxu1 %v11565_v34 }
 0xf97   :  { %9784 = vmatmul.mubr.msk.bf16.vlgmr.msra.gmra.mxu0 %vm45_vm0, %v12397_v1  ;;  %9785 = vmatmul.mubr.msk.bf16.vlgmr.msra.gmra.mxu1 %vm45_vm0, %v12397_v1  ;;  %v11591_v1 = vld [vmem:[%s13974_s5 + $0x88] sm:$0xff]  }
 0xf98   :  { %10634 = vmatpush3.bf16.msra.mxu0 %v11566_v38  ;;  %10656 = vmatpush3.bf16.msra.mxu1 %v11567_v39 }
 0xf99   :  { %10635 = vmatprep.subr.bf16.mxu0 %v11568_v40  ;;  %10657 = vmatprep.subr.bf16.mxu1 %v11569_v41 }
 0xf9c   :  { %10636 = vmatpush3.bf16.msra.mxu0 %v11570_v42  ;;  %10658 = vmatpush3.bf16.msra.mxu1 %v11571_v43 }
 0xf9d   :  { %10637 = vmatprep.subr.bf16.mxu0 %v11572_v44  ;;  %10659 = vmatprep.subr.bf16.mxu1 %v11573_v45 }
 0xfa0   :  { %10638 = vmatpush3.bf16.msra.mxu0 %v11574_v46  ;;  %10660 = vmatpush3.bf16.msra.mxu1 %v11575_v47  ;;  %v2813_v47 = vrot.slane %v2778_v30, %v12565_v12  ;;  %v11610_v30 = vld [vmem:[%s13974_s5 + $0x120] sm:$0xff]  }
 0xfa1   :  { %10639 = vmatprep.subr.bf16.mxu0 %v11576_v48  ;;  %10661 = vmatprep.subr.bf16.mxu1 %v11577_v49  ;;  %v2821_v48 = vrot.slane %v2780_v31, %v12565_v12 }
 0xfa4   :  { %10640 = vmatpush3.bf16.msra.mxu0 %v11578_v50  ;;  %10662 = vmatpush3.bf16.msra.mxu1 %v11579_v51 }
 0xfa5   :  { %10641 = vmatprep.subr.bf16.mxu0 %v11580_v52  ;;  %10663 = vmatprep.subr.bf16.mxu1 %v11581_v53 }
 0xfa8   :  { %10642 = vmatpush3.bf16.msra.mxu0 %v11582_v54  ;;  %10664 = vmatpush3.bf16.msra.mxu1 %v11583_v55 }
 0xfa9   :  { %10643 = vmatprep.subr.bf16.mxu0 %v11584_v56  ;;  %10665 = vmatprep.subr.bf16.mxu1 %v11585_v57 }
 0xfac   :  { %10644 = vmatpush3.bf16.msra.mxu0 %v11586_v58  ;;  %10666 = vmatpush3.bf16.msra.mxu1 %v11587_v61  ;;  %v11598_v61 = vld [vmem:[%s13974_s5 + $0x138] sm:$0xff]  }
 0xfad   :  { %10645 = vmatprep.subr.bf16.mxu0 %v11588_v62  ;;  %10667 = vmatprep.subr.bf16.mxu1 %v11589_v63  ;;  %v11599_v62 = vld [vmem:[%s13974_s5 + $0x1b8] sm:$0xff]  }
 0xfb0   :  { %10646 = vmatpush3.bf16.msra.mxu0 %v11590_v0  ;;  %10668 = vmatpush3.bf16.msra.mxu1 %v11591_v1 }
 0xfb1   :  { %10647 = vmatprep.subr.bf16.mxu0 %v11592_v4  ;;  %10669 = vmatprep.subr.bf16.mxu1 %v11593_v5  ;;  %v11600_v5 = vld [vmem:[%s13974_s5 + $0x170] sm:$0xff]  }
 0xfb4   :  { %10648 = vmatpush3.bf16.msra.mxu0 %v11594_v7  ;;  %10670 = vmatpush3.bf16.msra.mxu1 %v11595_v11  ;;  %v11601_v7 = vld [vmem:[%s13974_s5 + $0x1f0] sm:$0xff]  }
 0xfb5   :  { %10677 = vmatprep.subr.bf16.mxu0 %v11596_v15  ;;  %10699 = vmatprep.subr.bf16.mxu1 %v11597_v16 }
0x103f   :  { %v3051_v10 = vpop.f32.mrf.mxu0  ;;  %v3094_v19 = vpop.f32.mrf.mxu1 }
0x1040   :  { %v3052_v36 = vadd.f32 %v3051_v10, %v2793_v22  ;;  %v3095_v38 = vadd.f32 %v3094_v19, %v2801_v23 }
0x1041   :  { %v3053_v24 = vpop.f32.mrf.mxu0  ;;  %v3096_v25 = vpop.f32.mrf.mxu1 }
0x1042   :  { %v3054_v32 = vadd.f32 %v3053_v24, %v2797_v20  ;;  %v3097_v33 = vadd.f32 %v3096_v25, %v2805_v21  ;;  %v3361_v53 = vmax.f32 %v3052_v36, 0.0  ;;  %v3363_v54 = vmax.f32 %v3095_v38, 0.0  ;;  %v11607_v24 = vld [vmem:[%s13974_s5 + $0x1a8] sm:$0xff]   ;;  %v11608_v25 = vld [vmem:[%s13974_s5 + $0x160] sm:$0xff]   ;;  %v11614_v36 = vld [vmem:[%s13974_s5 + $0x118] sm:$0xff]  }
0x1043   :  { %v3055_v28 = vpop.f32.mrf.mxu0  ;;  %v3098_v29 = vpop.f32.mrf.mxu1 }
0x1044   :  { %v3056_v34 = vadd.f32 %v3055_v28, %v2793_v22  ;;  %v3099_v35 = vadd.f32 %v3098_v29, %v2801_v23  ;;  %v3362_v49 = vmax.f32 %v3054_v32, 0.0  ;;  %v3364_v50 = vmax.f32 %v3097_v33, 0.0  ;;  %v11606_v23 = vld [vmem:[%s13974_s5 + $0x128] sm:$0xff]   ;;  %v11609_v28 = vld [vmem:[%s13974_s5 + $0x1e0] sm:$0xff]   ;;  %v11612_v33 = vld [vmem:[%s13974_s5 + $0x158] sm:$0xff]  }
0x1045   :  { %v3057_v39 = vpop.f32.mrf.mxu0  ;;  %v3100_v40 = vpop.f32.mrf.mxu1  ;;  %v11611_v32 = vld [vmem:[%s13974_s5 + $0x1a0] sm:$0xff]  }
0x1046   :  { %v3058_v41 = vadd.f32 %v3057_v39, %v2797_v20  ;;  %v3101_v42 = vadd.f32 %v3100_v40, %v2805_v21  ;;  %v3377_v43 = vmax.f32 %v3056_v34, 0.0  ;;  %v3379_v44 = vmax.f32 %v3099_v35, 0.0  ;;  %v11605_v20 = vld [vmem:[%s13974_s5 + $0x1e8] sm:$0xff]   ;;  %v11613_v34 = vld [vmem:[%s13974_s5 + $0x1d8] sm:$0xff]   ;;  %v11616_v40 = vld [vmem:[%s13974_s5 + $0x150] sm:$0xff]  }
0x1047   :  { %v12583_v45 = vpop.f32.mrf.mxu0  ;;  %v12585_v46 = vpop.f32.mrf.mxu1  ;;  %v11615_v39 = vld [vmem:[%s13974_s5 + $0x198] sm:$0xff]  }
0x1048   :  { %v3378_v51 = vmax.f32 %v3058_v41, 0.0  ;;  %v3380_v52 = vmax.f32 %v3101_v42, 0.0  ;;  %v3393_v63 = vpack.c.bf16 %v3377_v43, %v3361_v53  ;;  %v3395_v0 = vpack.c.bf16 %v3379_v44, %v3363_v54  ;;  %v11617_v41 = vld [vmem:[%s13974_s5 + $0x1d0] sm:$0xff]   ;;  %v12662_v44 = vld [vmem:[%s13973_s4 + $0x120] sm:$0x11]  ;;  %v11621_v53 = vld [vmem:[%s13974_s5 + $0x1c8] sm:$0xff]  }
0x1049   :  { %v3139_v55 = vpop.f32.mrf.mxu0  ;;  %v3182_v56 = vpop.f32.mrf.mxu1  ;;  %v2777_v42 = vunpack.c.l.bf16 %v12574_v26  ;;  %v2779_v43 = vunpack.c.l.bf16 %v12579_v27  ;;  %v2782_v26 = vunpack.c.h.bf16 %v12662_v44 }
0x104a   :  { %v3394_v57 = vpack.c.bf16 %v3378_v51, %v3362_v49  ;;  %v3396_v58 = vpack.c.bf16 %v3380_v52, %v3364_v50  ;;  %v3140_v11 = vadd.f32 %v3139_v55, %v2813_v47  ;;  %v3183_v15 = vadd.f32 %v3182_v56, %v2821_v48  ;;  %v12672_v49 = vld [vmem:[%s13973_s4 + $0x128] sm:$0x11]  ;;  %v11619_v50 = vld [vmem:[%s13974_s5 + $0x190] sm:$0xff]  }
0x104b   :  { %v12595_v1 = vpop.f32.mrf.mxu0  ;;  %v12597_v4 = vpop.f32.mrf.mxu1  ;;  %v11620_v51 = vld [vmem:[%s13974_s5 + $0x148] sm:$0xff]   ;;  %v2784_v52 = vunpack.c.h.bf16 %v12672_v49  ;;  %v2809_v54 = vrot.slane %v2777_v42, %v12565_v12  ;;  %v2817_v55 = vrot.slane %v2779_v43, %v12565_v12  ;;  %v11641_v42 = vld [vmem:[%s13974_s5 + $0x2e0] sm:$0xff]  }
0x104c   :  { %4469 = vmatprep.mubr.bf16.mxu0 %v3394_v57  ;;  %4510 = vmatprep.mubr.bf16.mxu1 %v3396_v58  ;;  %v3366_v13 = vmax.f32 %v3140_v11, 0.0  ;;  %v3368_v3 = vmax.f32 %v3183_v15, 0.0  ;;  %v11622_v57 = vld [vmem:[%s13974_s5 + $0x108] sm:$0xff]  }
0x104d   :  { %v3143_v16 = vpop.f32.mrf.mxu0  ;;  %v3186_v17 = vpop.f32.mrf.mxu1  ;;  %4470 = vmatmul.mubr.bf16.vlgmr.msra.gmra.mxu0 %v3393_v63  ;;  %4511 = vmatmul.mubr.bf16.vlgmr.msra.gmra.mxu1 %v3395_v0  ;;  %v3142_v58 = vadd.f32 %v12595_v1, %v2809_v54  ;;  %v11623_v63 = vld [vmem:[%s13974_s5 + $0x188] sm:$0xff]   ;;  %v11624_v0 = vld [vmem:[%s13974_s5 + $0x140] sm:$0xff]   ;;  %v3138_v11 = vadd.f32 %v12583_v45, %v2809_v54  ;;  %v11628_v45 = vld [vmem:[%s13974_s5 + $0x278] sm:$0xff]  }
0x104e   :  { %v3144_v6 = vadd.f32 %v3143_v16, %v2813_v47  ;;  %v3187_v2 = vadd.f32 %v3186_v17, %v2821_v48  ;;  %10678 = vmatpush3.bf16.msra.mxu0 %v11598_v61  ;;  %10700 = vmatpush3.bf16.msra.mxu1 %v11599_v62  ;;  %v11618_v48 = vld [vmem:[%s13974_s5 + $0x110] sm:$0xff]   ;;  %v2829_v61 = vrot.slane %v2782_v26, %v12565_v12  ;;  %v11625_v1 = vld [vmem:[%s13974_s5 + $0x1c0] sm:$0xff]   ;;  %v11646_v54 = vld [vmem:[%s13974_s5 + $0x218] sm:$0xff]  }
0x104f   :  { %10679 = vmatprep.subr.bf16.mxu0 %v11600_v5  ;;  %10701 = vmatprep.subr.bf16.mxu1 %v11601_v7  ;;  %v12629_v29 = vpop.f32.mrf.mxu0  ;;  %v12634_v31 = vpop.f32.mrf.mxu1  ;;  %v3185_v5 = vadd.f32 %v12597_v4, %v2817_v55  ;;  %v2837_v7 = vrot.slane %v2784_v52, %v12565_v12  ;;  %v3181_v16 = vadd.f32 %v12585_v46, %v2817_v55  ;;  %v11645_v52 = vld [vmem:[%s13974_s5 + $0x2d8] sm:$0xff]  }
0x1050   :  { %v3382_v10 = vmax.f32 %v3144_v6, 0.0  ;;  %v3384_v19 = vmax.f32 %v3187_v2, 0.0  ;;  %v11626_v6 = vld [vmem:[%s13974_s5 + $0x100] sm:$0xff]   ;;  %v3381_v2 = vmax.f32 %v3142_v58, 0.0  ;;  %v11649_v58 = vld [vmem:[%s13974_s5 + $0x2d0] sm:$0xff]  }
0x1051   :  { %v3225_v35 = vpop.f32.mrf.mxu0  ;;  %v3268_v38 = vpop.f32.mrf.mxu1 }
0x1052   :  { %v3398_v21 = vpack.c.bf16 %v3382_v10, %v3366_v13  ;;  %v3400_v22 = vpack.c.bf16 %v3384_v19, %v3368_v3  ;;  %10680 = vmatpush3.bf16.msra.mxu0 %v11602_v9  ;;  %10702 = vmatpush3.bf16.msra.mxu1 %v11603_v8  ;;  %v3226_v4 = vadd.f32 %v3225_v35, %v2829_v61  ;;  %v11627_v9 = vld [vmem:[%s13974_s5 + $0x180] sm:$0xff]   ;;  %v3383_v8 = vmax.f32 %v3185_v5, 0.0  ;;  %v11635_v35 = vld [vmem:[%s13974_s5 + $0x2b0] sm:$0xff]  }
0x1053   :  { %10681 = vmatprep.subr.bf16.mxu0 %v11604_v18  ;;  %10703 = vmatprep.subr.bf16.mxu1 %v11605_v20  ;;  %v12664_v47 = vpop.f32.mrf.mxu0  ;;  %v12675_v27 = vpop.f32.mrf.mxu1  ;;  %v3269_v46 = vadd.f32 %v3268_v38, %v2837_v7  ;;  %v11629_v18 = vld [vmem:[%s13974_s5 + $0x2f8] sm:$0xff]   ;;  %v3365_v13 = vmax.f32 %v3138_v11, 0.0  ;;  %v3367_v10 = vmax.f32 %v3181_v16, 0.0  ;;  %v11637_v38 = vld [vmem:[%s13974_s5 + $0x2e8] sm:$0xff]   ;;  %v11650_v5 = vld [vmem:[%s13974_s5 + $0x210] sm:$0xff]  }
0x1054   :  { %4551 = vmatprep.mubr.bf16.mxu0 %v3398_v21  ;;  %4592 = vmatprep.mubr.bf16.mxu1 %v3400_v22  ;;  %v11630_v20 = vld [vmem:[%s13974_s5 + $0x238] sm:$0xff]   ;;  %v3370_v22 = vmax.f32 %v3226_v4, 0.0  ;;  %v11652_v11 = vld [vmem:[%s13974_s5 + $0x248] sm:$0xff]  }
0x1055   :  { %v3229_v56 = vpop.f32.mrf.mxu0  ;;  %v3272_v62 = vpop.f32.mrf.mxu1  ;;  %v3397_v21 = vpack.c.bf16 %v3381_v2, %v3365_v13  ;;  %v11653_v16 = vld [vmem:[%s13974_s5 + $0x2c8] sm:$0xff]  }
0x1056   :  { %10682 = vmatpush3.bf16.msra.mxu0 %v11606_v23  ;;  %10704 = vmatpush3.bf16.msra.mxu1 %v11607_v24  ;;  %v3230_v15 = vadd.f32 %v3229_v56, %v2829_v61  ;;  %v3273_v17 = vadd.f32 %v3272_v62, %v2837_v7  ;;  %v11631_v23 = vld [vmem:[%s13974_s5 + $0x2b8] sm:$0xff]   ;;  %v3399_v24 = vpack.c.bf16 %v3383_v8, %v3367_v10  ;;  %v2781_v61 = vunpack.c.l.bf16 %v12662_v44  ;;  %v11654_v4 = vld [vmem:[%s13974_s5 + $0x208] sm:$0xff]  }
0x1057   :  { %10683 = vmatprep.subr.bf16.mxu0 %v11608_v25  ;;  %10705 = vmatprep.subr.bf16.mxu1 %v11609_v28  ;;  %v3372_v25 = vmax.f32 %v3269_v46, 0.0  ;;  %v11632_v28 = vld [vmem:[%s13974_s5 + $0x270] sm:$0xff]   ;;  %v12755_v43 = vpop.f32.mrf.mxu0  ;;  %v12760_v26 = vpop.f32.mrf.mxu1  ;;  %v11647_v56 = vld [vmem:[%s13974_s5 + $0x298] sm:$0xff]   ;;  %v2783_v62 = vunpack.c.l.bf16 %v12672_v49  ;;  %v11655_v46 = vld [vmem:[%s13974_s5 + $0x288] sm:$0xff]  }
0x1058   :  { %v3386_v3 = vmax.f32 %v3230_v15, 0.0  ;;  %v3388_v19 = vmax.f32 %v3273_v17, 0.0  ;;  %v12798_v7 = vld [vmem:[%s13973_s4 + $0x138] sm:$0x11]  ;;  %v2825_v17 = vrot.slane %v2781_v61, %v12565_v12  ;;  %v11673_v61 = vld [vmem:[%s13974_s5 + $0x3e0] sm:$0xff]  }
0x1059   :  { %v3354_v55 = vpop.f32.mrf.mxu1  ;;  %v2788_v15 = vunpack.c.h.bf16 %v12798_v7 }
0x105a   :  { %10684 = vmatpush3.bf16.msra.mxu0 %v11610_v30  ;;  %10706 = vmatpush3.bf16.msra.mxu1 %v11611_v32  ;;  %v3402_v30 = vpack.c.bf16 %v3386_v3, %v3370_v22  ;;  %v11633_v32 = vld [vmem:[%s13974_s5 + $0x2f0] sm:$0xff]   ;;  %v3224_v10 = vadd.f32 %v12629_v29, %v2825_v17  ;;  %v11658_v22 = vld [vmem:[%s13974_s5 + $0x200] sm:$0xff]   ;;  %v11660_v29 = vld [vmem:[%s13974_s5 + $0x378] sm:$0xff]  }
0x105b   :  { %10685 = vmatprep.subr.bf16.mxu0 %v11612_v33  ;;  %10707 = vmatprep.subr.bf16.mxu1 %v11613_v34  ;;  %v3404_v33 = vpack.c.bf16 %v3388_v19, %v3372_v25  ;;  %v11634_v34 = vld [vmem:[%s13974_s5 + $0x230] sm:$0xff]   ;;  %v12801_v49 = vpop.f32.mrf.mxu1  ;;  %v2853_v3 = vrot.slane %v2788_v15, %v12565_v12  ;;  %v11679_v15 = vld [vmem:[%s13974_s5 + $0x398] sm:$0xff]  }
0x105d   :  { %v3358_v8 = vpop.f32.mrf.mxu1 }
0x105e   :  { %10686 = vmatpush3.bf16.msra.mxu0 %v11614_v36  ;;  %10708 = vmatpush3.bf16.msra.mxu1 %v11615_v39  ;;  %v11636_v36 = vld [vmem:[%s13974_s5 + $0x268] sm:$0xff]  }
0x105f   :  { %10687 = vmatprep.subr.bf16.mxu0 %v11616_v40  ;;  %10709 = vmatprep.subr.bf16.mxu1 %v11617_v41  ;;  %v11638_v39 = vld [vmem:[%s13974_s5 + $0x228] sm:$0xff]   ;;  %v11640_v41 = vld [vmem:[%s13974_s5 + $0x260] sm:$0xff]  }
0x1060   :  { %v11639_v40 = vld [vmem:[%s13974_s5 + $0x2a8] sm:$0xff]  }
0x1062   :  { %10688 = vmatpush3.bf16.msra.mxu0 %v11618_v48  ;;  %10710 = vmatpush3.bf16.msra.mxu1 %v11619_v50  ;;  %v11642_v48 = vld [vmem:[%s13974_s5 + $0x220] sm:$0xff]  }
0x1063   :  { %10689 = vmatprep.subr.bf16.mxu0 %v11620_v51  ;;  %10711 = vmatprep.subr.bf16.mxu1 %v11621_v53  ;;  %v11643_v50 = vld [vmem:[%s13974_s5 + $0x2a0] sm:$0xff]   ;;  %v11644_v51 = vld [vmem:[%s13974_s5 + $0x258] sm:$0xff]   ;;  %v3311_v53 = vpop.f32.mrf.mxu0 }
0x1066   :  { %10690 = vmatpush3.bf16.msra.mxu0 %v11622_v57  ;;  %10712 = vmatpush3.bf16.msra.mxu1 %v11623_v63  ;;  %v11648_v57 = vld [vmem:[%s13974_s5 + $0x250] sm:$0xff]  }
0x1067   :  { %10691 = vmatprep.subr.bf16.mxu0 %v11624_v0  ;;  %10713 = vmatprep.subr.bf16.mxu1 %v11625_v1  ;;  %v12788_v63 = vld [vmem:[%s13973_s4 + $0x130] sm:$0x11]  ;;  %v12790_v0 = vpop.f32.mrf.mxu0 }
0x1068   :  { %v2786_v44 = vunpack.c.h.bf16 %v12788_v63  ;;  %v11651_v1 = vld [vmem:[%s13974_s5 + $0x290] sm:$0xff]  }
0x1069   :  { %v3315_v2 = vpop.f32.mrf.mxu0 }
0x106a   :  { %10692 = vmatpush3.bf16.msra.mxu0 %v11626_v6  ;;  %10714 = vmatpush3.bf16.msra.mxu1 %v11627_v9  ;;  %v2833_v6 = vrot.slane %v2783_v62, %v12565_v12  ;;  %v3228_v9 = vadd.f32 %v12664_v47, %v2825_v17  ;;  %v11657_v47 = vld [vmem:[%s13974_s5 + $0x2c0] sm:$0xff]   ;;  %v11681_v17 = vld [vmem:[%s13974_s5 + $0x3d0] sm:$0xff]  }
0x106b   :  { %10721 = vmatprep.subr.bf16.mxu0 %v11628_v45  ;;  %10743 = vmatprep.subr.bf16.mxu1 %v11629_v18  ;;  %v2845_v45 = vrot.slane %v2786_v44, %v12565_v12  ;;  %v11656_v18 = vld [vmem:[%s13974_s5 + $0x240] sm:$0xff]   ;;  %v11676_v44 = vld [vmem:[%s13974_s5 + $0x358] sm:$0xff]  }
0x106c   :  { %v3271_v13 = vadd.f32 %v12675_v27, %v2833_v6  ;;  %v11674_v62 = vld [vmem:[%s13974_s5 + $0x320] sm:$0xff]  }
0x106d   :  { %4552 = vmatmul.mubr.bf16.vlgmr.msra.gmra.mxu0 %v3397_v21  ;;  %4593 = vmatmul.mubr.bf16.vlgmr.msra.gmra.mxu1 %v3399_v24  ;;  %v3316_v19 = vadd.f32 %v3315_v2, %v2845_v45  ;;  %v3359_v21 = vadd.f32 %v3358_v8, %v2853_v3  ;;  %v3312_v27 = vadd.f32 %v3311_v53, %v2845_v45  ;;  %v11659_v24 = vld [vmem:[%s13974_s5 + $0x280] sm:$0xff]   ;;  %v11667_v53 = vld [vmem:[%s13974_s5 + $0x3b0] sm:$0xff]   ;;  %v2787_v2 = vunpack.c.l.bf16 %v12798_v7  ;;  %v11684_v45 = vld [vmem:[%s13974_s5 + $0x348] sm:$0xff]  }
0x106e   :  { %10722 = vmatpush3.bf16.msra.mxu0 %v11630_v20  ;;  %4633 = vmatprep.mubr.bf16.mxu0 %v3402_v30  ;;  %v3267_v20 = vadd.f32 %v12634_v31, %v2833_v6  ;;  %v3387_v25 = vmax.f32 %v3271_v13, 0.0  ;;  %v3355_v31 = vadd.f32 %v3354_v55, %v2853_v3  ;;  %v3369_v30 = vmax.f32 %v3224_v10, 0.0  ;;  %v11669_v55 = vld [vmem:[%s13974_s5 + $0x3e8] sm:$0xff]   ;;  %v11688_v3 = vld [vmem:[%s13974_s5 + $0x340] sm:$0xff]  }
0x106f   :  { %10744 = vmatpush3.bf16.msra.mxu1 %v11631_v23  ;;  %4674 = vmatprep.mubr.bf16.mxu1 %v3404_v33  ;;  %v3385_v23 = vmax.f32 %v3228_v9, 0.0  ;;  %v2785_v6 = vunpack.c.l.bf16 %v12788_v63  ;;  %v11683_v9 = vld [vmem:[%s13974_s5 + $0x390] sm:$0xff]   ;;  %v11685_v63 = vld [vmem:[%s13974_s5 + $0x3c8] sm:$0xff]   ;;  %v2849_v8 = vrot.slane %v2787_v2, %v12565_v12  ;;  %v11689_v10 = vld [vmem:[%s13974_s5 + $0x3c0] sm:$0xff]  }
0x1070   :  { %10723 = vmatprep.subr.bf16.mxu0 %v11632_v28  ;;  %10745 = vmatprep.subr.bf16.mxu1 %v11633_v32  ;;  %v11661_v28 = vld [vmem:[%s13974_s5 + $0x3f8] sm:$0xff]   ;;  %v3390_v32 = vmax.f32 %v3316_v19, 0.0  ;;  %v3371_v33 = vmax.f32 %v3267_v20, 0.0  ;;  %v11687_v13 = vld [vmem:[%s13974_s5 + $0x388] sm:$0xff]   ;;  %v11690_v20 = vld [vmem:[%s13974_s5 + $0x300] sm:$0xff]  }
0x1071   :  { %v2841_v7 = vrot.slane %v2785_v6, %v12565_v12 }
0x1072   :  { %10724 = vmatpush3.bf16.msra.mxu0 %v11634_v34  ;;  %v3392_v34 = vmax.f32 %v3359_v21, 0.0 }
0x1073   :  { %10746 = vmatpush3.bf16.msra.mxu1 %v11635_v35  ;;  %10725 = vmatprep.subr.bf16.mxu0 %v11636_v36  ;;  %v11662_v35 = vld [vmem:[%s13974_s5 + $0x338] sm:$0xff]   ;;  %v3401_v36 = vpack.c.bf16 %v3385_v23, %v3369_v30  ;;  %v3310_v19 = vadd.f32 %v12755_v43, %v2841_v7 }
0x1074   :  { %10747 = vmatprep.subr.bf16.mxu1 %v11637_v38  ;;  %v3374_v38 = vmax.f32 %v3312_v27, 0.0 }
0x1075   :  { %v3373_v23 = vmax.f32 %v3310_v19, 0.0 }
0x1076   :  { %10726 = vmatpush3.bf16.msra.mxu0 %v11638_v39  ;;  %v11663_v39 = vld [vmem:[%s13974_s5 + $0x3b8] sm:$0xff]  }
0x1077   :  { %10748 = vmatpush3.bf16.msra.mxu1 %v11639_v40  ;;  %10727 = vmatprep.subr.bf16.mxu0 %v11640_v41  ;;  %v3403_v40 = vpack.c.bf16 %v3387_v25, %v3371_v33  ;;  %v3376_v41 = vmax.f32 %v3355_v31, 0.0 }
0x1078   :  { %10749 = vmatprep.subr.bf16.mxu1 %v11641_v42  ;;  %v11664_v42 = vld [vmem:[%s13974_s5 + $0x370] sm:$0xff]  }
0x107a   :  { %10728 = vmatpush3.bf16.msra.mxu0 %v11642_v48  ;;  %v3406_v48 = vpack.c.bf16 %v3390_v32, %v3374_v38 }
0x107b   :  { %10750 = vmatpush3.bf16.msra.mxu1 %v11643_v50  ;;  %10729 = vmatprep.subr.bf16.mxu0 %v11644_v51  ;;  %v11665_v50 = vld [vmem:[%s13974_s5 + $0x3f0] sm:$0xff]   ;;  %v3408_v51 = vpack.c.bf16 %v3392_v34, %v3376_v41 }
0x107c   :  { %10751 = vmatprep.subr.bf16.mxu1 %v11645_v52  ;;  %v11666_v52 = vld [vmem:[%s13974_s5 + $0x330] sm:$0xff]  }
0x107e   :  { %10730 = vmatpush3.bf16.msra.mxu0 %v11646_v54  ;;  %v11668_v54 = vld [vmem:[%s13974_s5 + $0x368] sm:$0xff]  }
0x107f   :  { %10752 = vmatpush3.bf16.msra.mxu1 %v11647_v56  ;;  %10731 = vmatprep.subr.bf16.mxu0 %v11648_v57  ;;  %v11670_v56 = vld [vmem:[%s13974_s5 + $0x328] sm:$0xff]  }
0x1080   :  { %10753 = vmatprep.subr.bf16.mxu1 %v11649_v58  ;;  %v11671_v57 = vld [vmem:[%s13974_s5 + $0x3a8] sm:$0xff]   ;;  %v11672_v58 = vld [vmem:[%s13974_s5 + $0x360] sm:$0xff]  }
0x1082   :  { %10732 = vmatpush3.bf16.msra.mxu0 %v11650_v5  ;;  %v11675_v5 = vld [vmem:[%s13974_s5 + $0x3a0] sm:$0xff]  }
0x1083   :  { %10754 = vmatpush3.bf16.msra.mxu1 %v11651_v1  ;;  %10733 = vmatprep.subr.bf16.mxu0 %v11652_v11  ;;  %v11677_v1 = vld [vmem:[%s13974_s5 + $0x3d8] sm:$0xff]  }
0x1084   :  { %10755 = vmatprep.subr.bf16.mxu1 %v11653_v16  ;;  %v11678_v11 = vld [vmem:[%s13974_s5 + $0x318] sm:$0xff]   ;;  %v11680_v16 = vld [vmem:[%s13974_s5 + $0x350] sm:$0xff]  }
0x1086   :  { %10734 = vmatpush3.bf16.msra.mxu0 %v11654_v4  ;;  %v11682_v4 = vld [vmem:[%s13974_s5 + $0x310] sm:$0xff]  }
0x1087   :  { %10756 = vmatpush3.bf16.msra.mxu1 %v11655_v46  ;;  %10735 = vmatprep.subr.bf16.mxu0 %v11656_v18  ;;  %v11686_v46 = vld [vmem:[%s13974_s5 + $0x308] sm:$0xff]   ;;  %v3314_v18 = vadd.f32 %v12790_v0, %v2841_v7  ;;  %v3353_v0 = vadd.f32 %v12760_v26, %v2849_v8 }
0x1088   :  { %10757 = vmatprep.subr.bf16.mxu1 %v11657_v47  ;;  %v3357_v47 = vadd.f32 %v12801_v49, %v2849_v8  ;;  %v11691_v49 = vld [vmem:[%s13974_s5 + $0x380] sm:$0xff]  }
0x1089   :  { %v3389_v21 = vmax.f32 %v3314_v18, 0.0  ;;  %v3375_v27 = vmax.f32 %v3353_v0, 0.0 }
0x108a   :  { %10736 = vmatpush3.bf16.msra.mxu0 %v11658_v22  ;;  %v3391_v22 = vmax.f32 %v3357_v47, 0.0 }
0x108b   :  { %10758 = vmatpush3.bf16.msra.mxu1 %v11659_v24  ;;  %10765 = vmatprep.subr.bf16.mxu0 %v11660_v29  ;;  %v3405_v43 = vpack.c.bf16 %v3389_v21, %v3373_v23 }
0x108c   :  { %10787 = vmatprep.subr.bf16.mxu1 %v11661_v28  ;;  %v3407_v26 = vpack.c.bf16 %v3391_v22, %v3375_v27 }
0x108d   :  { %4634 = vmatmul.mubr.bf16.vlgmr.msra.gmra.mxu0 %v3401_v36 }
0x108e   :  { %4675 = vmatmul.mubr.bf16.vlgmr.msra.gmra.mxu1 %v3403_v40  ;;  %10766 = vmatpush3.bf16.msra.mxu0 %v11662_v35 }
0x108f   :  { %4715 = vmatprep.mubr.bf16.mxu0 %v3406_v48  ;;  %10788 = vmatpush3.bf16.msra.mxu1 %v11663_v39  ;;  %v9786_v48 = vld [vmem:[%s13971_s1 + $0x11] ss:$0 sm:$0xff] }
0x1090   :  { %4756 = vmatprep.mubr.bf16.mxu1 %v3408_v51  ;;  %10767 = vmatprep.subr.bf16.mxu0 %v11664_v42 }
0x1091   :  { %10789 = vmatprep.subr.bf16.mxu1 %v11665_v50 }
0x1092   :  { %10768 = vmatpush3.bf16.msra.mxu0 %v11666_v52 }
0x1093   :  { %10790 = vmatpush3.bf16.msra.mxu1 %v11667_v53  ;;  %10769 = vmatprep.subr.bf16.mxu0 %v11668_v54 }
0x1094   :  { %10791 = vmatprep.subr.bf16.mxu1 %v11669_v55 }
0x1096   :  { %10770 = vmatpush3.bf16.msra.mxu0 %v11670_v56 }
0x1097   :  { %10792 = vmatpush3.bf16.msra.mxu1 %v11671_v57  ;;  %10771 = vmatprep.subr.bf16.mxu0 %v11672_v58 }
0x1098   :  { %10793 = vmatprep.subr.bf16.mxu1 %v11673_v61 }
0x109a   :  { %10772 = vmatpush3.bf16.msra.mxu0 %v11674_v62 }
0x109b   :  { %10794 = vmatpush3.bf16.msra.mxu1 %v11675_v5  ;;  %10773 = vmatprep.subr.bf16.mxu0 %v11676_v44 }
0x109c   :  { %10795 = vmatprep.subr.bf16.mxu1 %v11677_v1 }
0x109e   :  { %10774 = vmatpush3.bf16.msra.mxu0 %v11678_v11 }
0x109f   :  { %10796 = vmatpush3.bf16.msra.mxu1 %v11679_v15  ;;  %10775 = vmatprep.subr.bf16.mxu0 %v11680_v16 }
0x10a0   :  { %10797 = vmatprep.subr.bf16.mxu1 %v11681_v17 }
0x10a2   :  { %10776 = vmatpush3.bf16.msra.mxu0 %v11682_v4 }
0x10a3   :  { %10798 = vmatpush3.bf16.msra.mxu1 %v11683_v9  ;;  %10777 = vmatprep.subr.bf16.mxu0 %v11684_v45 }
0x10a4   :  { %10799 = vmatprep.subr.bf16.mxu1 %v11685_v63 }
0x10a6   :  { %10778 = vmatpush3.bf16.msra.mxu0 %v11686_v46 }
0x10a7   :  { %10800 = vmatpush3.bf16.msra.mxu1 %v11687_v13  ;;  %10779 = vmatprep.subr.bf16.mxu0 %v11688_v3 }
0x10a8   :  { %10801 = vmatprep.subr.bf16.mxu1 %v11689_v10 }
0x10aa   :  { %10780 = vmatpush3.bf16.msra.mxu0 %v11690_v20 }
0x10ab   :  { %10802 = vmatpush3.bf16.msra.mxu1 %v11691_v49 }
0x10ad   :  { %4716 = vmatmul.mubr.bf16.vlgmr.msra.gmra.mxu0 %v3405_v43 }
0x10ae   :  { %4757 = vmatmul.mubr.bf16.vlgmr.msra.gmra.mxu1 %v3407_v26 }
0x110d   :  { %v10649_v24 = vpop.f32.mrf.mxu0  ;;  %v10671_v29 = vpop.f32.mrf.mxu1 }
0x110f   :  { %v10650_v25 = vpop.f32.mrf.mxu0  ;;  %v10672_v31 = vpop.f32.mrf.mxu1 }
0x1110   :  { %v10651_v42 = vadd.f32 %v10650_v25, %v10649_v24  ;;  %v10673_v56 = vadd.f32 %v10672_v31, %v10671_v29 }
0x1111   :  { %v10652_v28 = vpop.f32.mrf.mxu0  ;;  %v10674_v30 = vpop.f32.mrf.mxu1 }
0x1112   :  { %v4472_v52 = vadd.f32 %v10651_v42, %v9786_v48 }
0x1113   :  { %v10653_v32 = vpop.f32.mrf.mxu0  ;;  %v10675_v34 = vpop.f32.mrf.mxu1 }
0x1114   :  { %v10654_v53 = vadd.f32 %v10653_v32, %v10652_v28  ;;  %v4513_v58 = vadd.f32 %v10673_v56, %v4472_v52  ;;  %v10676_v44 = vadd.f32 %v10675_v34, %v10674_v30  ;;  %v9928_v52 = vld [vmem:[%s13969_s2 + $0x298] sm:$0xff]  ;;  %v9926_v56 = vld [vmem:[%s13969_s2 + $0x288] sm:$0xff] }
0x1115   :  { %11340 = vmatprep.subr.mxu1 %v9928_v52 }
0x1116   :  { %v4475_v61 = vadd.f32 %v10654_v53, %v9786_v48  ;;  %v9919_v53 = vld [vmem:[%s13969_s2 + $0x1f0] sm:$0xff]  ;;  %11341 = vmatpush3.msra.mxu1 %v9928_v52  ;;  %v9959_v52 = vld [vmem:[%s13969_s2 + $0x2c0] sm:$0xff] }
0x1118   :  { %v4516_v15 = vadd.f32 %v10676_v44, %v4475_v61  ;;  %v9936_v61 = vld [vmem:[%s13969_s2 + $0x338] sm:$0xff] }
0x112d   :  { %v10693_v33 = vpop.f32.mrf.mxu0  ;;  %v10715_v35 = vpop.f32.mrf.mxu1 }
0x112f   :  { %v10694_v36 = vpop.f32.mrf.mxu0  ;;  %v10716_v38 = vpop.f32.mrf.mxu1 }
0x1130   :  { %v10695_v57 = vadd.f32 %v10694_v36, %v10693_v33  ;;  %v10717_v16 = vadd.f32 %v10716_v38, %v10715_v35 }
0x1131   :  { %v10696_v39 = vpop.f32.mrf.mxu0  ;;  %v10718_v40 = vpop.f32.mrf.mxu1 }
0x1132   :  { %v4554_v1 = vadd.f32 %v10695_v57, %v4513_v58  ;;  %v9917_v57 = vld [vmem:[%s13969_s2 + $0x1e0] sm:$0xff] }
0x1133   :  { %v10697_v41 = vpop.f32.mrf.mxu0  ;;  %v10719_v51 = vpop.f32.mrf.mxu1  ;;  %v9925_v58 = vld [vmem:[%s13969_s2 + $0x280] sm:$0xff] }
0x1134   :  { %v10698_v11 = vadd.f32 %v10697_v41, %v10696_v39  ;;  %v4595_v4 = vadd.f32 %v10717_v16, %v4554_v1  ;;  %v10720_v45 = vadd.f32 %v10719_v51, %v10718_v40 }
0x1136   :  { %v4557_v9 = vadd.f32 %v10698_v11, %v4516_v15 }
0x1138   :  { %v4598_v18 = vadd.f32 %v10720_v45, %v4557_v9 }
0x114d   :  { %v10737_v50 = vpop.f32.mrf.mxu0 }
0x114e   :  { %v10759_v54 = vpop.f32.mrf.mxu1 }
0x114f   :  { %v10738_v55 = vpop.f32.mrf.mxu0 }
0x1150   :  { %v10760_v62 = vpop.f32.mrf.mxu1  ;;  %v10739_v17 = vadd.f32 %v10738_v55, %v10737_v50  ;;  %v9918_v55 = vld [vmem:[%s13969_s2 + $0x1e8] sm:$0xff] }
0x1151   :  { %v10740_v5 = vpop.f32.mrf.mxu0  ;;  %v10761_v13 = vadd.f32 %v10760_v62, %v10759_v54  ;;  %v9927_v54 = vld [vmem:[%s13969_s2 + $0x290] sm:$0xff] }
0x1152   :  { %v10762_v6 = vpop.f32.mrf.mxu1  ;;  %v4636_v63 = vadd.f32 %v10739_v17, %v4595_v4  ;;  %11342 = vmatprep.subr.mxu1 %v9927_v54  ;;  %v9915_v17 = vld [vmem:[%s13971_s1 + $0x14] ss:$0 sm:$0xff] }
0x1153   :  { %v10741_v2 = vpop.f32.mrf.mxu0  ;;  %11343 = vmatpush3.msra.mxu1 %v9927_v54 }
0x1154   :  { %v10742_v7 = vadd.f32 %v10741_v2, %v10740_v5  ;;  %v10763_v8 = vpop.f32.mrf.mxu1  ;;  %v4677_v10 = vadd.f32 %v10761_v13, %v4636_v63  ;;  %11344 = vmatprep.subr.mxu1 %v9926_v56  ;;  %v9916_v2 = vld [vmem:[%s13971_s1 + $0x15] ss:$0 sm:$0xff]  ;;  %v9933_v13 = vld [vmem:[%s13969_s2 + $0x320] sm:$0xff] }
0x1155   :  { %v10764_v49 = vadd.f32 %v10763_v8, %v10762_v6  ;;  %11345 = vmatpush3.msra.mxu1 %v9926_v56 }
0x1156   :  { %v4639_v19 = vadd.f32 %v10742_v7, %v4598_v18  ;;  %11346 = vmatprep.subr.mxu1 %v9925_v58  ;;  %v9934_v18 = vld [vmem:[%s13969_s2 + $0x328] sm:$0xff] }
0x1157   :  { %11347 = vmatpush3.msra.mxu1 %v9925_v58 }
0x1158   :  { %v4680_v26 = vadd.f32 %v10764_v49, %v4639_v19  ;;  %11362 = vmatprep.subr.mxu1 %v11900_v14 }
0x116d   :  { %v10781_v46 = vpop.f32.mrf.mxu0 }
0x116e   :  { %v10803_v3 = vpop.f32.mrf.mxu1 }
0x116f   :  { %v10782_v47 = vpop.f32.mrf.mxu0 }
0x1170   :  { %v10783_v0 = vadd.f32 %v10782_v47, %v10781_v46  ;;  %v10804_v20 = vpop.f32.mrf.mxu1  ;;  %v9935_v46 = vld [vmem:[%s13969_s2 + $0x330] sm:$0xff] }
0x1171   :  { %v10784_v21 = vpop.f32.mrf.mxu0  ;;  %v10805_v23 = vadd.f32 %v10804_v20, %v10803_v3 }
0x1172   :  { %v4718_v22 = vadd.f32 %v10783_v0, %v4677_v10  ;;  %v10806_v27 = vpop.f32.mrf.mxu1  ;;  %v9930_v10 = vld [vmem:[%s13969_s2 + $0x2a0] ss:$0 sm:$0xff] }
0x1173   :  { %v10785_v43 = vpop.f32.mrf.mxu0 }
0x1174   :  { %v4759_v24 = vadd.f32 %v10805_v23, %v4718_v22  ;;  %v10786_v29 = vadd.f32 %v10785_v43, %v10784_v21  ;;  %v10807_v25 = vpop.f32.mrf.mxu1  ;;  %v9922_v21 = vld [vmem:[%s13969_s2 + $0x200] ss:$0 sm:$0xff] }
0x1175   :  { %v10808_v28 = vadd.f32 %v10807_v25, %v10806_v27  ;;  %v9938_v27 = vld [vmem:[%s13969_s2 + $0x340] ss:$0 sm:$0xff] }
0x1176   :  { %v4721_v31 = vadd.f32 %v10786_v29, %v4680_v26  ;;  %v4765_v30 = vadd.f32 %v4759_v24, %v12381_v60 }
0x1178   :  { %v4762_v32 = vadd.f32 %v10808_v28, %v4721_v31  ;;  %v4767_v33 = vsel %vm45_vm0, %v4765_v30, 0.0 }
0x1179   :  { %4768 = vadd.xlane.f32.xlu0 %v4767_v33 }
0x117a   :  { %v4766_v34 = vadd.f32 %v4762_v32, %v12379_v59  ;;  %v9920_v59 = vld [vmem:[%s13969_s2 + $0x1f8] sm:$0xff] }
0x117b   :  { %11329 = vmatprep.subr.mxu0 %v9920_v59 }
0x117c   :  { %v4770_v35 = vsel %vm45_vm0, %v4766_v34, 0.0  ;;  %11330 = vmatpush3.msra.mxu0 %v9920_v59  ;;  %v9951_v59 = vld [vmem:[%s13969_s2 + $0x220] sm:$0xff] }
0x117d   :  { %4771 = vadd.xlane.f32.xlu1 %v4770_v35  ;;  %11331 = vmatprep.subr.mxu0 %v9919_v53 }
0x117e   :  { %11332 = vmatpush3.msra.mxu0 %v9919_v53 }
0x117f   :  { %11333 = vmatprep.subr.mxu0 %v9918_v55 }
0x1180   :  { %11334 = vmatpush3.msra.mxu0 %v9918_v55 }
0x1181   :  { %11335 = vmatprep.subr.mxu0 %v9917_v57 }
0x1182   :  { %11336 = vmatpush3.msra.mxu0 %v9917_v57  ;;  %v9950_v57 = vld [vmem:[%s13969_s2 + $0x218] sm:$0xff] }
0x1183   :  { %11351 = vmatprep.subr.mxu0 %v9936_v61 }
0x1202   :  { %v4769_v36 = vpop.xlane.xlu0 %4768 }
0x1203   :  { %v4773_v38 = vmul.f32 0.03125, %v4769_v36 }
0x1205   :  { %v4775_v39 = vsub.f32 %v4765_v30, %v4773_v38 }
0x1206   :  { %v4772_v40 = vpop.xlane.xlu1 %4771 }
0x1207   :  { %v4774_v41 = vmul.f32 0.03125, %v4772_v40  ;;  %v4777_v42 = vmul.f32 %v4775_v39, %v4775_v39 }
0x1209   :  { %v4776_v48 = vsub.f32 %v4766_v34, %v4774_v41  ;;  %v4779_v50 = vsel %vm45_vm0, %v4777_v42, 0.0 }
0x120a   :  { %4780 = vadd.xlane.f32.xlu0 %v4779_v50 }
0x120b   :  { %v4778_v60 = vmul.f32 %v4776_v48, %v4776_v48 }
0x120d   :  { %v4782_v51 = vsel %vm45_vm0, %v4778_v60, 0.0 }
0x120e   :  { %4783 = vadd.xlane.f32.xlu1 %v4782_v51 }
0x1293   :  { %v4781_v62 = vpop.xlane.xlu0 %4780 }
0x1294   :  { %v4785_v5 = vmul.f32 0.03125, %v4781_v62 }
0x1296   :  { %v4787_v44 = vadd.f32 1e-05, %v4785_v5  ;;  %v9948_v5 = vld [vmem:[%s13969_s2 + $0x208] sm:$0xff] }
0x1297   :  { %v4784_v1 = vpop.xlane.xlu1 %4783 }
0x1298   :  { %11856 = vrsqrt.f32 %v4787_v44  ;;  %v4786_v11 = vmul.f32 0.03125, %v4784_v1  ;;  %v9958_v44 = vld [vmem:[%s13969_s2 + $0x2b8] sm:$0xff]  ;;  %v9957_v1 = vld [vmem:[%s13969_s2 + $0x2b0] sm:$0xff] }
0x129a   :  { %v4788_v15 = vadd.f32 1e-05, %v4786_v11  ;;  %v9967_v11 = vld [vmem:[%s13969_s2 + $0x360] sm:$0xff] }
0x129c   :  { %11858 = vrsqrt.f32 %v4788_v15  ;;  %v9956_v15 = vld [vmem:[%s13969_s2 + $0x2a8] sm:$0xff] }
0x12a5   :  { %v11857_v16 = vpop.eup %11856 }
0x12a6   :  { %v4791_v6 = vmul.f32 %v11857_v16, %v4775_v39  ;;  %v9966_v16 = vld [vmem:[%s13969_s2 + $0x358] sm:$0xff] }
0x12a8   :  { %v4797_v4 = vmul.f32 %v9915_v17, %v4791_v6  ;;  %v9964_v6 = vld [vmem:[%s13969_s2 + $0x348] sm:$0xff] }
0x12a9   :  { %v11859_v9 = vpop.eup %11858 }
0x12aa   :  { %v12986_v45 = vadd.f32 %v9916_v2, %v4797_v4  ;;  %v4792_v63 = vmul.f32 %v11859_v9, %v4776_v48 }
0x12ac   :  { %v4798_v7 = vmul.f32 %v9915_v17, %v4792_v63  ;;  %11337 = vmatprep.mubr.msk.f32.mxu0 %vm45_vm0, %v12986_v45  ;;  %11348 = vmatprep.mubr.msk.f32.mxu1 %vm45_vm0, %v12986_v45  ;;  %v9965_v17 = vld [vmem:[%s13969_s2 + $0x350] sm:$0xff] }
0x12ae   :  { %v12992_v8 = vadd.f32 %v9916_v2, %v4798_v7 }
0x12b0   :  { %11338 = vmatmul.mubr.msk.f32.vlgmr.msra.gmra.mxu0 %vm45_vm0, %v12992_v8  ;;  %11349 = vmatmul.mubr.msk.f32.vlgmr.msra.gmra.mxu1 %vm45_vm0, %v12992_v8 }
0x12b1   :  { %11352 = vmatpush3.msra.mxu0 %v9936_v61  ;;  %11359 = vmatprep.mubr.msk.f32.mxu0 %vm45_vm0, %v12986_v45  ;;  %v9949_v61 = vld [vmem:[%s13969_s2 + $0x210] sm:$0xff] }
0x12b2   :  { %11353 = vmatprep.subr.mxu0 %v9935_v46  ;;  %11364 = vmatprep.mubr.msk.f32.mxu1 %vm11901_vm1, %v11900_v14 }
0x12b3   :  { %11354 = vmatpush3.msra.mxu0 %v9935_v46 }
0x12b4   :  { %11355 = vmatprep.subr.mxu0 %v9934_v18 }
0x12b5   :  { %11356 = vmatpush3.msra.mxu0 %v9934_v18 }
0x12b6   :  { %11357 = vmatprep.subr.mxu0 %v9933_v13 }
0x12b7   :  { %11358 = vmatpush3.msra.mxu0 %v9933_v13 }
0x12b8   :  { %11360 = vmatmul.mubr.msk.f32.vlgmr.msra.gmra.mxu0 %vm45_vm0, %v12992_v8  ;;  %11372 = vmatprep.subr.mxu0 %v11900_v14 }
0x12b9   :  { %11374 = vmatprep.mubr.msk.f32.mxu0 %vm11901_vm1, %v11900_v14 }
0x1370   :  { %v11339_v3 = vpop.f32.mrf.mxu0  ;;  %v11350_v47 = vpop.f32.mrf.mxu1 }
0x1371   :  { %v4984_v22 = vadd.f32 %v11350_v47, %v9930_v10  ;;  %v4899_v43 = vadd.f32 %v11339_v3, %v9922_v21  ;;  %v9961_v47 = vld [vmem:[%s13969_s2 + $0x2c8] ss:$0 sm:$0xff] }
0x1372   :  { %v4978_v19 = vpop.f32.mrf.mxu1  ;;  %v4893_v0 = vpop.f32.mrf.mxu0 }
0x1373   :  { %v4979_v20 = vadd.f32 %v9930_v10, %v4978_v19  ;;  %v4894_v49 = vadd.f32 %v9922_v21, %v4893_v0 }
0x1375   :  { %11363 = vmatpush3.xpose.msk.msra.mxu1 %vm297_vm2, %v4979_v20  ;;  %v9953_v20 = vld [vmem:[%s13969_s2 + $0x228] ss:$0 sm:$0xff] }
0x1376   :  { %11367 = vmatprep.subr.mxu1 %v11900_v14 }
0x1378   :  { %v11361_v23 = vpop.f32.mrf.mxu0  ;;  %11365 = vmatmul.mubr.msk.f32.vlgmr.msra.gmra.mxu1 %vm297_vm2, %v4894_v49 }
0x1379   :  { %11368 = vmatpush3.xpose.msk.msra.mxu1 %vm297_vm2, %v4984_v22  ;;  %11369 = vmatprep.mubr.msk.f32.mxu1 %vm11901_vm1, %v11900_v14  ;;  %v5069_v24 = vadd.f32 %v11361_v23, %v9938_v27  ;;  %v9969_v23 = vld [vmem:[%s13969_s2 + $0x368] ss:$0 sm:$0xff] }
0x137a   :  { %v5063_v26 = vpop.f32.mrf.mxu0  ;;  %11377 = vmatprep.subr.mxu1 %v11900_v14 }
0x137b   :  { %v5064_v29 = vadd.f32 %v9938_v27, %v5063_v26 }
0x137c   :  { %11370 = vmatmul.mubr.msk.f32.vlgmr.msra.gmra.mxu1 %vm297_vm2, %v4899_v43 }
0x137d   :  { %11373 = vmatpush3.msra.mxu0 %v5064_v29  ;;  %11378 = vmatpush3.msra.mxu1 %v5069_v24 }
0x137e   :  { %11379 = vmatprep.mubr.msk.f32.mxu1 %vm11901_vm1, %v11900_v14  ;;  %11382 = vmatprep.subr.mxu0 %v9951_v59 }
0x137f   :  { %11393 = vmatprep.subr.mxu1 %v9959_v52 }
0x1438   :  { %v5144_v25 = vpop.f32.mrf.mxu1 }
0x1439   :  { %v5224_v31 = vmul.f32 0.35355338, %v5144_v25 }
0x143a   :  { %v11366_v28 = vpop.f32.mrf.mxu1 }
0x143b   :  { %v5226_v30 = vsel %vm297_vm2, %v5224_v31, -inf }
0x143c   :  { %5227 = vmax.xlane.f32.xlu1 %v5226_v30  ;;  %v5220_v32 = vpop.f32.mrf.mxu1 }
0x143d   :  { %v5225_v33 = vmul.f32 0.35355338, %v5220_v32 }
0x143e   :  { %v11371_v34 = vpop.f32.mrf.mxu1 }
0x143f   :  { %v5229_v35 = vsel %vm297_vm2, %v5225_v33, -inf }
0x1440   :  { %5230 = vmax.xlane.f32.xlu0 %v5229_v35 }
0x14c5   :  { %v5228_v36 = vpop.xlane.xlu1 %5227 }
0x14c6   :  { %v5232_v38 = vsub.f32 %v5224_v31, %v5228_v36 }
0x14c8   :  { %v5234_v39 = vmul.f32 1.442695, %v5232_v38 }
0x14c9   :  { %v5231_v40 = vpop.xlane.xlu0 %5230 }
0x14ca   :  { %11860 = vpow2.f32 %v5234_v39  ;;  %v5233_v41 = vsub.f32 %v5225_v33, %v5231_v40 }
0x14cc   :  { %v5236_v42 = vmul.f32 1.442695, %v5233_v41 }
0x14ce   :  { %11862 = vpow2.f32 %v5236_v42 }
0x14d7   :  { %v11861_v48 = vpop.eup %11860 }
0x14d8   :  { %v5238_v50 = vsel %vm297_vm2, %v11861_v48, 0.0 }
0x14d9   :  { %5239 = vadd.xlane.f32.xlu1 %v5238_v50 }
0x14db   :  { %v11863_v60 = vpop.eup %11862 }
0x14dc   :  { %v5241_v51 = vsel %vm297_vm2, %v11863_v60, 0.0 }
0x14dd   :  { %5242 = vadd.xlane.f32.xlu0 %v5241_v51 }
0x1562   :  { %v5240_v53 = vpop.xlane.xlu1 %5239 }
0x1563   :  { %11864 = vrcp.f32 %v5240_v53 }
0x1566   :  { %v5243_v54 = vpop.xlane.xlu0 %5242 }
0x1567   :  { %11866 = vrcp.f32 %v5243_v54 }
0x1570   :  { %v11865_v55 = vpop.eup %11864 }
0x1571   :  { %v5246_v56 = vmul.f32 %v11865_v55, %v11861_v48 }
0x1573   :  { %11375 = vmatmul.mubr.msk.f32.vlgmr.msra.gmra.mxu0 %vm297_vm2, %v5246_v56  ;;  %v9947_v56 = vld [vmem:[%s13972_s3 + $0x20] sm:$0xff] }
0x1574   :  { %v11867_v58 = vpop.eup %11866  ;;  %11383 = vmatpush3.msra.mxu0 %v9951_v59  ;;  %11390 = vmatprep.mubr.msk.f32.mxu0 %vm45_vm0, %v12986_v45 }
0x1575   :  { %11384 = vmatprep.subr.mxu0 %v9950_v57  ;;  %v5247_v62 = vmul.f32 %v11867_v58, %v11863_v60  ;;  %v9991_v58 = vld [vmem:[%s13969_s2 + $0x2e0] sm:$0xff] }
0x1576   :  { %11385 = vmatpush3.msra.mxu0 %v9950_v57  ;;  %v9992_v57 = vld [vmem:[%s13969_s2 + $0x2e8] sm:$0xff] }
0x1577   :  { %11386 = vmatprep.subr.mxu0 %v9949_v61  ;;  %11380 = vmatmul.mubr.msk.f32.vlgmr.msra.gmra.mxu1 %vm297_vm2, %v5247_v62  ;;  %v9989_v62 = vld [vmem:[%s13969_s2 + $0x2d0] sm:$0xff] }
0x1578   :  { %11387 = vmatpush3.msra.mxu0 %v9949_v61  ;;  %11394 = vmatpush3.msra.mxu1 %v9959_v52  ;;  %v9990_v61 = vld [vmem:[%s13969_s2 + $0x2d8] sm:$0xff] }
0x1579   :  { %11388 = vmatprep.subr.mxu0 %v9948_v5  ;;  %11395 = vmatprep.subr.mxu1 %v9958_v44 }
0x157a   :  { %11401 = vmatprep.mubr.msk.f32.mxu1 %vm45_vm0, %v12986_v45  ;;  %11389 = vmatpush3.msra.mxu0 %v9948_v5  ;;  %v9978_v5 = vld [vmem:[%s13972_s3 + $0x28] sm:$0xff] }
0x157b   :  { %11396 = vmatpush3.msra.mxu1 %v9958_v44  ;;  %11391 = vmatmul.mubr.msk.f32.vlgmr.msra.gmra.mxu0 %vm45_vm0, %v12992_v8  ;;  %v9984_v44 = vld [vmem:[%s13969_s2 + $0x248] sm:$0xff] }
0x157c   :  { %11397 = vmatprep.subr.mxu1 %v9957_v1  ;;  %11404 = vmatprep.subr.mxu0 %v9967_v11 }
0x157d   :  { %11398 = vmatpush3.msra.mxu1 %v9957_v1  ;;  %11405 = vmatpush3.msra.mxu0 %v9967_v11 }
0x157e   :  { %11412 = vmatprep.mubr.msk.f32.mxu0 %vm45_vm0, %v12986_v45  ;;  %11399 = vmatprep.subr.mxu1 %v9956_v15 }
0x157f   :  { %11406 = vmatprep.subr.mxu0 %v9966_v16  ;;  %11400 = vmatpush3.msra.mxu1 %v9956_v15 }
0x1580   :  { %11407 = vmatpush3.msra.mxu0 %v9966_v16  ;;  %11402 = vmatmul.mubr.msk.f32.vlgmr.msra.gmra.mxu1 %vm45_vm0, %v12992_v8 }
0x1581   :  { %11408 = vmatprep.subr.mxu0 %v9965_v17  ;;  %11415 = vmatprep.subr.mxu1 %v11900_v14 }
0x1582   :  { %11409 = vmatpush3.msra.mxu0 %v9965_v17  ;;  %11417 = vmatprep.mubr.msk.f32.mxu1 %vm11901_vm1, %v11900_v14 }
0x1583   :  { %11410 = vmatprep.subr.mxu0 %v9964_v6 }
0x1584   :  { %11411 = vmatpush3.msra.mxu0 %v9964_v6 }
0x1585   :  { %11413 = vmatmul.mubr.msk.f32.vlgmr.msra.gmra.mxu0 %vm45_vm0, %v12992_v8  ;;  %11425 = vmatprep.subr.mxu0 %v11900_v14 }
0x1586   :  { %11427 = vmatprep.mubr.msk.f32.mxu0 %vm11901_vm1, %v11900_v14 }
0x1633   :  { %v5317_v2 = vpop.f32.mrf.mxu0 }
0x1634   :  { %v6055_v63 = vrot.slane %v5317_v2, 7 }
0x1635   :  { %v11376_v4 = vpop.f32.mrf.mxu0 }
0x1636   :  { %v9983_v4 = vld [vmem:[%s13969_s2 + $0x240] sm:$0xff] }
0x1637   :  { %v5390_v9 = vpop.f32.mrf.mxu1 }
0x1638   :  { %v6056_v7 = vrot.slane %v5390_v9, 6 }
0x1639   :  { %v11381_v46 = vpop.f32.mrf.mxu1 }
0x163a   :  { %v13096_v18 = vsel %vm5979_vm3, %v6056_v7, %v6055_v63  ;;  %v9982_v63 = vld [vmem:[%s13969_s2 + $0x238] sm:$0xff]  ;;  %v9981_v46 = vld [vmem:[%s13969_s2 + $0x230] sm:$0xff] }
0x163b   :  { %v11392_v13 = vpop.f32.mrf.mxu0 }
0x163c   :  { %v5478_v26 = vadd.f32 %v11392_v13, %v9953_v20  ;;  %v9994_v13 = vld [vmem:[%s13969_s2 + $0x2f0] ss:$0 sm:$0xff] }
0x163d   :  { %v5472_v19 = vpop.f32.mrf.mxu0 }
0x163e   :  { %v5473_v49 = vadd.f32 %v9953_v20, %v5472_v19  ;;  %v9998_v19 = vld [vmem:[%s13969_s2 + $0x378] sm:$0xff] }
0x1640   :  { %v11403_v3 = vpop.f32.mrf.mxu1 }
0x1641   :  { %v5563_v22 = vadd.f32 %v11403_v3, %v9961_v47  ;;  %v9999_v3 = vld [vmem:[%s13969_s2 + $0x380] sm:$0xff] }
0x1642   :  { %v5557_v10 = vpop.f32.mrf.mxu1 }
0x1643   :  { %v5558_v0 = vadd.f32 %v9961_v47, %v5557_v10 }
0x1645   :  { %v11414_v21 = vpop.f32.mrf.mxu0  ;;  %11416 = vmatpush3.xpose.msk.msra.mxu1 %vm297_vm2, %v5558_v0 }
0x1646   :  { %11420 = vmatprep.subr.mxu1 %v11900_v14  ;;  %v5648_v24 = vadd.f32 %v11414_v21, %v9969_v23  ;;  %v9997_v21 = vld [vmem:[%s13969_s2 + $0x370] sm:$0xff] }
0x1647   :  { %v5642_v27 = vpop.f32.mrf.mxu0 }
0x1648   :  { %v5643_v43 = vadd.f32 %v9969_v23, %v5642_v27  ;;  %11418 = vmatmul.mubr.msk.f32.vlgmr.msra.gmra.mxu1 %vm297_vm2, %v5473_v49  ;;  %v9986_v27 = vld [vmem:[%s13969_s2 + $0x250] ss:$0 sm:$0xff] }
0x1649   :  { %11421 = vmatpush3.xpose.msk.msra.mxu1 %vm297_vm2, %v5563_v22  ;;  %11422 = vmatprep.mubr.msk.f32.mxu1 %vm11901_vm1, %v11900_v14 }
0x164a   :  { %11426 = vmatpush3.msra.mxu0 %v5643_v43  ;;  %11430 = vmatprep.subr.mxu1 %v11900_v14 }
0x164b   :  { %11435 = vmatprep.subr.mxu0 %v11900_v14 }
0x164c   :  { %11423 = vmatmul.mubr.msk.f32.vlgmr.msra.gmra.mxu1 %vm297_vm2, %v5478_v26 }
0x164d   :  { %11431 = vmatpush3.msra.mxu1 %v5648_v24  ;;  %11432 = vmatprep.mubr.msk.f32.mxu1 %vm11901_vm1, %v11900_v14  ;;  %v10002_v24 = vld [vmem:[%s13969_s2 + $0x390] ss:$0 sm:$0xff] }
0x164e   :  { %11440 = vmatprep.subr.mxu1 %v11900_v14 }
0x1708   :  { %v5723_v29 = vpop.f32.mrf.mxu1 }
0x1709   :  { %v5803_v25 = vmul.f32 0.35355338, %v5723_v29 }
0x170a   :  { %v11419_v31 = vpop.f32.mrf.mxu1 }
0x170b   :  { %v5805_v28 = vsel %vm297_vm2, %v5803_v25, -inf }
0x170c   :  { %5806 = vmax.xlane.f32.xlu0 %v5805_v28  ;;  %v5799_v30 = vpop.f32.mrf.mxu1 }
0x170d   :  { %v5804_v32 = vmul.f32 0.35355338, %v5799_v30 }
0x170e   :  { %v11424_v33 = vpop.f32.mrf.mxu1 }
0x170f   :  { %v5808_v34 = vsel %vm297_vm2, %v5804_v32, -inf }
0x1710   :  { %5809 = vmax.xlane.f32.xlu1 %v5808_v34 }
0x1795   :  { %v5807_v35 = vpop.xlane.xlu0 %5806 }
0x1796   :  { %v5811_v36 = vsub.f32 %v5803_v25, %v5807_v35 }
0x1798   :  { %v5813_v38 = vmul.f32 1.442695, %v5811_v36 }
0x1799   :  { %v5810_v39 = vpop.xlane.xlu1 %5809 }
0x179a   :  { %11868 = vpow2.f32 %v5813_v38  ;;  %v5812_v40 = vsub.f32 %v5804_v32, %v5810_v39 }
0x179c   :  { %v5815_v41 = vmul.f32 1.442695, %v5812_v40 }
0x179e   :  { %11870 = vpow2.f32 %v5815_v41 }
0x17a7   :  { %v11869_v42 = vpop.eup %11868 }
0x17a8   :  { %v5817_v48 = vsel %vm297_vm2, %v11869_v42, 0.0 }
0x17a9   :  { %5818 = vadd.xlane.f32.xlu0 %v5817_v48 }
0x17ab   :  { %v11871_v50 = vpop.eup %11870 }
0x17ac   :  { %v5820_v60 = vsel %vm297_vm2, %v11871_v50, 0.0 }
0x17ad   :  { %5821 = vadd.xlane.f32.xlu1 %v5820_v60 }
0x1832   :  { %v5819_v51 = vpop.xlane.xlu0 %5818 }
0x1833   :  { %11872 = vrcp.f32 %v5819_v51 }
0x1836   :  { %v5822_v59 = vpop.xlane.xlu1 %5821 }
0x1837   :  { %11874 = vrcp.f32 %v5822_v59 }
0x1840   :  { %v11873_v52 = vpop.eup %11872 }
0x1841   :  { %v5825_v53 = vmul.f32 %v11873_v52, %v11869_v42 }
0x1843   :  { %11428 = vmatmul.mubr.msk.f32.vlgmr.msra.gmra.mxu0 %vm297_vm2, %v5825_v53 }
0x1844   :  { %v11875_v54 = vpop.eup %11874  ;;  %11437 = vmatprep.mubr.msk.f32.mxu0 %vm11901_vm1, %v11900_v14  ;;  %11436 = vmatpush3.msra.mxu0 %v9978_v5 }
0x1845   :  { %v5826_v55 = vmul.f32 %v11875_v54, %v11871_v50  ;;  %11445 = vmatprep.subr.mxu0 %v9984_v44 }
0x1847   :  { %11433 = vmatmul.mubr.msk.f32.vlgmr.msra.gmra.mxu1 %vm297_vm2, %v5826_v55  ;;  %v10016_v55 = vld [vmem:[%s13969_s2 + $0x270] sm:$0xff] }
0x1848   :  { %11441 = vmatpush3.msra.mxu1 %v9947_v56  ;;  %11442 = vmatprep.mubr.msk.f32.mxu1 %vm11901_vm1, %v11900_v14 }
0x1849   :  { %11456 = vmatprep.subr.mxu1 %v9992_v57 }
0x184b   :  { %11443 = vmatmul.mubr.msk.f32.vlgmr.msra.gmra.mxu1 %vm297_vm2, %v13096_v18  ;;  %v10000_v18 = vld [vmem:[%s13969_s2 + $0x388] sm:$0xff] }
0x184c   :  { %11457 = vmatpush3.msra.mxu1 %v9992_v57  ;;  %11464 = vmatprep.mubr.msk.f32.mxu1 %vm45_vm0, %v12986_v45 }
0x184d   :  { %11458 = vmatprep.subr.mxu1 %v9991_v58 }
0x184e   :  { %11459 = vmatpush3.msra.mxu1 %v9991_v58 }
0x184f   :  { %11460 = vmatprep.subr.mxu1 %v9990_v61 }
0x1850   :  { %11461 = vmatpush3.msra.mxu1 %v9990_v61 }
0x1851   :  { %11462 = vmatprep.subr.mxu1 %v9989_v62 }
0x1852   :  { %11463 = vmatpush3.msra.mxu1 %v9989_v62 }
0x1853   :  { %11465 = vmatmul.mubr.msk.f32.vlgmr.msra.gmra.mxu1 %vm45_vm0, %v12992_v8  ;;  %11478 = vmatprep.subr.mxu1 %v11900_v14 }
0x1854   :  { %11480 = vmatprep.mubr.msk.f32.mxu1 %vm11901_vm1, %v11900_v14 }
0x1903   :  { %v5896_v1 = vpop.f32.mrf.mxu0 }
0x1904   :  { %v5977_v16 = vrot.slane %v5896_v1, 7  ;;  %v10014_v1 = vld [vmem:[%s13969_s2 + $0x260] sm:$0xff] }
0x1905   :  { %v11429_v11 = vpop.f32.mrf.mxu0 }
0x1906   :  { %v10013_v11 = vld [vmem:[%s13969_s2 + $0x258] sm:$0xff] }
0x1907   :  { %v5969_v15 = vpop.f32.mrf.mxu1 }
0x1908   :  { %v5978_v17 = vrot.slane %v5969_v15, 6  ;;  %v10032_v15 = vld [vmem:[%s13969_s2 + $0x3b0] sm:$0xff] }
0x1909   :  { %v11434_v6 = vpop.f32.mrf.mxu1 }
0x190a   :  { %v5980_v2 = vsel %vm5979_vm3, %v5978_v17, %v5977_v16  ;;  %v10031_v16 = vld [vmem:[%s13969_s2 + $0x3a8] sm:$0xff]  ;;  %v10030_v17 = vld [vmem:[%s13969_s2 + $0x3a0] sm:$0xff]  ;;  %v10029_v6 = vld [vmem:[%s13969_s2 + $0x398] sm:$0xff] }
0x190b   :  { %11438 = vmatmul.mubr.msk.f32.vlgmr.msra.gmra.mxu0 %vm297_vm2, %v5980_v2  ;;  %v13164_v9 = vpop.f32.mrf.mxu1  ;;  %v10011_v2 = vld [vmem:[%s13972_s3 + $0x30] sm:$0xff] }
0x190c   :  { %11446 = vmatpush3.msra.mxu0 %v9984_v44  ;;  %11453 = vmatprep.mubr.msk.f32.mxu0 %vm45_vm0, %v12986_v45  ;;  %v10015_v44 = vld [vmem:[%s13969_s2 + $0x268] sm:$0xff] }
0x190d   :  { %11447 = vmatprep.subr.mxu0 %v9983_v4  ;;  %v11444_v7 = vpop.f32.mrf.mxu1 }
0x190e   :  { %11448 = vmatpush3.msra.mxu0 %v9983_v4  ;;  %v10024_v4 = vld [vmem:[%s13969_s2 + $0x310] sm:$0xff] }
0x190f   :  { %11449 = vmatprep.subr.mxu0 %v9982_v63 }
0x1910   :  { %11450 = vmatpush3.msra.mxu0 %v9982_v63 }
0x1911   :  { %11451 = vmatprep.subr.mxu0 %v9981_v46 }
0x1912   :  { %11452 = vmatpush3.msra.mxu0 %v9981_v46 }
0x1913   :  { %11454 = vmatmul.mubr.msk.f32.vlgmr.msra.gmra.mxu0 %vm45_vm0, %v12992_v8  ;;  %v11466_v47 = vpop.f32.mrf.mxu1  ;;  %11467 = vmatprep.subr.mxu0 %v10000_v18 }
0x1914   :  { %v6297_v10 = vadd.f32 %v11466_v47, %v9994_v13  ;;  %11468 = vmatpush3.msra.mxu0 %v10000_v18  ;;  %11475 = vmatprep.mubr.msk.f32.mxu0 %vm45_vm0, %v12986_v45 }
0x1915   :  { %v6291_v0 = vpop.f32.mrf.mxu1  ;;  %11469 = vmatprep.subr.mxu0 %v9999_v3 }
0x1916   :  { %v6292_v20 = vadd.f32 %v9994_v13, %v6291_v0  ;;  %11470 = vmatpush3.msra.mxu0 %v9999_v3  ;;  %v10021_v0 = vld [vmem:[%s13969_s2 + $0x2f8] sm:$0xff] }
0x1917   :  { %11471 = vmatprep.subr.mxu0 %v9998_v19 }
0x1918   :  { %11472 = vmatpush3.msra.mxu0 %v9998_v19  ;;  %11479 = vmatpush3.xpose.msk.msra.mxu1 %vm297_vm2, %v6292_v20  ;;  %v10022_v19 = vld [vmem:[%s13969_s2 + $0x300] sm:$0xff] }
0x1919   :  { %11473 = vmatprep.subr.mxu0 %v9997_v21  ;;  %11483 = vmatprep.subr.mxu1 %v11900_v14 }
0x191a   :  { %11474 = vmatpush3.msra.mxu0 %v9997_v21 }
0x191b   :  { %11476 = vmatmul.mubr.msk.f32.vlgmr.msra.gmra.mxu0 %vm45_vm0, %v12992_v8  ;;  %11488 = vmatprep.subr.mxu0 %v11900_v14 }
0x191c   :  { %11490 = vmatprep.mubr.msk.f32.mxu0 %vm11901_vm1, %v11900_v14 }
0x19cb   :  { %v13200_v49 = vpop.f32.mrf.mxu0 }
0x19cd   :  { %v11439_v22 = vpop.f32.mrf.mxu0 }
0x19ce   :  { %v10034_v22 = vld [vmem:[%s13969_s2 + $0x3b8] ss:$0 sm:$0xff] }
0x19d3   :  { %v11455_v23 = vpop.f32.mrf.mxu0 }
0x19d4   :  { %v6212_v29 = vadd.f32 %v11455_v23, %v9986_v27 }
0x19d5   :  { %v6206_v43 = vpop.f32.mrf.mxu0 }
0x19d6   :  { %v6207_v26 = vadd.f32 %v9986_v27, %v6206_v43 }
0x19d8   :  { %11481 = vmatmul.mubr.msk.f32.vlgmr.msra.gmra.mxu1 %vm297_vm2, %v6207_v26 }
0x19d9   :  { %11484 = vmatpush3.xpose.msk.msra.mxu1 %vm297_vm2, %v6297_v10  ;;  %11485 = vmatprep.mubr.msk.f32.mxu1 %vm11901_vm1, %v11900_v14  ;;  %v10023_v10 = vld [vmem:[%s13969_s2 + $0x308] sm:$0xff] }
0x19da   :  { %11493 = vmatprep.subr.mxu1 %v11900_v14 }
0x19db   :  { %v11477_v25 = vpop.f32.mrf.mxu0 }
0x19dc   :  { %v6382_v31 = vadd.f32 %v11477_v25, %v10002_v24  ;;  %11486 = vmatmul.mubr.msk.f32.vlgmr.msra.gmra.mxu1 %vm297_vm2, %v6212_v29 }
0x19dd   :  { %v6376_v28 = vpop.f32.mrf.mxu0  ;;  %11495 = vmatprep.mubr.msk.f32.mxu1 %vm11901_vm1, %v11900_v14 }
0x19de   :  { %v6377_v30 = vadd.f32 %v10002_v24, %v6376_v28  ;;  %11494 = vmatpush3.msra.mxu1 %v6382_v31  ;;  %v6127_v24 = vadd.f32 %v13164_v9, %v13200_v49 }
0x19df   :  { %11503 = vmatprep.subr.mxu1 %v10016_v55 }
0x19e0   :  { %11489 = vmatpush3.msra.mxu0 %v6377_v30  ;;  %v10026_v30 = vld [vmem:[%s13969_s2 + $0x318] ss:$0 sm:$0xff] }
0x19e1   :  { %11498 = vmatprep.subr.mxu0 %v11900_v14 }
0x1a98   :  { %v6457_v32 = vpop.f32.mrf.mxu1 }
0x1a99   :  { %v6537_v33 = vmul.f32 0.35355338, %v6457_v32 }
0x1a9a   :  { %v11482_v34 = vpop.f32.mrf.mxu1 }
0x1a9b   :  { %v6539_v35 = vsel %vm297_vm2, %v6537_v33, -inf  ;;  %v10018_v34 = vld [vmem:[%s13969_s2 + $0x278] ss:$0 sm:$0xff] }
0x1a9c   :  { %6540 = vmax.xlane.f32.xlu0 %v6539_v35  ;;  %v6533_v36 = vpop.f32.mrf.mxu1 }
0x1a9d   :  { %v6538_v38 = vmul.f32 0.35355338, %v6533_v36 }
0x1a9e   :  { %v11487_v39 = vpop.f32.mrf.mxu1 }
0x1a9f   :  { %v6542_v40 = vsel %vm297_vm2, %v6538_v38, -inf }
0x1aa0   :  { %6543 = vmax.xlane.f32.xlu1 %v6542_v40 }
0x1b25   :  { %v6541_v41 = vpop.xlane.xlu0 %6540 }
0x1b26   :  { %v6545_v42 = vsub.f32 %v6537_v33, %v6541_v41 }
0x1b28   :  { %v6547_v48 = vmul.f32 1.442695, %v6545_v42 }
0x1b29   :  { %v6544_v50 = vpop.xlane.xlu1 %6543 }
0x1b2a   :  { %11876 = vpow2.f32 %v6547_v48  ;;  %v6546_v60 = vsub.f32 %v6538_v38, %v6544_v50 }
0x1b2c   :  { %v6549_v51 = vmul.f32 1.442695, %v6546_v60 }
0x1b2e   :  { %11878 = vpow2.f32 %v6549_v51 }
0x1b37   :  { %v11877_v59 = vpop.eup %11876 }
0x1b38   :  { %v6551_v52 = vsel %vm297_vm2, %v11877_v59, 0.0 }
0x1b39   :  { %6552 = vadd.xlane.f32.xlu0 %v6551_v52 }
0x1b3b   :  { %v11879_v53 = vpop.eup %11878 }
0x1b3c   :  { %v6554_v54 = vsel %vm297_vm2, %v11879_v53, 0.0 }
0x1b3d   :  { %6555 = vadd.xlane.f32.xlu1 %v6554_v54 }
0x1bc2   :  { %v6553_v56 = vpop.xlane.xlu0 %6552 }
0x1bc3   :  { %11880 = vrcp.f32 %v6553_v56 }
0x1bc6   :  { %v6556_v57 = vpop.xlane.xlu1 %6555 }
0x1bc7   :  { %11882 = vrcp.f32 %v6556_v57 }
0x1bd0   :  { %v11881_v58 = vpop.eup %11880 }
0x1bd1   :  { %v6559_v61 = vmul.f32 %v11881_v58, %v11877_v59 }
0x1bd3   :  { %11491 = vmatmul.mubr.msk.f32.vlgmr.msra.gmra.mxu0 %vm297_vm2, %v6559_v61 }
0x1bd4   :  { %v11883_v62 = vpop.eup %11882  ;;  %11500 = vmatprep.mubr.msk.f32.mxu0 %vm11901_vm1, %v11900_v14  ;;  %11499 = vmatpush3.msra.mxu0 %v10011_v2 }
0x1bd5   :  { %v6560_v5 = vmul.f32 %v11883_v62, %v11879_v53  ;;  %11514 = vmatprep.subr.mxu0 %v10024_v4 }
0x1bd7   :  { %11496 = vmatmul.mubr.msk.f32.vlgmr.msra.gmra.mxu1 %vm297_vm2, %v6560_v5 }
0x1bd8   :  { %11504 = vmatpush3.msra.mxu1 %v10016_v55  ;;  %11511 = vmatprep.mubr.msk.f32.mxu1 %vm45_vm0, %v12986_v45 }
0x1bd9   :  { %11505 = vmatprep.subr.mxu1 %v10015_v44 }
0x1bda   :  { %11506 = vmatpush3.msra.mxu1 %v10015_v44 }
0x1bdb   :  { %11507 = vmatprep.subr.mxu1 %v10014_v1 }
0x1bdc   :  { %11508 = vmatpush3.msra.mxu1 %v10014_v1 }
0x1bdd   :  { %11509 = vmatprep.subr.mxu1 %v10013_v11 }
0x1bde   :  { %11510 = vmatpush3.msra.mxu1 %v10013_v11 }
0x1bdf   :  { %11512 = vmatmul.mubr.msk.f32.vlgmr.msra.gmra.mxu1 %vm45_vm0, %v12992_v8  ;;  %11525 = vmatprep.subr.mxu1 %v10032_v15 }
0x1be0   :  { %11526 = vmatpush3.msra.mxu1 %v10032_v15  ;;  %11533 = vmatprep.mubr.msk.f32.mxu1 %vm45_vm0, %v12986_v45  ;;  %v10043_v15 = vld [vmem:[%s13972_s3 + $0x38] sm:$0xff] }
0x1be1   :  { %11527 = vmatprep.subr.mxu1 %v10031_v16 }
0x1be2   :  { %11528 = vmatpush3.msra.mxu1 %v10031_v16 }
0x1be3   :  { %11529 = vmatprep.subr.mxu1 %v10030_v17 }
0x1be4   :  { %11530 = vmatpush3.msra.mxu1 %v10030_v17 }
0x1be5   :  { %11531 = vmatprep.subr.mxu1 %v10029_v6 }
0x1be6   :  { %11532 = vmatpush3.msra.mxu1 %v10029_v6 }
0x1be7   :  { %11534 = vmatmul.mubr.msk.f32.vlgmr.msra.gmra.mxu1 %vm45_vm0, %v12992_v8  ;;  %11546 = vmatprep.subr.mxu1 %v11900_v14 }
0x1be8   :  { %11548 = vmatprep.mubr.msk.f32.mxu1 %vm11901_vm1, %v11900_v14 }
0x1c93   :  { %v6630_v63 = vpop.f32.mrf.mxu0 }
0x1c94   :  { %v6711_v18 = vrot.slane %v6630_v63, 7 }
0x1c95   :  { %v11492_v7 = vpop.f32.mrf.mxu0 }
0x1c97   :  { %v6703_v46 = vpop.f32.mrf.mxu1 }
0x1c98   :  { %v6712_v13 = vrot.slane %v6703_v46, 6 }
0x1c99   :  { %v11497_v3 = vpop.f32.mrf.mxu1 }
0x1c9a   :  { %v6713_v47 = vsel %vm5979_vm3, %v6712_v13, %v6711_v18 }
0x1c9b   :  { %11501 = vmatmul.mubr.msk.f32.vlgmr.msra.gmra.mxu0 %vm297_vm2, %v6713_v47 }
0x1c9c   :  { %11515 = vmatpush3.msra.mxu0 %v10024_v4  ;;  %11522 = vmatprep.mubr.msk.f32.mxu0 %vm45_vm0, %v12986_v45 }
0x1c9d   :  { %11516 = vmatprep.subr.mxu0 %v10023_v10 }
0x1c9e   :  { %11517 = vmatpush3.msra.mxu0 %v10023_v10 }
0x1c9f   :  { %11518 = vmatprep.subr.mxu0 %v10022_v19  ;;  %v11513_v20 = vpop.f32.mrf.mxu1 }
0x1ca0   :  { %11519 = vmatpush3.msra.mxu0 %v10022_v19  ;;  %v6869_v49 = vadd.f32 %v11513_v20, %v10018_v34 }
0x1ca1   :  { %11520 = vmatprep.subr.mxu0 %v10021_v0  ;;  %v6863_v21 = vpop.f32.mrf.mxu1 }
0x1ca2   :  { %11521 = vmatpush3.msra.mxu0 %v10021_v0  ;;  %v6864_v35 = vadd.f32 %v10018_v34, %v6863_v21  ;;  %v10065_v34 = vld [vmem:[%s13973_s4 + $0x1c8] sm:$0xff] }
0x1ca3   :  { %11523 = vmatmul.mubr.msk.f32.vlgmr.msra.gmra.mxu0 %vm45_vm0, %v12992_v8  ;;  %11536 = vmatprep.subr.mxu0 %v11900_v14 }
0x1ca4   :  { %11538 = vmatprep.mubr.msk.f32.mxu0 %vm11901_vm1, %v11900_v14 }
0x1ca7   :  { %v11535_v23 = vpop.f32.mrf.mxu1 }
0x1ca8   :  { %v7039_v27 = vadd.f32 %v11535_v23, %v10034_v22 }
0x1ca9   :  { %v7033_v43 = vpop.f32.mrf.mxu1 }
0x1caa   :  { %v7034_v26 = vadd.f32 %v10034_v22, %v7033_v43 }
0x1cac   :  { %11547 = vmatpush3.msra.mxu1 %v7034_v26 }
0x1cad   :  { %11556 = vmatprep.subr.mxu1 %v11900_v14 }
0x1d5b   :  { %v6782_v29 = vpop.f32.mrf.mxu0 }
0x1d5c   :  { %v13290_v25 = vadd.f32 %v6782_v29, %v6127_v24 }
0x1d5d   :  { %v11502_v31 = vpop.f32.mrf.mxu0 }
0x1d63   :  { %v11524_v28 = vpop.f32.mrf.mxu0 }
0x1d64   :  { %v6954_v9 = vadd.f32 %v11524_v28, %v10026_v30 }
0x1d65   :  { %v6948_v32 = vpop.f32.mrf.mxu0 }
0x1d66   :  { %v6949_v33 = vadd.f32 %v10026_v30, %v6948_v32  ;;  %v10064_v32 = vld [vmem:[%s13973_s4 + $0x1c0] sm:$0xff] }
0x1d68   :  { %11537 = vmatpush3.xpose.msk.msra.mxu0 %vm297_vm2, %v6949_v33  ;;  %v10072_v33 = vld [vmem:[%s13973_s4 + $0x200] sm:$0xff] }
0x1d69   :  { %11541 = vmatprep.subr.mxu0 %v11900_v14 }
0x1d6b   :  { %11539 = vmatmul.mubr.msk.f32.vlgmr.msra.gmra.mxu0 %vm297_vm2, %v6864_v35  ;;  %v10105_v35 = vcombine.high %v10064_v32, %v10072_v33 }
0x1d6c   :  { %11542 = vmatpush3.xpose.msk.msra.mxu0 %vm297_vm2, %v6954_v9  ;;  %11543 = vmatprep.mubr.msk.f32.mxu0 %vm11901_vm1, %v11900_v14  ;;  %v10073_v9 = vld [vmem:[%s13973_s4 + $0x208] sm:$0xff] }
0x1d6d   :  { %11551 = vmatprep.subr.mxu0 %v11900_v14 }
0x1d6f   :  { %11544 = vmatmul.mubr.msk.f32.vlgmr.msra.gmra.mxu0 %vm297_vm2, %v6869_v49  ;;  %v10104_v49 = vcombine.low %v10064_v32, %v10072_v33  ;;  %v10052_v33 = vld [vmem:[%s13973_s4 + $0x160] sm:$0xff] }
0x1d70   :  { %11552 = vmatpush3.msra.mxu0 %v7039_v27  ;;  %11553 = vmatprep.mubr.msk.f32.mxu0 %vm11901_vm1, %v11900_v14 }
0x1d71   :  { %7822 = vmatprep.subr.bf16.mxu0 %v10105_v35  ;;  %v10053_v35 = vld [vmem:[%s13973_s4 + $0x168] sm:$0xff] }
0x1e2b   :  { %v7114_v36 = vpop.f32.mrf.mxu0 }
0x1e2c   :  { %v7194_v38 = vmul.f32 0.35355338, %v7114_v36  ;;  %v10106_v36 = vcombine.low %v10065_v34, %v10073_v9 }
0x1e2d   :  { %v11540_v39 = vpop.f32.mrf.mxu0 }
0x1e2e   :  { %v7196_v40 = vsel %vm297_vm2, %v7194_v38, -inf  ;;  %v10048_v39 = vld [vmem:[%s13973_s4 + $0x140] sm:$0xff] }
0x1e2f   :  { %7197 = vmax.xlane.f32.xlu0 %v7196_v40  ;;  %v7190_v41 = vpop.f32.mrf.mxu0  ;;  %v10056_v40 = vld [vmem:[%s13973_s4 + $0x180] sm:$0xff] }
0x1e30   :  { %v7195_v42 = vmul.f32 0.35355338, %v7190_v41  ;;  %v10049_v41 = vld [vmem:[%s13973_s4 + $0x148] sm:$0xff] }
0x1e31   :  { %v11545_v48 = vpop.f32.mrf.mxu0 }
0x1e32   :  { %v7199_v50 = vsel %vm297_vm2, %v7195_v42, -inf  ;;  %v10057_v48 = vld [vmem:[%s13973_s4 + $0x188] sm:$0xff] }
0x1e33   :  { %7200 = vmax.xlane.f32.xlu1 %v7199_v50  ;;  %v10088_v50 = vcombine.low %v10048_v39, %v10056_v40 }
0x1eb8   :  { %v7198_v60 = vpop.xlane.xlu0 %7197 }
0x1eb9   :  { %v7202_v51 = vsub.f32 %v7194_v38, %v7198_v60  ;;  %v10107_v38 = vcombine.high %v10065_v34, %v10073_v9  ;;  %v10090_v60 = vcombine.low %v10049_v41, %v10057_v48  ;;  %v10060_v34 = vld [vmem:[%s13973_s4 + $0x1a0] sm:$0xff]  ;;  %v10061_v9 = vld [vmem:[%s13973_s4 + $0x1a8] sm:$0xff] }
0x1ebb   :  { %v7204_v59 = vmul.f32 1.442695, %v7202_v51  ;;  %v10091_v51 = vcombine.high %v10049_v41, %v10057_v48  ;;  %v10078_v41 = vld [vmem:[%s13973_s4 + $0x230] sm:$0xff]  ;;  %v10079_v48 = vld [vmem:[%s13973_s4 + $0x238] sm:$0xff] }
0x1ebc   :  { %v7201_v52 = vpop.xlane.xlu1 %7200 }
0x1ebd   :  { %11884 = vpow2.f32 %v7204_v59  ;;  %v7203_v53 = vsub.f32 %v7195_v42, %v7201_v52  ;;  %v10089_v42 = vcombine.high %v10048_v39, %v10056_v40  ;;  %v10066_v59 = vld [vmem:[%s13973_s4 + $0x1d0] sm:$0xff]  ;;  %v10099_v39 = vcombine.high %v10053_v35, %v10061_v9 }
0x1ebe   :  { %v10074_v52 = vld [vmem:[%s13973_s4 + $0x210] sm:$0xff] }
0x1ebf   :  { %v7206_v54 = vmul.f32 1.442695, %v7203_v53  ;;  %v10067_v53 = vld [vmem:[%s13973_s4 + $0x1d8] sm:$0xff]  ;;  %v10070_v40 = vld [vmem:[%s13973_s4 + $0x1f0] sm:$0xff] }
0x1ec1   :  { %11886 = vpow2.f32 %v7206_v54  ;;  %v10109_v54 = vcombine.high %v10066_v59, %v10074_v52 }
0x1eca   :  { %v11885_v55 = vpop.eup %11884 }
0x1ecb   :  { %v7208_v56 = vsel %vm297_vm2, %v11885_v55, 0.0 }
0x1ecc   :  { %7209 = vadd.xlane.f32.xlu0 %v7208_v56  ;;  %v10108_v56 = vcombine.low %v10066_v59, %v10074_v52  ;;  %v10054_v52 = vld [vmem:[%s13973_s4 + $0x170] sm:$0xff] }
0x1ece   :  { %v11887_v57 = vpop.eup %11886 }
0x1ecf   :  { %v7211_v58 = vsel %vm297_vm2, %v11887_v57, 0.0 }
0x1ed0   :  { %7212 = vadd.xlane.f32.xlu1 %v7211_v58 }
0x1f55   :  { %v7210_v61 = vpop.xlane.xlu0 %7209 }
0x1f56   :  { %11888 = vrcp.f32 %v7210_v61 }
0x1f59   :  { %v7213_v62 = vpop.xlane.xlu1 %7212 }
0x1f5a   :  { %11890 = vrcp.f32 %v7213_v62 }
0x1f63   :  { %v11889_v5 = vpop.eup %11888 }
0x1f64   :  { %v7216_v44 = vmul.f32 %v11889_v5, %v11885_v55  ;;  %v10075_v55 = vld [vmem:[%s13973_s4 + $0x218] sm:$0xff] }
0x1f65   :  { %v10111_v58 = vcombine.high %v10067_v53, %v10075_v55 }
0x1f66   :  { %11549 = vmatmul.mubr.msk.f32.vlgmr.msra.gmra.mxu1 %vm297_vm2, %v7216_v44 }
0x1f67   :  { %v11891_v1 = vpop.eup %11890  ;;  %11558 = vmatprep.mubr.msk.f32.mxu1 %vm11901_vm1, %v11900_v14  ;;  %11557 = vmatpush3.msra.mxu1 %v10043_v15  ;;  %v10045_v14 = vld [vmem:[%s13971_s1 + $0x16] ss:$0 sm:$0xff] }
0x1f68   :  { %v7217_v11 = vmul.f32 %v11891_v1, %v11887_v57  ;;  %7863 = vmatprep.subr.bf16.mxu1 %v10107_v38  ;;  %v10110_v57 = vcombine.low %v10067_v53, %v10075_v55  ;;  %v10097_v38 = vcombine.high %v10052_v33, %v10060_v34  ;;  %v10062_v53 = vld [vmem:[%s13973_s4 + $0x1b0] sm:$0xff]  ;;  %v10063_v55 = vld [vmem:[%s13973_s4 + $0x1b8] sm:$0xff] }
0x1f6a   :  { %11554 = vmatmul.mubr.msk.f32.vlgmr.msra.gmra.mxu0 %vm297_vm2, %v7217_v11 }
0x1f6b   :  { %7842 = vmatprep.mubr.bf16.mxu0 %v11902_v37  ;;  %7823 = vmatpush1.bf16.msra.mxu0 %v10104_v49 }
0x1f6c   :  { %7824 = vmatprep.subr.bf16.mxu0 %v10089_v42  ;;  %v10071_v42 = vld [vmem:[%s13973_s4 + $0x1f8] sm:$0xff] }
0x1f6d   :  { %v10119_v59 = vcombine.high %v10071_v42, %v10079_v48 }
0x1f6f   :  { %7825 = vmatpush1.bf16.msra.mxu0 %v10088_v50  ;;  %v10096_v50 = vcombine.low %v10052_v33, %v10060_v34  ;;  %v10081_v33 = vld [vmem:[%s13973_s4 + $0x248] sm:$0x11] }
0x1f70   :  { %7904 = vmatprep.subr.bf16.mxu0 %v10109_v54  ;;  %v10055_v54 = vld [vmem:[%s13973_s4 + $0x178] sm:$0xff] }
0x2026   :  { %v7287_v16 = vpop.f32.mrf.mxu1 }
0x2027   :  { %v7368_v2 = vrot.slane %v7287_v16, 7  ;;  %v10046_v16 = vld [vmem:[%s13971_s1 + $0x18] ss:$0 sm:$0xff] }
0x2028   :  { %v11550_v17 = vpop.f32.mrf.mxu1 }
0x202a   :  { %v7360_v6 = vpop.f32.mrf.mxu0 }
0x202b   :  { %v7369_v4 = vrot.slane %v7360_v6, 6 }
0x202c   :  { %v11555_v63 = vpop.f32.mrf.mxu0 }
0x202d   :  { %v7370_v7 = vsel %vm5979_vm3, %v7369_v4, %v7368_v2  ;;  %v10047_v2 = vld [vmem:[%s13971_s1 + $0x19] ss:$0 sm:$0xff] }
0x202e   :  { %11559 = vmatmul.mubr.msk.f32.vlgmr.msra.gmra.mxu1 %vm297_vm2, %v7370_v7 }
0x202f   :  { %7883 = vmatprep.mubr.bf16.mxu1 %v11902_v37  ;;  %7864 = vmatpush1.bf16.msra.mxu1 %v10106_v36 }
0x2030   :  { %7865 = vmatprep.subr.bf16.mxu1 %v10091_v51  ;;  %v10117_v51 = vcombine.high %v10070_v40, %v10078_v41 }
0x2033   :  { %7866 = vmatpush1.bf16.msra.mxu1 %v10090_v60  ;;  %v10098_v60 = vcombine.low %v10053_v35, %v10061_v9  ;;  %v7559_v35 = vunpack.c.l.bf16 %v10081_v33 }
0x2034   :  { %7945 = vmatprep.subr.bf16.mxu1 %v10111_v58  ;;  %v10101_v58 = vcombine.high %v10054_v52, %v10062_v53 }
0x20ee   :  { %v7439_v46 = vpop.f32.mrf.mxu1 }
0x20ef   :  { %v7443_v18 = vadd.f32 %v7439_v46, %v13290_v25 }
0x20f0   :  { %v11560_v13 = vpop.f32.mrf.mxu1 }
0x20f1   :  { %v7448_v3 = vadd.f32 %v10045_v14, %v7443_v18 }
0x20f3   :  { %v7451_v47 = vrot.slane %v7448_v3, 2  ;;  %v7450_v10 = vrot.slane %v7448_v3, 1 }
0x20f5   :  { %v7454_v19 = vadd.f32 %v7450_v10, %v12986_v45  ;;  %v7455_v0 = vadd.f32 %v7451_v47, %v12992_v8 }
0x20f7   :  { %v7462_v20 = vsel %vm7461_vm4, %v7454_v19, 0.0  ;;  %v7458_v21 = vrot.slane %v7455_v0, 7 }
0x20f8   :  { %7463 = vadd.xlane.f32.xlu1 %v7462_v20 }
0x20f9   :  { %v7466_v22 = vsel %vm7465_vm5, %v7458_v21, 0.0  ;;  %v10058_v21 = vld [vmem:[%s13973_s4 + $0x190] sm:$0xff] }
0x20fa   :  { %7467 = vadd.xlane.f32.xlu0 %v7466_v22  ;;  %v10051_v22 = vld [vmem:[%s13973_s4 + $0x158] sm:$0xff] }
0x2181   :  { %v7464_v23 = vpop.xlane.xlu1 %7463 }
0x2182   :  { %v7469_v27 = vmul.f32 0.03125, %v7464_v23  ;;  %v10059_v23 = vld [vmem:[%s13973_s4 + $0x198] sm:$0xff] }
0x2183   :  { %v7468_v43 = vpop.xlane.xlu0 %7467 }
0x2184   :  { %v7476_v26 = vsub.f32 %v7454_v19, %v7469_v27  ;;  %v7470_v24 = vmul.f32 0.03125, %v7468_v43  ;;  %v10050_v19 = vld [vmem:[%s13973_s4 + $0x150] sm:$0xff] }
0x2186   :  { %v7473_v29 = vrot.slane %v7470_v24, 1  ;;  %v7478_v25 = vmul.f32 %v7476_v26, %v7476_v26  ;;  %v10095_v24 = vcombine.high %v10051_v22, %v10059_v23 }
0x2188   :  { %v7477_v31 = vsub.f32 %v7455_v0, %v7473_v29  ;;  %v7485_v45 = vsel %vm7461_vm4, %v7478_v25, 0.0  ;;  %v10068_v29 = vld [vmem:[%s13973_s4 + $0x1e0] sm:$0xff] }
0x2189   :  { %7486 = vadd.xlane.f32.xlu1 %v7485_v45  ;;  %v10076_v25 = vld [vmem:[%s13973_s4 + $0x220] sm:$0xff]  ;;  %v10077_v45 = vld [vmem:[%s13973_s4 + $0x228] sm:$0xff] }
0x218a   :  { %v7479_v8 = vmul.f32 %v7477_v31, %v7477_v31  ;;  %v10112_v49 = vcombine.low %v10068_v29, %v10076_v25 }
0x218c   :  { %v7482_v28 = vrot.slane %v7479_v8, 7  ;;  %v10092_v8 = vcombine.low %v10050_v19, %v10058_v21 }
0x218e   :  { %v7488_v30 = vsel %vm7465_vm5, %v7482_v28, 0.0  ;;  %v10094_v28 = vcombine.low %v10051_v22, %v10059_v23  ;;  %v11713_v22 = vld [vmem:[%s13974_s5 + $0x4d0] sm:$0xff]  }
0x218f   :  { %7489 = vadd.xlane.f32.xlu0 %v7488_v30  ;;  %v10113_v30 = vcombine.high %v10068_v29, %v10076_v25  ;;  %v11714_v23 = vld [vmem:[%s13974_s5 + $0x410] sm:$0xff]   ;;  %v11719_v29 = vld [vmem:[%s13974_s5 + $0x488] sm:$0xff]   ;;  %v11720_v25 = vld [vmem:[%s13974_s5 + $0x440] sm:$0xff]  }
0x2212   :  { %v7487_v61 = vpop.xlane.xlu1 %7486 }
0x2213   :  { %v7491_v62 = vmul.f32 0.03125, %v7487_v61  ;;  %v10103_v61 = vcombine.high %v10055_v54, %v10063_v55 }
0x2215   :  { %v7493_v5 = vadd.f32 1e-05, %v7491_v62  ;;  %v10100_v62 = vcombine.low %v10054_v52, %v10062_v53  ;;  %v13588_v52 = vld [vmem:[%s13973_s4 + $0x258] sm:$0x11] }
0x2217   :  { %11892 = vrsqrt.f32 %v7493_v5  ;;  %v10102_v5 = vcombine.low %v10055_v54, %v10063_v55 }
0x2218   :  { %v7490_v44 = vpop.xlane.xlu0 %7489 }
0x2219   :  { %v7492_v1 = vmul.f32 0.03125, %v7490_v44  ;;  %v11692_v44 = vld [vmem:[%s13974_s5 + $0x478] sm:$0xff]  }
0x221b   :  { %v7494_v11 = vadd.f32 1e-05, %v7492_v1  ;;  %v11693_v1 = vld [vmem:[%s13974_s5 + $0x4f8] sm:$0xff]  }
0x221d   :  { %11894 = vrsqrt.f32 %v7494_v11  ;;  %v11694_v11 = vld [vmem:[%s13974_s5 + $0x438] sm:$0xff]  }
0x2224   :  { %v11893_v15 = vpop.eup %11892 }
0x2225   :  { %v7502_v17 = vmul.f32 %v11893_v15, %v7476_v26  ;;  %v10093_v26 = vcombine.high %v10050_v19, %v10058_v21  ;;  %v11695_v15 = vld [vmem:[%s13974_s5 + $0x4b8] sm:$0xff]   ;;  %v11712_v21 = vld [vmem:[%s13974_s5 + $0x450] sm:$0xff]  }
0x2226   :  { %v11709_v19 = vld [vmem:[%s13974_s5 + $0x4d8] sm:$0xff]  }
0x2227   :  { %v7508_v6 = vmul.f32 %v10046_v16, %v7502_v17  ;;  %v11698_v17 = vld [vmem:[%s13974_s5 + $0x430] sm:$0xff]  }
0x2229   :  { %v13375_v7 = vadd.f32 %v10047_v2, %v7508_v6  ;;  %v11699_v6 = vld [vmem:[%s13974_s5 + $0x4b0] sm:$0xff]  }
0x222a   :  { %v11895_v4 = vpop.eup %11894 }
0x222b   :  { %v7499_v63 = vrot.slane %v11895_v4, 1  ;;  %v7573_v18 = vpack.c.bf16 %v13375_v7, %v13375_v7  ;;  %v11701_v4 = vld [vmem:[%s13974_s5 + $0x4e8] sm:$0xff]  }
0x222d   :  { %v7503_v14 = vmul.f32 %v7499_v63, %v7477_v31  ;;  %v7641_v47 = vunpack.c.l.b16 %v7573_v18  ;;  %v10069_v31 = vld [vmem:[%s13973_s4 + $0x1e8] sm:$0xff]  ;;  %v11705_v18 = vld [vmem:[%s13974_s5 + $0x4e0] sm:$0xff]  }
0x222e   :  { %v10115_v32 = vcombine.high %v10069_v31, %v10077_v45  ;;  %v10114_v36 = vcombine.low %v10069_v31, %v10077_v45  ;;  %v11702_v63 = vld [vmem:[%s13974_s5 + $0x428] sm:$0xff]   ;;  %v11721_v31 = vld [vmem:[%s13974_s5 + $0x4c0] sm:$0xff]  }
0x222f   :  { %v7509_v46 = vmul.f32 %v10046_v16, %v7503_v14  ;;  %v7643_v0 = vrot.slane %v7641_v47, 7  ;;  %v11696_v16 = vld [vmem:[%s13974_s5 + $0x470] sm:$0xff]   ;;  %v11703_v14 = vld [vmem:[%s13974_s5 + $0x4a8] sm:$0xff]   ;;  %v11707_v47 = vld [vmem:[%s13974_s5 + $0x4a0] sm:$0xff]  }
0x2230   :  { %v11722_v45 = vld [vmem:[%s13974_s5 + $0x400] sm:$0xff]  }
0x2231   :  { %v13379_v13 = vadd.f32 %v10047_v2, %v7509_v46  ;;  %v11700_v2 = vld [vmem:[%s13974_s5 + $0x468] sm:$0xff]   ;;  %v11704_v46 = vld [vmem:[%s13974_s5 + $0x460] sm:$0xff]  }
0x2233   :  { %v7574_v3 = vpack.c.bf16 %v13379_v13, %v13379_v13 }
0x2235   :  { %v7642_v10 = vunpack.c.l.b16 %v7574_v3  ;;  %v11706_v3 = vld [vmem:[%s13974_s5 + $0x420] sm:$0xff]  }
0x2237   :  { %v7644_v20 = vrot.slane %v7642_v10, 6  ;;  %v11708_v10 = vld [vmem:[%s13974_s5 + $0x458] sm:$0xff]  }
0x2239   :  { %v7645_v27 = vsel %vm5979_vm3, %v7644_v20, %v7643_v0  ;;  %v11710_v0 = vld [vmem:[%s13974_s5 + $0x418] sm:$0xff]  }
0x223a   :  { %v13396_v43 = vpack.c.b16 %v7645_v27, %v7645_v27  ;;  %v11711_v20 = vld [vmem:[%s13974_s5 + $0x498] sm:$0xff]   ;;  %v11715_v27 = vld [vmem:[%s13974_s5 + $0x490] sm:$0xff]  }
0x223c   :  { %10120 = vmatmul.mubr.msk.bf16.vlgmr.msra.gmra.mxu0 %vm45_vm0, %v13396_v43  ;;  %10121 = vmatmul.mubr.msk.bf16.vlgmr.msra.gmra.mxu1 %vm45_vm0, %v13396_v43 }
0x223d   :  { %7905 = vmatpush1.bf16.msra.mxu0 %v10108_v56  ;;  %7946 = vmatpush1.bf16.msra.mxu1 %v10110_v57  ;;  %v10116_v56 = vcombine.low %v10070_v40, %v10078_v41  ;;  %v10118_v57 = vcombine.low %v10071_v42, %v10079_v48 }
0x223e   :  { %7906 = vmatprep.subr.bf16.mxu0 %v10093_v26  ;;  %7947 = vmatprep.subr.bf16.mxu1 %v10095_v24  ;;  %v11717_v26 = vld [vmem:[%s13974_s5 + $0x4c8] sm:$0xff]  }
0x223f   :  { %7924 = vmatprep.mubr.bf16.mxu0 %v11902_v37  ;;  %7965 = vmatprep.mubr.bf16.mxu1 %v11902_v37  ;;  %v11718_v24 = vld [vmem:[%s13974_s5 + $0x408] sm:$0xff]  }
0x2241   :  { %7907 = vmatpush1.bf16.msra.mxu0 %v10092_v8  ;;  %7948 = vmatpush1.bf16.msra.mxu1 %v10094_v28  ;;  %v11723_v8 = vld [vmem:[%s13974_s5 + $0x480] sm:$0xff]   ;;  %v11724_v28 = vld [vmem:[%s13974_s5 + $0x578] sm:$0xff]  }
0x2242   :  { %7986 = vmatprep.subr.bf16.mxu0 %v10113_v30  ;;  %8027 = vmatprep.subr.bf16.mxu1 %v10115_v32  ;;  %v11725_v30 = vld [vmem:[%s13974_s5 + $0x5f8] sm:$0xff]   ;;  %v10080_v32 = vld [vmem:[%s13973_s4 + $0x240] sm:$0x11] }
0x2243   :  { %v7557_v34 = vunpack.c.l.bf16 %v10080_v32  ;;  %v7558_v9 = vunpack.c.h.bf16 %v10080_v32 }
0x2244   :  { %10122 = vmatmul.mubr.msk.bf16.vlgmr.msra.gmra.mxu0 %vm45_vm0, %v13396_v43  ;;  %10123 = vmatmul.mubr.msk.bf16.vlgmr.msra.gmra.mxu1 %vm45_vm0, %v13396_v43 }
0x2245   :  { %7987 = vmatpush1.bf16.msra.mxu0 %v10112_v49  ;;  %8028 = vmatpush1.bf16.msra.mxu1 %v10114_v36  ;;  %v7560_v49 = vunpack.c.h.bf16 %v10081_v33  ;;  %v7578_v36 = vrot.slane %v7557_v34, %v12565_v12  ;;  %v11736_v33 = vld [vmem:[%s13974_s5 + $0x560] sm:$0xff]  }
0x2246   :  { %7988 = vmatprep.subr.bf16.mxu0 %v10097_v38  ;;  %8029 = vmatprep.subr.bf16.mxu1 %v10099_v39  ;;  %v7586_v38 = vrot.slane %v7559_v35, %v12565_v12  ;;  %v7582_v39 = vrot.slane %v7558_v9, %v12565_v12  ;;  %v11737_v34 = vld [vmem:[%s13974_s5 + $0x5e0] sm:$0xff]  }
0x2247   :  { %8006 = vmatprep.mubr.bf16.mxu0 %v11902_v37  ;;  %8047 = vmatprep.mubr.bf16.mxu1 %v11902_v37  ;;  %v7590_v40 = vrot.slane %v7560_v49, %v12565_v12  ;;  %v11738_v49 = vld [vmem:[%s13974_s5 + $0x520] sm:$0xff]  }
0x2249   :  { %7989 = vmatpush1.bf16.msra.mxu0 %v10096_v50  ;;  %8030 = vmatpush1.bf16.msra.mxu1 %v10098_v60 }
0x224a   :  { %8068 = vmatprep.subr.bf16.mxu0 %v10117_v51  ;;  %8109 = vmatprep.subr.bf16.mxu1 %v10119_v59  ;;  %v13583_v59 = vld [vmem:[%s13973_s4 + $0x250] sm:$0x11] }
0x224b   :  { %v7562_v55 = vunpack.c.h.bf16 %v13583_v59 }
0x224c   :  { %10124 = vmatmul.mubr.msk.bf16.vlgmr.msra.gmra.mxu0 %vm45_vm0, %v13396_v43  ;;  %10125 = vmatmul.mubr.msk.bf16.vlgmr.msra.gmra.mxu1 %vm45_vm0, %v13396_v43 }
0x224d   :  { %8069 = vmatpush1.bf16.msra.mxu0 %v10116_v56  ;;  %8110 = vmatpush1.bf16.msra.mxu1 %v10118_v57  ;;  %v7564_v56 = vunpack.c.h.bf16 %v13588_v52 }
0x224e   :  { %8070 = vmatprep.subr.bf16.mxu0 %v10101_v58  ;;  %8111 = vmatprep.subr.bf16.mxu1 %v10103_v61 }
0x224f   :  { %8088 = vmatprep.mubr.bf16.mxu0 %v11902_v37  ;;  %8129 = vmatprep.mubr.bf16.mxu1 %v11902_v37  ;;  %v11697_v37 = vld [vmem:[%s13974_s5 + $0x4f0] sm:$0xff]  }
0x2251   :  { %8071 = vmatpush1.bf16.msra.mxu0 %v10100_v62  ;;  %8112 = vmatpush1.bf16.msra.mxu1 %v10102_v5 }
0x2252   :  { %10921 = vmatprep.subr.bf16.mxu0 %v11692_v44  ;;  %10943 = vmatprep.subr.bf16.mxu1 %v11693_v1 }
0x2254   :  { %10126 = vmatmul.mubr.msk.bf16.vlgmr.msra.gmra.mxu0 %vm45_vm0, %v13396_v43  ;;  %10127 = vmatmul.mubr.msk.bf16.vlgmr.msra.gmra.mxu1 %vm45_vm0, %v13396_v43  ;;  %v11716_v43 = vld [vmem:[%s13974_s5 + $0x448] sm:$0xff]  }
0x2255   :  { %10922 = vmatpush3.bf16.msra.mxu0 %v11694_v11  ;;  %10944 = vmatpush3.bf16.msra.mxu1 %v11695_v15 }
0x2256   :  { %10923 = vmatprep.subr.bf16.mxu0 %v11696_v16  ;;  %10945 = vmatprep.subr.bf16.mxu1 %v11697_v37  ;;  %v7598_v37 = vrot.slane %v7562_v55, %v12565_v12 }
0x2259   :  { %10924 = vmatpush3.bf16.msra.mxu0 %v11698_v17  ;;  %10946 = vmatpush3.bf16.msra.mxu1 %v11699_v6  ;;  %v7606_v17 = vrot.slane %v7564_v56, %v12565_v12  ;;  %v11726_v6 = vld [vmem:[%s13974_s5 + $0x538] sm:$0xff]  }
0x225a   :  { %10925 = vmatprep.subr.bf16.mxu0 %v11700_v2  ;;  %10947 = vmatprep.subr.bf16.mxu1 %v11701_v4  ;;  %v11727_v2 = vld [vmem:[%s13974_s5 + $0x5b8] sm:$0xff]  }
0x225d   :  { %10926 = vmatpush3.bf16.msra.mxu0 %v11702_v63  ;;  %10948 = vmatpush3.bf16.msra.mxu1 %v11703_v14 }
0x225e   :  { %10927 = vmatprep.subr.bf16.mxu0 %v11704_v46  ;;  %10949 = vmatprep.subr.bf16.mxu1 %v11705_v18  ;;  %v11728_v18 = vld [vmem:[%s13974_s5 + $0x570] sm:$0xff]  }
0x2261   :  { %10928 = vmatpush3.bf16.msra.mxu0 %v11706_v3  ;;  %10950 = vmatpush3.bf16.msra.mxu1 %v11707_v47  ;;  %v11729_v3 = vld [vmem:[%s13974_s5 + $0x5f0] sm:$0xff]  }
0x2262   :  { %10929 = vmatprep.subr.bf16.mxu0 %v11708_v10  ;;  %10951 = vmatprep.subr.bf16.mxu1 %v11709_v19 }
0x2265   :  { %10930 = vmatpush3.bf16.msra.mxu0 %v11710_v0  ;;  %10952 = vmatpush3.bf16.msra.mxu1 %v11711_v20  ;;  %v11730_v20 = vld [vmem:[%s13974_s5 + $0x530] sm:$0xff]  }
0x2266   :  { %10931 = vmatprep.subr.bf16.mxu0 %v11712_v21  ;;  %10953 = vmatprep.subr.bf16.mxu1 %v11713_v22  ;;  %v11731_v21 = vld [vmem:[%s13974_s5 + $0x5b0] sm:$0xff]  }
0x2269   :  { %10932 = vmatpush3.bf16.msra.mxu0 %v11714_v23  ;;  %10954 = vmatpush3.bf16.msra.mxu1 %v11715_v27  ;;  %v11732_v27 = vld [vmem:[%s13974_s5 + $0x568] sm:$0xff]  }
0x226a   :  { %10933 = vmatprep.subr.bf16.mxu0 %v11716_v43  ;;  %10955 = vmatprep.subr.bf16.mxu1 %v11717_v26  ;;  %v11733_v43 = vld [vmem:[%s13974_s5 + $0x5e8] sm:$0xff]  }
0x226d   :  { %10934 = vmatpush3.bf16.msra.mxu0 %v11718_v24  ;;  %10956 = vmatpush3.bf16.msra.mxu1 %v11719_v29 }
0x226e   :  { %10935 = vmatprep.subr.bf16.mxu0 %v11720_v25  ;;  %10957 = vmatprep.subr.bf16.mxu1 %v11721_v31 }
0x2271   :  { %10936 = vmatpush3.bf16.msra.mxu0 %v11722_v45  ;;  %10958 = vmatpush3.bf16.msra.mxu1 %v11723_v8  ;;  %v11734_v8 = vld [vmem:[%s13974_s5 + $0x528] sm:$0xff]  }
0x2272   :  { %10965 = vmatprep.subr.bf16.mxu0 %v11724_v28  ;;  %10987 = vmatprep.subr.bf16.mxu1 %v11725_v30  ;;  %v11735_v28 = vld [vmem:[%s13974_s5 + $0x5a8] sm:$0xff]  }
0x22fc   :  { %v7844_v41 = vpop.f32.mrf.mxu0  ;;  %v7885_v42 = vpop.f32.mrf.mxu1 }
0x22fd   :  { %v7845_v48 = vadd.f32 %v7844_v41, %v7578_v36  ;;  %v7886_v50 = vadd.f32 %v7885_v42, %v7586_v38  ;;  %v11739_v36 = vld [vmem:[%s13974_s5 + $0x5a0] sm:$0xff]   ;;  %v11741_v41 = vld [vmem:[%s13974_s5 + $0x5d8] sm:$0xff]  }
0x22fe   :  { %v7846_v60 = vpop.f32.mrf.mxu0  ;;  %v7887_v51 = vpop.f32.mrf.mxu1 }
0x22ff   :  { %v7847_v53 = vadd.f32 %v7846_v60, %v7582_v39  ;;  %v7888_v54 = vadd.f32 %v7887_v51, %v7590_v40  ;;  %v8138_v57 = vmax.f32 %v7845_v48, 0.0  ;;  %v8140_v58 = vmax.f32 %v7886_v50, 0.0  ;;  %v11740_v40 = vld [vmem:[%s13974_s5 + $0x558] sm:$0xff]  }
0x2300   :  { %v7848_v61 = vpop.f32.mrf.mxu0  ;;  %v7889_v62 = vpop.f32.mrf.mxu1  ;;  %v11742_v50 = vld [vmem:[%s13974_s5 + $0x518] sm:$0xff]   ;;  %v7561_v51 = vunpack.c.l.bf16 %v13583_v59  ;;  %v11745_v59 = vld [vmem:[%s13974_s5 + $0x5d0] sm:$0xff]  }
0x2301   :  { %v8139_v5 = vmax.f32 %v7847_v53, 0.0  ;;  %v8141_v44 = vmax.f32 %v7888_v54, 0.0  ;;  %v8154_v4 = vpack.c.bf16 %v8138_v57, %v8138_v57  ;;  %v8156_v63 = vpack.c.bf16 %v8140_v58, %v8140_v58  ;;  %v11743_v60 = vld [vmem:[%s13974_s5 + $0x598] sm:$0xff]   ;;  %v13661_v54 = vld [vmem:[%s13973_s4 + $0x260] sm:$0x11]  ;;  %v11744_v57 = vld [vmem:[%s13974_s5 + $0x550] sm:$0xff]  }
0x2302   :  { %v7849_v1 = vpop.f32.mrf.mxu0  ;;  %v7890_v11 = vpop.f32.mrf.mxu1  ;;  %v7563_v53 = vunpack.c.l.bf16 %v13588_v52  ;;  %v13676_v52 = vld [vmem:[%s13973_s4 + $0x268] sm:$0x11]  ;;  %v7566_v58 = vunpack.c.h.bf16 %v13661_v54 }
0x2303   :  { %v8155_v15 = vpack.c.bf16 %v8139_v5, %v8139_v5  ;;  %v8157_v16 = vpack.c.bf16 %v8141_v44, %v8141_v44  ;;  %v7568_v61 = vunpack.c.h.bf16 %v13676_v52  ;;  %v11746_v44 = vld [vmem:[%s13974_s5 + $0x510] sm:$0xff]   ;;  %v7594_v11 = vrot.slane %v7561_v51, %v12565_v12  ;;  %v11773_v51 = vld [vmem:[%s13974_s5 + $0x6d8] sm:$0xff]  }
0x2304   :  { %v13600_v14 = vpop.f32.mrf.mxu0  ;;  %v13602_v46 = vpop.f32.mrf.mxu1  ;;  %v11747_v1 = vld [vmem:[%s13974_s5 + $0x590] sm:$0xff]  }
0x2305   :  { %9231 = vmatprep.mubr.bf16.mxu0 %v8155_v15  ;;  %9271 = vmatprep.mubr.bf16.mxu1 %v8157_v16  ;;  %v7602_v15 = vrot.slane %v7563_v53, %v12565_v12  ;;  %v11774_v53 = vld [vmem:[%s13974_s5 + $0x618] sm:$0xff]  }
0x2306   :  { %v7928_v47 = vpop.f32.mrf.mxu0  ;;  %v7969_v10 = vpop.f32.mrf.mxu1  ;;  %9232 = vmatmul.mubr.bf16.vlgmr.msra.gmra.mxu0 %v8154_v4  ;;  %9272 = vmatmul.mubr.bf16.vlgmr.msra.gmra.mxu1 %v8156_v63  ;;  %v7622_v4 = vrot.slane %v7568_v61, %v12565_v12  ;;  %v7567_v61 = vunpack.c.l.bf16 %v13676_v52  ;;  %v11778_v52 = vld [vmem:[%s13974_s5 + $0x610] sm:$0xff]  }
0x2307   :  { %v7929_v19 = vadd.f32 %v7928_v47, %v7598_v37  ;;  %v7970_v0 = vadd.f32 %v7969_v10, %v7606_v17  ;;  %10966 = vmatpush3.bf16.msra.mxu0 %v11726_v6  ;;  %10988 = vmatpush3.bf16.msra.mxu1 %v11727_v2  ;;  %v11748_v17 = vld [vmem:[%s13974_s5 + $0x548] sm:$0xff]   ;;  %v7614_v2 = vrot.slane %v7566_v58, %v12565_v12  ;;  %v11776_v58 = vld [vmem:[%s13974_s5 + $0x650] sm:$0xff]  }
0x2308   :  { %v7930_v22 = vpop.f32.mrf.mxu0  ;;  %v7971_v23 = vpop.f32.mrf.mxu1  ;;  %10967 = vmatprep.subr.bf16.mxu0 %v11728_v18  ;;  %10989 = vmatprep.subr.bf16.mxu1 %v11729_v3  ;;  %v11749_v6 = vld [vmem:[%s13974_s5 + $0x5c8] sm:$0xff]   ;;  %v7927_v10 = vadd.f32 %v13600_v14, %v7594_v11  ;;  %v11754_v14 = vld [vmem:[%s13974_s5 + $0x500] sm:$0xff]  }
0x2309   :  { %v8143_v26 = vmax.f32 %v7929_v19, 0.0  ;;  %v8145_v24 = vmax.f32 %v7970_v0, 0.0  ;;  %v11750_v3 = vld [vmem:[%s13974_s5 + $0x508] sm:$0xff]   ;;  %v7968_v19 = vadd.f32 %v13602_v46, %v7602_v15  ;;  %v11752_v0 = vld [vmem:[%s13974_s5 + $0x540] sm:$0xff]  }
0x230a   :  { %v7931_v29 = vpop.f32.mrf.mxu0  ;;  %v7972_v25 = vpop.f32.mrf.mxu1  ;;  %v11751_v47 = vld [vmem:[%s13974_s5 + $0x588] sm:$0xff]   ;;  %v11755_v46 = vld [vmem:[%s13974_s5 + $0x580] sm:$0xff]   ;;  %v8142_v23 = vmax.f32 %v7927_v10, 0.0 }
0x230b   :  { %v8159_v31 = vpack.c.bf16 %v8143_v26, %v8143_v26  ;;  %v8161_v45 = vpack.c.bf16 %v8145_v24, %v8145_v24  ;;  %10968 = vmatpush3.bf16.msra.mxu0 %v11730_v20  ;;  %10990 = vmatpush3.bf16.msra.mxu1 %v11731_v21  ;;  %v11753_v20 = vld [vmem:[%s13974_s5 + $0x5c0] sm:$0xff]   ;;  %v11757_v26 = vld [vmem:[%s13974_s5 + $0x6f8] sm:$0xff]  }
0x230c   :  { %v13628_v30 = vpop.f32.mrf.mxu0  ;;  %v13630_v32 = vpop.f32.mrf.mxu1  ;;  %10969 = vmatprep.subr.bf16.mxu0 %v11732_v27  ;;  %10991 = vmatprep.subr.bf16.mxu1 %v11733_v43  ;;  %v8144_v27 = vmax.f32 %v7968_v19, 0.0  ;;  %v11756_v43 = vld [vmem:[%s13974_s5 + $0x678] sm:$0xff]   ;;  %v11784_v10 = vld [vmem:[%s13974_s5 + $0x640] sm:$0xff]  }
0x230d   :  { %9311 = vmatprep.mubr.bf16.mxu0 %v8159_v31  ;;  %9351 = vmatprep.mubr.bf16.mxu1 %v8161_v45  ;;  %v11758_v25 = vld [vmem:[%s13974_s5 + $0x638] sm:$0xff]   ;;  %v8158_v31 = vpack.c.bf16 %v8142_v23, %v8142_v23 }
0x230e   :  { %v8010_v35 = vpop.f32.mrf.mxu0  ;;  %v8051_v9 = vpop.f32.mrf.mxu1  ;;  %v8160_v45 = vpack.c.bf16 %v8144_v27, %v8144_v27  ;;  %v11790_v27 = vld [vmem:[%s13974_s5 + $0x738] sm:$0xff]  }
0x230f   :  { %10970 = vmatpush3.bf16.msra.mxu0 %v11734_v8  ;;  %10992 = vmatpush3.bf16.msra.mxu1 %v11735_v28  ;;  %v8011_v21 = vadd.f32 %v8010_v35, %v7614_v2  ;;  %v8052_v22 = vadd.f32 %v8051_v9, %v7622_v4  ;;  %v11759_v8 = vld [vmem:[%s13974_s5 + $0x6b8] sm:$0xff]   ;;  %v11762_v9 = vld [vmem:[%s13974_s5 + $0x630] sm:$0xff]   ;;  %v11781_v2 = vld [vmem:[%s13974_s5 + $0x6c8] sm:$0xff]  }
0x2310   :  { %v8012_v38 = vpop.f32.mrf.mxu0  ;;  %v8053_v39 = vpop.f32.mrf.mxu1  ;;  %10971 = vmatprep.subr.bf16.mxu0 %v11736_v33  ;;  %10993 = vmatprep.subr.bf16.mxu1 %v11737_v34  ;;  %v11760_v33 = vld [vmem:[%s13974_s5 + $0x670] sm:$0xff]  }
0x2311   :  { %v8147_v24 = vmax.f32 %v8011_v21, 0.0  ;;  %v8149_v29 = vmax.f32 %v8052_v22, 0.0  ;;  %v11761_v34 = vld [vmem:[%s13974_s5 + $0x6f0] sm:$0xff]   ;;  %v11765_v38 = vld [vmem:[%s13974_s5 + $0x6e8] sm:$0xff]   ;;  %v11786_v21 = vld [vmem:[%s13974_s5 + $0x600] sm:$0xff]  }
0x2312   :  { %v8013_v42 = vpop.f32.mrf.mxu0  ;;  %v8054_v48 = vpop.f32.mrf.mxu1  ;;  %v11766_v39 = vld [vmem:[%s13974_s5 + $0x628] sm:$0xff]  }
0x2313   :  { %10972 = vmatpush3.bf16.msra.mxu0 %v11738_v49  ;;  %10994 = vmatpush3.bf16.msra.mxu1 %v11739_v36  ;;  %v8163_v28 = vpack.c.bf16 %v8147_v24, %v8147_v24  ;;  %v8165_v35 = vpack.c.bf16 %v8149_v29, %v8149_v29  ;;  %v11763_v49 = vld [vmem:[%s13974_s5 + $0x6b0] sm:$0xff]   ;;  %v11764_v36 = vld [vmem:[%s13974_s5 + $0x668] sm:$0xff]   ;;  %v11769_v42 = vld [vmem:[%s13974_s5 + $0x6e0] sm:$0xff]  }
0x2314   :  { %v13663_v55 = vpop.f32.mrf.mxu0  ;;  %v13665_v56 = vpop.f32.mrf.mxu1  ;;  %10973 = vmatprep.subr.bf16.mxu0 %v11740_v40  ;;  %10995 = vmatprep.subr.bf16.mxu1 %v11741_v41  ;;  %v11767_v40 = vld [vmem:[%s13974_s5 + $0x6a8] sm:$0xff]   ;;  %v11768_v41 = vld [vmem:[%s13974_s5 + $0x660] sm:$0xff]   ;;  %v11792_v29 = vld [vmem:[%s13974_s5 + $0x770] sm:$0xff]  }
0x2315   :  { %v11770_v48 = vld [vmem:[%s13974_s5 + $0x620] sm:$0xff]  }
0x2316   :  { %v13680_v62 = vpop.f32.mrf.mxu0  ;;  %v13682_v5 = vpop.f32.mrf.mxu1 }
0x2317   :  { %10974 = vmatpush3.bf16.msra.mxu0 %v11742_v50  ;;  %10996 = vmatpush3.bf16.msra.mxu1 %v11743_v60  ;;  %v11771_v50 = vld [vmem:[%s13974_s5 + $0x6a0] sm:$0xff]   ;;  %v11772_v60 = vld [vmem:[%s13974_s5 + $0x658] sm:$0xff]  }
0x2318   :  { %v8094_v16 = vpop.f32.mrf.mxu0  ;;  %v8135_v37 = vpop.f32.mrf.mxu1  ;;  %10975 = vmatprep.subr.bf16.mxu0 %v11744_v57  ;;  %10997 = vmatprep.subr.bf16.mxu1 %v11745_v59  ;;  %v7565_v57 = vunpack.c.l.bf16 %v13661_v54  ;;  %v11775_v59 = vld [vmem:[%s13974_s5 + $0x698] sm:$0xff]   ;;  %v11777_v54 = vld [vmem:[%s13974_s5 + $0x6d0] sm:$0xff]  }
0x2319   :  { %v11779_v37 = vld [vmem:[%s13974_s5 + $0x690] sm:$0xff]  }
0x231a   :  { %v8095_v63 = vpop.f32.mrf.mxu0  ;;  %v8136_v18 = vpop.f32.mrf.mxu1  ;;  %v7610_v16 = vrot.slane %v7565_v57, %v12565_v12  ;;  %v11810_v57 = vld [vmem:[%s13974_s5 + $0x710] sm:$0xff]  }
0x231b   :  { %10976 = vmatpush3.bf16.msra.mxu0 %v11746_v44  ;;  %10998 = vmatpush3.bf16.msra.mxu1 %v11747_v1  ;;  %v13788_v44 = vld [vmem:[%s13973_s4 + $0x270] sm:$0x11]  ;;  %v13796_v1 = vld [vmem:[%s13973_s4 + $0x278] sm:$0x11]  ;;  %v11782_v18 = vld [vmem:[%s13974_s5 + $0x608] sm:$0xff]  }
0x231c   :  { %10977 = vmatprep.subr.bf16.mxu0 %v11748_v17  ;;  %10999 = vmatprep.subr.bf16.mxu1 %v11749_v6  ;;  %v7570_v11 = vunpack.c.h.bf16 %v13788_v44  ;;  %v7572_v15 = vunpack.c.h.bf16 %v13796_v1  ;;  %v11780_v17 = vld [vmem:[%s13974_s5 + $0x648] sm:$0xff]   ;;  %v7618_v6 = vrot.slane %v7567_v61, %v12565_v12 }
0x231d   :  { %v11812_v61 = vld [vmem:[%s13974_s5 + $0x748] sm:$0xff]  }
0x231e   :  { %v7630_v4 = vrot.slane %v7570_v11, %v12565_v12  ;;  %v7638_v63 = vrot.slane %v7572_v15, %v12565_v12  ;;  %v8050_v19 = vadd.f32 %v13630_v32, %v7618_v6  ;;  %v11787_v32 = vld [vmem:[%s13974_s5 + $0x680] sm:$0xff]   ;;  %v11815_v15 = vld [vmem:[%s13974_s5 + $0x788] sm:$0xff]  }
0x231f   :  { %10978 = vmatpush3.bf16.msra.mxu0 %v11750_v3  ;;  %11000 = vmatpush3.bf16.msra.mxu1 %v11751_v47  ;;  %v8009_v3 = vadd.f32 %v13628_v30, %v7610_v16  ;;  %v11783_v47 = vld [vmem:[%s13974_s5 + $0x688] sm:$0xff]   ;;  %v11817_v16 = vld [vmem:[%s13974_s5 + $0x7c0] sm:$0xff]  }
0x2320   :  { %10979 = vmatprep.subr.bf16.mxu0 %v11752_v0  ;;  %11001 = vmatprep.subr.bf16.mxu1 %v11753_v20  ;;  %v11785_v0 = vld [vmem:[%s13974_s5 + $0x6c0] sm:$0xff]   ;;  %v8093_v20 = vadd.f32 %v13680_v62, %v7630_v4  ;;  %v8134_v30 = vadd.f32 %v13682_v5, %v7638_v63  ;;  %v11789_v62 = vld [vmem:[%s13974_s5 + $0x7f8] sm:$0xff]  }
0x2321   :  { %v8146_v22 = vmax.f32 %v8009_v3, 0.0 }
0x2322   :  { %v8151_v5 = vmax.f32 %v8093_v20, 0.0  ;;  %v8153_v23 = vmax.f32 %v8134_v30, 0.0 }
0x2323   :  { %10980 = vmatpush3.bf16.msra.mxu0 %v11754_v14  ;;  %11002 = vmatpush3.bf16.msra.mxu1 %v11755_v46  ;;  %v11788_v14 = vld [vmem:[%s13974_s5 + $0x778] sm:$0xff]   ;;  %v8148_v46 = vmax.f32 %v8050_v19, 0.0 }
0x2324   :  { %11009 = vmatprep.subr.bf16.mxu0 %v11756_v43  ;;  %11031 = vmatprep.subr.bf16.mxu1 %v11757_v26  ;;  %v8162_v43 = vpack.c.bf16 %v8146_v22, %v8146_v22  ;;  %v11791_v26 = vld [vmem:[%s13974_s5 + $0x7b8] sm:$0xff]  }
0x2325   :  { %v8164_v24 = vpack.c.bf16 %v8148_v46, %v8148_v46 }
0x2326   :  { %9312 = vmatmul.mubr.bf16.vlgmr.msra.gmra.mxu0 %v8158_v31  ;;  %9352 = vmatmul.mubr.bf16.vlgmr.msra.gmra.mxu1 %v8160_v45  ;;  %v11793_v31 = vld [vmem:[%s13974_s5 + $0x7f0] sm:$0xff]   ;;  %v8169_v45 = vpack.c.bf16 %v8153_v23, %v8153_v23 }
0x2327   :  { %11010 = vmatpush3.bf16.msra.mxu0 %v11758_v25  ;;  %9391 = vmatprep.mubr.bf16.mxu0 %v8163_v28  ;;  %v8167_v25 = vpack.c.bf16 %v8151_v5, %v8151_v5  ;;  %v11795_v28 = vld [vmem:[%s13974_s5 + $0x7b0] sm:$0xff]  }
0x2328   :  { %11032 = vmatpush3.bf16.msra.mxu1 %v11759_v8  ;;  %9431 = vmatprep.mubr.bf16.mxu1 %v8165_v35  ;;  %v11794_v8 = vld [vmem:[%s13974_s5 + $0x730] sm:$0xff]   ;;  %v11798_v35 = vld [vmem:[%s13974_s5 + $0x728] sm:$0xff]  }
0x2329   :  { %11011 = vmatprep.subr.bf16.mxu0 %v11760_v33  ;;  %11033 = vmatprep.subr.bf16.mxu1 %v11761_v34  ;;  %v11796_v33 = vld [vmem:[%s13974_s5 + $0x768] sm:$0xff]  }
0x232a   :  { %v11797_v34 = vld [vmem:[%s13974_s5 + $0x7e8] sm:$0xff]  }
0x232b   :  { %11012 = vmatpush3.bf16.msra.mxu0 %v11762_v9  ;;  %v11799_v9 = vld [vmem:[%s13974_s5 + $0x7a8] sm:$0xff]  }
0x232c   :  { %11034 = vmatpush3.bf16.msra.mxu1 %v11763_v49  ;;  %11013 = vmatprep.subr.bf16.mxu0 %v11764_v36  ;;  %v11800_v49 = vld [vmem:[%s13974_s5 + $0x760] sm:$0xff]  }
0x232d   :  { %11035 = vmatprep.subr.bf16.mxu1 %v11765_v38  ;;  %v11801_v36 = vld [vmem:[%s13974_s5 + $0x7e0] sm:$0xff]  }
0x232e   :  { %v11802_v38 = vld [vmem:[%s13974_s5 + $0x720] sm:$0xff]  }
0x232f   :  { %11014 = vmatpush3.bf16.msra.mxu0 %v11766_v39  ;;  %v11803_v39 = vld [vmem:[%s13974_s5 + $0x7a0] sm:$0xff]  }
0x2330   :  { %11036 = vmatpush3.bf16.msra.mxu1 %v11767_v40  ;;  %11015 = vmatprep.subr.bf16.mxu0 %v11768_v41  ;;  %v11804_v40 = vld [vmem:[%s13974_s5 + $0x758] sm:$0xff]  }
0x2331   :  { %11037 = vmatprep.subr.bf16.mxu1 %v11769_v42  ;;  %v11805_v41 = vld [vmem:[%s13974_s5 + $0x7d8] sm:$0xff]  }
0x2332   :  { %v11806_v42 = vld [vmem:[%s13974_s5 + $0x718] sm:$0xff]  }
0x2333   :  { %11016 = vmatpush3.bf16.msra.mxu0 %v11770_v48  ;;  %v7569_v48 = vunpack.c.l.bf16 %v13788_v44 }
0x2334   :  { %11038 = vmatpush3.bf16.msra.mxu1 %v11771_v50  ;;  %11017 = vmatprep.subr.bf16.mxu0 %v11772_v60  ;;  %v11807_v50 = vld [vmem:[%s13974_s5 + $0x798] sm:$0xff]   ;;  %v11808_v60 = vld [vmem:[%s13974_s5 + $0x750] sm:$0xff]  }
0x2335   :  { %11039 = vmatprep.subr.bf16.mxu1 %v11773_v51  ;;  %v7571_v51 = vunpack.c.l.bf16 %v13796_v1  ;;  %v11814_v1 = vld [vmem:[%s13974_s5 + $0x708] sm:$0xff]  }
0x2337   :  { %11018 = vmatpush3.bf16.msra.mxu0 %v11774_v53  ;;  %v11809_v53 = vld [vmem:[%s13974_s5 + $0x7d0] sm:$0xff]   ;;  %v7634_v44 = vrot.slane %v7571_v51, %v12565_v12 }
0x2338   :  { %11040 = vmatpush3.bf16.msra.mxu1 %v11775_v59  ;;  %11019 = vmatprep.subr.bf16.mxu0 %v11776_v58  ;;  %v7626_v59 = vrot.slane %v7569_v48, %v12565_v12  ;;  %v11811_v58 = vld [vmem:[%s13974_s5 + $0x790] sm:$0xff]   ;;  %v11816_v12 = vld [vmem:[%s13974_s5 + $0x740] sm:$0xff]  }
0x2339   :  { %11041 = vmatprep.subr.bf16.mxu1 %v11777_v54  ;;  %v11813_v54 = vld [vmem:[%s13974_s5 + $0x7c8] sm:$0xff]  }
0x233a   :  { %v8091_v11 = vadd.f32 %v13663_v55, %v7626_v59  ;;  %v11818_v55 = vld [vmem:[%s13974_s5 + $0x700] sm:$0xff]  }
0x233b   :  { %11020 = vmatpush3.bf16.msra.mxu0 %v11778_v52  ;;  %v8132_v52 = vadd.f32 %v13665_v56, %v7634_v44 }
0x233c   :  { %11042 = vmatpush3.bf16.msra.mxu1 %v11779_v37  ;;  %11021 = vmatprep.subr.bf16.mxu0 %v11780_v17  ;;  %v8150_v37 = vmax.f32 %v8091_v11, 0.0  ;;  %v11819_v17 = vld [vmem:[%s13974_s5 + $0x780] sm:$0xff]  }
0x233d   :  { %11043 = vmatprep.subr.bf16.mxu1 %v11781_v2  ;;  %v8152_v6 = vmax.f32 %v8132_v52, 0.0 }
0x233e   :  { %v8166_v56 = vpack.c.bf16 %v8150_v37, %v8150_v37 }
0x233f   :  { %11022 = vmatpush3.bf16.msra.mxu0 %v11782_v18  ;;  %v8168_v2 = vpack.c.bf16 %v8152_v6, %v8152_v6  ;;  %v10384_v18 = vld [vmem:[%s13971_s1 + $0x17] ss:$0 sm:$0xff] }
0x2340   :  { %11044 = vmatpush3.bf16.msra.mxu1 %v11783_v47  ;;  %11023 = vmatprep.subr.bf16.mxu0 %v11784_v10 }
0x2341   :  { %11045 = vmatprep.subr.bf16.mxu1 %v11785_v0 }
0x2343   :  { %11024 = vmatpush3.bf16.msra.mxu0 %v11786_v21 }
0x2344   :  { %11046 = vmatpush3.bf16.msra.mxu1 %v11787_v32  ;;  %11053 = vmatprep.subr.bf16.mxu0 %v11788_v14 }
0x2345   :  { %11075 = vmatprep.subr.bf16.mxu1 %v11789_v62 }
0x2346   :  { %9392 = vmatmul.mubr.bf16.vlgmr.msra.gmra.mxu0 %v8162_v43 }
0x2347   :  { %9432 = vmatmul.mubr.bf16.vlgmr.msra.gmra.mxu1 %v8164_v24  ;;  %11054 = vmatpush3.bf16.msra.mxu0 %v11790_v27 }
0x2348   :  { %9471 = vmatprep.mubr.bf16.mxu0 %v8167_v25  ;;  %11076 = vmatpush3.bf16.msra.mxu1 %v11791_v26 }
0x2349   :  { %9511 = vmatprep.mubr.bf16.mxu1 %v8169_v45  ;;  %11055 = vmatprep.subr.bf16.mxu0 %v11792_v29 }
0x234a   :  { %11077 = vmatprep.subr.bf16.mxu1 %v11793_v31 }
0x234b   :  { %11056 = vmatpush3.bf16.msra.mxu0 %v11794_v8 }
0x234c   :  { %11078 = vmatpush3.bf16.msra.mxu1 %v11795_v28  ;;  %11057 = vmatprep.subr.bf16.mxu0 %v11796_v33 }
0x234d   :  { %11079 = vmatprep.subr.bf16.mxu1 %v11797_v34 }
0x234f   :  { %11058 = vmatpush3.bf16.msra.mxu0 %v11798_v35 }
0x2350   :  { %11080 = vmatpush3.bf16.msra.mxu1 %v11799_v9  ;;  %11059 = vmatprep.subr.bf16.mxu0 %v11800_v49 }
0x2351   :  { %11081 = vmatprep.subr.bf16.mxu1 %v11801_v36 }
0x2353   :  { %11060 = vmatpush3.bf16.msra.mxu0 %v11802_v38 }
0x2354   :  { %11082 = vmatpush3.bf16.msra.mxu1 %v11803_v39  ;;  %11061 = vmatprep.subr.bf16.mxu0 %v11804_v40 }
0x2355   :  { %11083 = vmatprep.subr.bf16.mxu1 %v11805_v41 }
0x2357   :  { %11062 = vmatpush3.bf16.msra.mxu0 %v11806_v42 }
0x2358   :  { %11084 = vmatpush3.bf16.msra.mxu1 %v11807_v50  ;;  %11063 = vmatprep.subr.bf16.mxu0 %v11808_v60 }
0x2359   :  { %11085 = vmatprep.subr.bf16.mxu1 %v11809_v53 }
0x235b   :  { %11064 = vmatpush3.bf16.msra.mxu0 %v11810_v57 }
0x235c   :  { %11086 = vmatpush3.bf16.msra.mxu1 %v11811_v58  ;;  %11065 = vmatprep.subr.bf16.mxu0 %v11812_v61 }
0x235d   :  { %11087 = vmatprep.subr.bf16.mxu1 %v11813_v54 }
0x235f   :  { %11066 = vmatpush3.bf16.msra.mxu0 %v11814_v1 }
0x2360   :  { %11088 = vmatpush3.bf16.msra.mxu1 %v11815_v15  ;;  %11067 = vmatprep.subr.bf16.mxu0 %v11816_v12 }
0x2361   :  { %11089 = vmatprep.subr.bf16.mxu1 %v11817_v16 }
0x2363   :  { %11068 = vmatpush3.bf16.msra.mxu0 %v11818_v55 }
0x2364   :  { %11090 = vmatpush3.bf16.msra.mxu1 %v11819_v17 }
0x2366   :  { %9472 = vmatmul.mubr.bf16.vlgmr.msra.gmra.mxu0 %v8166_v56 }
0x2367   :  { %9512 = vmatmul.mubr.bf16.vlgmr.msra.gmra.mxu1 %v8168_v2 }
0x23c6   :  { %v10937_v4 = vpop.f32.mrf.mxu0  ;;  %v10959_v63 = vpop.f32.mrf.mxu1 }
0x23c8   :  { %v10938_v3 = vpop.f32.mrf.mxu0  ;;  %v10960_v47 = vpop.f32.mrf.mxu1 }
0x23c9   :  { %v10939_v10 = vadd.f32 %v10938_v3, %v10937_v4  ;;  %v10961_v19 = vadd.f32 %v10960_v47, %v10959_v63 }
0x23ca   :  { %v10940_v0 = vpop.f32.mrf.mxu0  ;;  %v10962_v20 = vpop.f32.mrf.mxu1 }
0x23cb   :  { %v9234_v30 = vadd.f32 %v10939_v10, %v10384_v18 }
0x23cc   :  { %v10941_v21 = vpop.f32.mrf.mxu0  ;;  %v10963_v22 = vpop.f32.mrf.mxu1 }
0x23cd   :  { %v9274_v32 = vadd.f32 %v10961_v19, %v9234_v30  ;;  %v10513_v22 = vld [vmem:[%s13971_s1 + $0x1a] ss:$0 sm:$0xff] }
0x23e6   :  { %v10981_v14 = vpop.f32.mrf.mxu0  ;;  %v11003_v46 = vpop.f32.mrf.mxu1 }
0x23e8   :  { %v10982_v62 = vpop.f32.mrf.mxu0  ;;  %v11004_v5 = vpop.f32.mrf.mxu1 }
0x23e9   :  { %v10983_v34 = vadd.f32 %v10982_v62, %v10981_v14  ;;  %v11005_v9 = vadd.f32 %v11004_v5, %v11003_v46  ;;  %v10514_v14 = vld [vmem:[%s13971_s1 + $0x1b] ss:$0 sm:$0xff]  ;;  %v10515_v62 = vld [vmem:[%s13971_s1 + $0x1c] ss:$0 sm:$0xff] }
0x23ea   :  { %v10984_v23 = vpop.f32.mrf.mxu0  ;;  %v11006_v27 = vpop.f32.mrf.mxu1 }
0x23eb   :  { %v9314_v35 = vadd.f32 %v10983_v34, %v9274_v32 }
0x23ec   :  { %v10985_v43 = vpop.f32.mrf.mxu0  ;;  %v11007_v26 = vpop.f32.mrf.mxu1 }
0x23ed   :  { %v9354_v36 = vadd.f32 %v11005_v9, %v9314_v35 }
0x2406   :  { %v11025_v24 = vpop.f32.mrf.mxu0 }
0x2407   :  { %v11047_v29 = vpop.f32.mrf.mxu1 }
0x2408   :  { %v11026_v25 = vpop.f32.mrf.mxu0 }
0x2409   :  { %v11048_v31 = vpop.f32.mrf.mxu1  ;;  %v11027_v49 = vadd.f32 %v11026_v25, %v11025_v24 }
0x240a   :  { %v11028_v45 = vpop.f32.mrf.mxu0  ;;  %v11049_v40 = vadd.f32 %v11048_v31, %v11047_v29 }
0x240b   :  { %v11050_v8 = vpop.f32.mrf.mxu1  ;;  %v9394_v38 = vadd.f32 %v11027_v49, %v9354_v36 }
0x240c   :  { %v11029_v28 = vpop.f32.mrf.mxu0 }
0x240d   :  { %v11051_v33 = vpop.f32.mrf.mxu1  ;;  %v9434_v48 = vadd.f32 %v11049_v40, %v9394_v38  ;;  %v10516_v28 = vld [vmem:[%s13971_s1 + $0x1d] ss:$0 sm:$0xff] }
0x2426   :  { %v11069_v39 = vpop.f32.mrf.mxu0 }
0x2427   :  { %v11091_v41 = vpop.f32.mrf.mxu1 }
0x2428   :  { %v11070_v42 = vpop.f32.mrf.mxu0 }
0x2429   :  { %v11071_v50 = vadd.f32 %v11070_v42, %v11069_v39  ;;  %v11092_v60 = vpop.f32.mrf.mxu1 }
0x242a   :  { %v11072_v51 = vpop.f32.mrf.mxu0  ;;  %v11093_v57 = vadd.f32 %v11092_v60, %v11091_v41 }
0x242b   :  { %v9474_v53 = vadd.f32 %v11071_v50, %v9434_v48  ;;  %v11094_v59 = vpop.f32.mrf.mxu1 }
0x242c   :  { %v11073_v58 = vpop.f32.mrf.mxu0 }
0x242d   :  { %v9514_v61 = vadd.f32 %v11093_v57, %v9474_v53  ;;  %v11095_v44 = vpop.f32.mrf.mxu1 }
0x242f   :  { %v9521_v54 = vrot.slane %v9514_v61, 2  ;;  %v9520_v1 = vrot.slane %v9514_v61, 1 }
0x2431   :  { %v9524_v11 = vadd.f32 %v9520_v1, %v13375_v7  ;;  %v9525_v15 = vadd.f32 %v9521_v54, %v13379_v13 }
0x2433   :  { %v9531_v12 = vsel %vm7461_vm4, %v9524_v11, 0.0  ;;  %v9528_v52 = vrot.slane %v9525_v15, 7 }
0x2434   :  { %9532 = vadd.xlane.f32.xlu1 %v9531_v12 }
0x2435   :  { %v9534_v16 = vsel %vm7465_vm5, %v9528_v52, 0.0 }
0x2436   :  { %9535 = vadd.xlane.f32.xlu0 %v9534_v16 }
0x24bd   :  { %v9533_v55 = vpop.xlane.xlu1 %9532 }
0x24be   :  { %v9537_v37 = vmul.f32 0.03125, %v9533_v55 }
0x24bf   :  { %v9536_v17 = vpop.xlane.xlu0 %9535 }
0x24c0   :  { %v9544_v6 = vsub.f32 %v9524_v11, %v9537_v37  ;;  %v9538_v56 = vmul.f32 0.03125, %v9536_v17 }
0x24c2   :  { %v9541_v2 = vrot.slane %v9538_v56, 1  ;;  %v9546_v4 = vmul.f32 %v9544_v6, %v9544_v6 }
0x24c4   :  { %v9545_v63 = vsub.f32 %v9525_v15, %v9541_v2  ;;  %v9553_v18 = vsel %vm7461_vm4, %v9546_v4, 0.0 }
0x24c5   :  { %9554 = vadd.xlane.f32.xlu1 %v9553_v18 }
0x24c6   :  { %v9547_v7 = vmul.f32 %v9545_v63, %v9545_v63 }
0x24c8   :  { %v9550_v13 = vrot.slane %v9547_v7, 7 }
0x24ca   :  { %v9556_v3 = vsel %vm7465_vm5, %v9550_v13, 0.0 }
0x24cb   :  { %9557 = vadd.xlane.f32.xlu0 %v9556_v3 }
0x254e   :  { %v9555_v47 = vpop.xlane.xlu1 %9554 }
0x254f   :  { %v9559_v10 = vmul.f32 0.03125, %v9555_v47 }
0x2551   :  { %v9561_v19 = vadd.f32 1e-05, %v9559_v10 }
0x2553   :  { %11896 = vrsqrt.f32 %v9561_v19 }
0x2554   :  { %v9558_v0 = vpop.xlane.xlu0 %9557 }
0x2555   :  { %v9560_v20 = vmul.f32 0.03125, %v9558_v0 }
0x2557   :  { %v9562_v30 = vadd.f32 1e-05, %v9560_v20 }
0x2559   :  { %11898 = vrsqrt.f32 %v9562_v30 }
0x2560   :  { %v11897_v21 = vpop.eup %11896 }
0x2561   :  { %v9570_v32 = vmul.f32 %v11897_v21, %v9544_v6 }
0x2563   :  { %v9576_v46 = vmul.f32 %v10513_v22, %v9570_v32 }
0x2565   :  { %v9582_v5 = vadd.f32 %v10514_v14, %v9576_v46 }
0x2566   :  { %v11899_v23 = vpop.eup %11898 }
0x2567   :  { %v9567_v27 = vrot.slane %v11899_v23, 1  ;;  %v9590_v43 = vmul.f32 %v10515_v62, %v9582_v5 }
0x2569   :  { %v9571_v26 = vmul.f32 %v9567_v27, %v9545_v63  ;;  %v9597_v24 = vsel %vm7461_vm4, %v9590_v43, 0.0 }
0x256a   :  { %9598 = vadd.xlane.f32.xlu0 %v9597_v24 }
0x256b   :  { %v9577_v29 = vmul.f32 %v10513_v22, %v9571_v26 }
0x256d   :  { %v9583_v25 = vadd.f32 %v10514_v14, %v9577_v29 }
0x256f   :  { %v9591_v31 = vmul.f32 %v10515_v62, %v9583_v25 }
0x2571   :  { %v9594_v45 = vrot.slane %v9591_v31, 7 }
0x2573   :  { %v9600_v8 = vsel %vm7465_vm5, %v9594_v45, 0.0 }
0x2574   :  { %9601 = vadd.xlane.f32.xlu1 %v9600_v8 }
0x25f3   :  { %v9599_v33 = vpop.xlane.xlu0 %9598 }
0x25f4   :  { %v9607_v34 = vadd.f32 %v10516_v28, %v9599_v33 }
0x25f6   :  { %9610 = vst.msk [vmem:[%s13975_s6 - $0x7] sm:$0x80] %vm9609_vm6, %v9607_v34 }
0x25fd   :  { %v9602_v35 = vpop.xlane.xlu1 %9601 }
0x25fe   :  { %v9608_v9 = vadd.f32 %v10516_v28, %v9602_v35 }
0x2600   :  { %9612 = vst.msk [vmem:[%s13975_s6 + $0x1] sm:$0x1] %vm9611_vm7, %v9608_v9 }

</bundles_post_ra>
